<compile_context>
chip_gen: v7x
topology: tpu7x:2x2x1
jax: 0.10.0
libtpu: 0.0.40
codegen_flags: <defaults>
</compile_context>

<pallas_src>
import functools

import jax
import jax.numpy as jnp
from jax.experimental import pallas as pl
from jax.experimental.pallas import tpu as pltpu


def _round_up(n, m):
    return (n + m - 1) // m * m


# ---------------------------------------------------------------------------
# Probe: can we request single-buffered (revisited) blocks on this JAX build?
# ---------------------------------------------------------------------------
@functools.lru_cache(maxsize=1)
def _single_buffer_supported():
    if not hasattr(pl, "Buffered"):
        return False
    try:
        def k(x_ref, o_ref):
            o_ref[...] = x_ref[...]
        f = pl.pallas_call(
            k,
            out_shape=jax.ShapeDtypeStruct((8, 128), jnp.float32),
            grid=(1,),
            in_specs=[pl.BlockSpec((8, 128), lambda i: (0, 0),
                                   pipeline_mode=pl.Buffered(1))],
            out_specs=pl.BlockSpec((8, 128), lambda i: (0, 0)),
        )
        jax.jit(f).lower(jnp.zeros((8, 128), jnp.float32)).compile()
        return True
    except Exception:
        return False


def _spec(shape, index_map, single_buffer):
    if single_buffer and _single_buffer_supported():
        return pl.BlockSpec(shape, index_map, pipeline_mode=pl.Buffered(1))
    return pl.BlockSpec(shape, index_map)


# ---------------------------------------------------------------------------
# Kernel A: all weights resident in VMEM, 1-D grid over batch tiles.
# ---------------------------------------------------------------------------
def _make_resident_kernel(num_couplings, nmid, Hp, Kp, compute_dtype):
    def kernel(xe_ref, xo_ref, ese_ref, eso_ref, w0_ref, wm_ref, wl_ref, b_ref,
               ze_ref, zo_ref):
        xe = xe_ref[...]          # (bm, Hp) f32, stays on-chip across couplings
        xo = xo_ref[...]
        for c in range(num_couplings):
            x1, x2 = (xe, xo) if c % 2 == 0 else (xo, xe)
            h = jnp.dot(x1.astype(compute_dtype), w0_ref[c],
                        preferred_element_type=jnp.float32)
            h = jnp.maximum(h + b_ref[c, 0:1, :Kp], 0.0)
            for j in range(nmid):
                h = jnp.dot(h.astype(compute_dtype), wm_ref[c, j],
                            preferred_element_type=jnp.float32)
                h = jnp.maximum(h + b_ref[c, j + 1:j + 2, :Kp], 0.0)
            h = jnp.dot(h.astype(compute_dtype), wl_ref[c],
                        preferred_element_type=jnp.float32)
            h = h + b_ref[c, nmid + 1:nmid + 2, :Hp]
            xe, xo = x1, x2 + h   # coupling update (matches torch swap semantics)
        # Scale epilogue: exp(s) factors precomputed outside -> pure VPU multiply.
        ze_ref[...] = ese_ref[...] * xe
        zo_ref[...] = eso_ref[...] * xo
    return kernel


# ---------------------------------------------------------------------------
# Kernel B: weights streamed per coupling over an inner 'arbitrary' grid axis;
# activation halves carried in VMEM scratch (v7x / module-default sizes).
# ---------------------------------------------------------------------------
def _make_streamed_kernel(num_couplings, nmid, Hp, Kp, compute_dtype):
    def kernel(xe_ref, xo_ref, ese_ref, eso_ref, w0_ref, wm_ref, wl_ref, b_ref,
               ze_ref, zo_ref, xe_s, xo_s):
        c = pl.program_id(1)

        @pl.when(c == 0)
        def _():
            xe_s[...] = xe_ref[...]
            xo_s[...] = xo_ref[...]

        even = (c % 2) == 0
        xe = xe_s[...]
        xo = xo_s[...]
        x1 = jnp.where(even, xe, xo)
        x2 = jnp.where(even, xo, xe)

        h = jnp.dot(x1.astype(compute_dtype), w0_ref[0],
                    preferred_element_type=jnp.float32)
        h = jnp.maximum(h + b_ref[0, 0:1, :Kp], 0.0)
        for j in range(nmid):
            h = jnp.dot(h.astype(compute_dtype), wm_ref[0, j],
                        preferred_element_type=jnp.float32)
            h = jnp.maximum(h + b_ref[0, j + 1:j + 2, :Kp], 0.0)
        h = jnp.dot(h.astype(compute_dtype), wl_ref[0],
                    preferred_element_type=jnp.float32)
        h = h + b_ref[0, nmid + 1:nmid + 2, :Hp]

        xe_s[...] = x1
        xo_s[...] = x2 + h

        @pl.when(c == num_couplings - 1)
        def _():
            ze_ref[...] = ese_ref[...] * xe_s[...]
            zo_ref[...] = eso_ref[...] * xo_s[...]
    return kernel


# ---------------------------------------------------------------------------
# Parameter packing (outside jit): pad to lane multiples, stack, cast ONCE.
# ---------------------------------------------------------------------------
def pack_params(mlp_params, s, compute_dtype=jnp.bfloat16):
    C = len(mlp_params)
    L = len(mlp_params[0])
    nmid = L - 2
    half, hidden = mlp_params[0][0][0].shape
    Hp = _round_up(half, 128)
    Kp = _round_up(hidden, 128)
    Dmax = max(Hp, Kp)

    def padw(w, r, c):
        return jnp.pad(w, ((0, r - w.shape[0]), (0, c - w.shape[1])))

    def padb(b):
        b = b.reshape(-1)
        return jnp.pad(b, (0, Dmax - b.shape[0]))

    w0 = jnp.stack([padw(lyr[0][0], Hp, Kp) for lyr in mlp_params]).astype(compute_dtype)
    wm = jnp.stack([jnp.stack([padw(lyr[1 + j][0], Kp, Kp) for j in range(nmid)])
                    for lyr in mlp_params]).astype(compute_dtype)
    wl = jnp.stack([padw(lyr[L - 1][0], Kp, Hp) for lyr in mlp_params]).astype(compute_dtype)
    bias = jnp.stack([jnp.stack([padb(lyr[j][1]) for j in range(L)])
                      for lyr in mlp_params]).astype(jnp.float32)

    exp_se = jnp.pad(jnp.exp(s[::2]), (0, Hp - half)).reshape(1, Hp).astype(jnp.float32)
    exp_so = jnp.pad(jnp.exp(s[1::2]), (0, Hp - half)).reshape(1, Hp).astype(jnp.float32)
    log_jac = jnp.sum(s)
    return dict(w0=w0, wm=wm, wl=wl, b=bias,
                exp_se=exp_se, exp_so=exp_so, log_jac=log_jac)


# ---------------------------------------------------------------------------
# Wrapper: mirrors NICE.forward -> (z, log_jacobian)
# ---------------------------------------------------------------------------
def nice_forward(x, packed, *, block_m=256, weight_mode="auto"):
    bsz, data_dim = x.shape
    half = data_dim // 2

    w0, wm, wl, bias = packed["w0"], packed["wm"], packed["wl"], packed["b"]
    exp_se, exp_so = packed["exp_se"], packed["exp_so"]
    log_jac = packed["log_jac"]
    C, Hp, Kp = w0.shape
    nmid = wm.shape[1]
    L = bias.shape[1]
    compute_dtype = w0.dtype

    # De-interleave ONCE (layout glue); kernel works on contiguous halves.
    # TODO(synk): if profiles show this strided split + final interleave as
    # separate HBM passes, store activations pre-split upstream instead of
    # doing a stride-2 lane shuffle inside the kernel (XLU-expensive).
    xe = x[:, ::2].astype(jnp.float32)
    xo = x[:, 1::2].astype(jnp.float32)
    if Hp != half:
        xe = jnp.pad(xe, ((0, 0), (0, Hp - half)))
        xo = jnp.pad(xo, ((0, 0), (0, Hp - half)))

    # Batch tiling: multiple of 8; keep >= 2 grid steps (megacore / 2-TC chips).
    bm = min(block_m, _round_up(bsz, 8))
    if _round_up(bsz, bm) // bm < 2 and bsz > 8:
        bm = _round_up((bsz + 1) // 2, 8)
    padded = _round_up(bsz, bm)
    grid_m = padded // bm
    if padded != bsz:
        # Padded rows run through the MLP and are sliced off (wasted FLOPs only).
        xe = jnp.pad(xe, ((0, padded - bsz), (0, 0)))
        xo = jnp.pad(xo, ((0, padded - bsz), (0, 0)))

    # Per-generation VMEM budget (v5e/v6e ~128 MiB, v7x ~64 MiB per TC).
    try:
        vmem_cap = int(pltpu.get_tpu_info().vmem_capacity_bytes)
    except Exception:
        vmem_cap = 64 * 1024 * 1024
    vmem_limit = int(0.9 * vmem_cap)

    w_bytes = ((w0.size + wm.size + wl.size) * jnp.dtype(compute_dtype).itemsize
               + bias.size * 4)
    act_bytes = (6 * bm * Hp + 2 * bm * Kp) * 4
    if weight_mode == "auto":
        weight_mode = ("resident"
                       if w_bytes + act_bytes < int(0.55 * vmem_cap) else "stream")

    out_shape = (jax.ShapeDtypeStruct((padded, Hp), jnp.float32),
                 jax.ShapeDtypeStruct((padded, Hp), jnp.float32))

    if weight_mode == "resident":
        row = pl.BlockSpec((bm, Hp), lambda i: (i, 0))
        in_specs = [
            row, row,
            _spec((1, Hp), lambda i: (0, 0), True),
            _spec((1, Hp), lambda i: (0, 0), True),
            _spec(w0.shape, lambda i: (0, 0, 0), True),
            _spec(wm.shape, lambda i: (0, 0, 0, 0), True),
            _spec(wl.shape, lambda i: (0, 0, 0), True),
            _spec(bias.shape, lambda i: (0, 0, 0), True),
        ]
        out_specs = [row, row]
        grid = (grid_m,)
        scratch = ()
        kernel = _make_resident_kernel(C, nmid, Hp, Kp, compute_dtype)
        semantics = ("parallel",)
    else:  # "stream": weights auto-pipelined one coupling at a time
        row = pl.BlockSpec((bm, Hp), lambda i, c: (i, 0))
        in_specs = [
            row, row,
            _spec((1, Hp), lambda i, c: (0, 0), True),
            _spec((1, Hp), lambda i, c: (0, 0), True),
            pl.BlockSpec((1, Hp, Kp), lambda i, c: (c, 0, 0)),
            pl.BlockSpec((1, nmid, Kp, Kp), lambda i, c: (c, 0, 0, 0)),
            pl.BlockSpec((1, Kp, Hp), lambda i, c: (c, 0, 0)),
            pl.BlockSpec((1, L, bias.shape[2]), lambda i, c: (c, 0, 0)),
        ]
        out_specs = [row, row]
        grid = (grid_m, C)
        scratch = (pltpu.VMEM((bm, Hp), jnp.float32),
                   pltpu.VMEM((bm, Hp), jnp.float32))
        kernel = _make_streamed_kernel(C, nmid, Hp, Kp, compute_dtype)
        semantics = ("parallel", "arbitrary")

    ze, zo = pl.pallas_call(
        kernel,
        out_shape=out_shape,
        grid_spec=pltpu.PrefetchScalarGridSpec(
            num_scalar_prefetch=0,
            grid=grid,
            in_specs=in_specs,
            out_specs=out_specs,
            scratch_shapes=scratch),
        compiler_params=pltpu.CompilerParams(
            dimension_semantics=semantics,
            vmem_limit_bytes=vmem_limit),
    )(xe, xo, exp_se, exp_so, w0, wm, wl, bias)

    ze = ze[:bsz, :half]
    zo = zo[:bsz, :half]
    # Re-interleave ONCE at the very end.
    z = jnp.stack([ze, zo], axis=-1).reshape(bsz, data_dim)
    return z, log_jac


# ---------------------------------------------------------------------------
# Pure-JAX reference (verification; compute_dtype mirrors the kernel path)
# ---------------------------------------------------------------------------
def nice_reference(x, mlp_params, s, compute_dtype=jnp.float32):
    prec = jax.lax.Precision.HIGHEST if compute_dtype == jnp.float32 else None
    for i, layer_params in enumerate(mlp_params):
        x1 = x[:, ::2] if i % 2 == 0 else x[:, 1::2]
        x2 = x[:, 1::2] if i % 2 == 0 else x[:, ::2]
        h = x1
        n = len(layer_params)
        for j, (w, b) in enumerate(layer_params):
            h = jnp.dot(h.astype(compute_dtype), w.astype(compute_dtype),
                        preferred_element_type=jnp.float32,
                        precision=prec) + b.reshape(-1)
            if j < n - 1:
                h = jnp.maximum(h, 0.0)
        xnew = jnp.zeros_like(x)
        xnew = xnew.at[:, ::2].set(x1).at[:, 1::2].set(x2 + h)
        x = xnew
    return jnp.exp(s) * x, jnp.sum(s)


# ---------------------------------------------------------------------------
# Deterministic parameter init (synthetic, matching module layer structure)
# ---------------------------------------------------------------------------
def init_params(key, data_dim, hidden_dim, nice_size):
    half = data_dim // 2
    dims = [(half, hidden_dim)] + [(hidden_dim, hidden_dim)] * 4 + [(hidden_dim, half)]
    mlp_params = []
    for _ in range(nice_size):
        layers = []
        for (din, dout) in dims:
            key, kw, kb = jax.random.split(key, 3)
            scale = 1.0 / jnp.sqrt(jnp.float32(din))
            w = jax.random.normal(kw, (din, dout), jnp.float32) * scale
            b = jax.random.normal(kb, (1, dout), jnp.float32) * scale
            layers.append((w, b))
        mlp_params.append(layers)
    key, ks = jax.random.split(key)
    s = jax.random.normal(ks, (data_dim,), jnp.float32) * 0.1
    return mlp_params, s


# ---------------------------------------------------------------------------
if __name__ == "__main__":
    _single_buffer_supported()   # populate probe cache before jit tracing

    # --- config A: lane-multiple dims, batch tiling exercises megacore grid ---
    batch, data_dim, hidden_dim, nice_size = 256, 256, 128, 4
    key = jax.random.PRNGKey(0)
    key, kx = jax.random.split(key)
    x = jax.random.normal(kx, (batch, data_dim), jnp.float32)
    mlp_params, s = init_params(key, data_dim, hidden_dim, nice_size)

    packed_bf16 = pack_params(mlp_params, s, jnp.bfloat16)   # pre-cast ONCE
    packed_f32 = pack_params(mlp_params, s, jnp.float32)

    fwd_resident = jax.jit(functools.partial(nice_forward, weight_mode="resident"))
    fwd_stream = jax.jit(functools.partial(nice_forward, weight_mode="stream"))

    z_ref_bf16, lj_ref = nice_reference(x, mlp_params, s, jnp.bfloat16)
    z_ref_f32, _ = nice_reference(x, mlp_params, s, jnp.float32)

    # default bf16 path, resident weights
    z, lj = fwd_resident(x, packed_bf16)
    z, lj = jax.block_until_ready(z), jax.block_until_ready(lj)
    assert jnp.allclose(z, z_ref_bf16, atol=2e-2, rtol=2e-2), "bf16 resident mismatch"
    assert jnp.allclose(lj, lj_ref, atol=1e-5, rtol=1e-5), "log_jacobian mismatch"

    # streamed-weights path (v7x / module-default sizes) — same semantics
    z2, _ = fwd_stream(x, packed_bf16)
    z2 = jax.block_until_ready(z2)
    assert jnp.allclose(z2, z_ref_bf16, atol=2e-2, rtol=2e-2), "bf16 streamed mismatch"

    # f32 path (exact module semantics)
    z3, _ = fwd_resident(x, packed_f32)
    z3 = jax.block_until_ready(z3)
    assert jnp.allclose(z3, z_ref_f32, atol=2e-2, rtol=2e-2), "f32 resident mismatch"

    # --- config B: non-lane-multiple dims -> exercises 128-padding path ---
    batch_b, data_dim_b, hidden_b = 10, 56, 40
    key, kxb = jax.random.split(key)
    xb = jax.random.normal(kxb, (batch_b, data_dim_b), jnp.float32)
    mlp_b, s_b = init_params(key, data_dim_b, hidden_b, nice_size)
    packed_b = pack_params(mlp_b, s_b, jnp.bfloat16)
    zb, ljb = fwd_resident(xb, packed_b)
    zb = jax.block_until_ready(zb)
    zb_ref, ljb_ref = nice_reference(xb, mlp_b, s_b, jnp.bfloat16)
    assert jnp.allclose(zb, zb_ref, atol=2e-2, rtol=2e-2), "padded-dims mismatch"
    assert jnp.allclose(ljb, ljb_ref, atol=1e-5, rtol=1e-5), "padded log_jac mismatch"

    print("KERNEL_OK")
</pallas_src>

<mosaic_0001>
module attributes {stable_mosaic.version = 11 : i64} {
  func.func @kernel(%arg0: i32, %arg1: memref<128x128xf32, #tpu.memory_space<vmem>>, %arg2: memref<128x128xf32, #tpu.memory_space<vmem>>, %arg3: memref<1x128xf32, #tpu.memory_space<vmem>>, %arg4: memref<1x128xf32, #tpu.memory_space<vmem>>, %arg5: memref<4x128x128xbf16, #tpu.memory_space<vmem>>, %arg6: memref<4x4x128x128xbf16, #tpu.memory_space<vmem>>, %arg7: memref<4x128x128xbf16, #tpu.memory_space<vmem>>, %arg8: memref<4x6x128xf32, #tpu.memory_space<vmem>>, %arg9: memref<128x128xf32, #tpu.memory_space<vmem>>, %arg10: memref<128x128xf32, #tpu.memory_space<vmem>>) attributes {dimension_semantics = [#tpu.dimension_semantics<parallel>], iteration_bounds = array<i64: 2>, scalar_prefetch = 0 : i64, scratch_operands = 0 : i64, tpu.core_type = #tpu.core_type<tc>, window_params = [{transform_indices = @transform_0, window_bounds = array<i64: 128, 128>}, {transform_indices = @transform_1, window_bounds = array<i64: 128, 128>}, {pipeline_mode = #tpu.pipeline_mode<synchronous>, transform_indices = @transform_2, window_bounds = array<i64: 1, 128>}, {pipeline_mode = #tpu.pipeline_mode<synchronous>, transform_indices = @transform_3, window_bounds = array<i64: 1, 128>}, {pipeline_mode = #tpu.pipeline_mode<synchronous>, transform_indices = @transform_4, window_bounds = array<i64: 4, 128, 128>}, {pipeline_mode = #tpu.pipeline_mode<synchronous>, transform_indices = @transform_5, window_bounds = array<i64: 4, 4, 128, 128>}, {pipeline_mode = #tpu.pipeline_mode<synchronous>, transform_indices = @transform_6, window_bounds = array<i64: 4, 128, 128>}, {pipeline_mode = #tpu.pipeline_mode<synchronous>, transform_indices = @transform_7, window_bounds = array<i64: 4, 6, 128>}, {transform_indices = @transform_8, window_bounds = array<i64: 128, 128>}, {transform_indices = @transform_9, window_bounds = array<i64: 128, 128>}]} {
    %c0 = arith.constant 0 : index
    %c0_0 = arith.constant 0 : index
    %0 = vector.load %arg1[%c0, %c0_0] : memref<128x128xf32, #tpu.memory_space<vmem>>, vector<128x128xf32>
    %c0_1 = arith.constant 0 : index
    %c0_2 = arith.constant 0 : index
    %1 = vector.load %arg2[%c0_1, %c0_2] : memref<128x128xf32, #tpu.memory_space<vmem>>, vector<128x128xf32>
    %2 = arith.truncf %0 : vector<128x128xf32> to vector<128x128xbf16>
    %c0_3 = arith.constant 0 : index
    %c0_4 = arith.constant 0 : index
    %c0_5 = arith.constant 0 : index
    %3 = vector.load %arg5[%c0_3, %c0_4, %c0_5] : memref<4x128x128xbf16, #tpu.memory_space<vmem>>, vector<1x128x128xbf16>
    %4 = vector.shape_cast %3 : vector<1x128x128xbf16> to vector<128x128xbf16>
    %cst = arith.constant dense<0.000000e+00> : vector<128x128xf32>
    %5 = tpu.matmul %2, %4, %cst {dimension_numbers = #tpu.dot_dimension_numbers<[1], [0], [0], [1], [0, 0, 1, 1], [], []>} : vector<128x128xbf16>, vector<128x128xbf16>, vector<128x128xf32> -> vector<128x128xf32>
    %c0_6 = arith.constant 0 : index
    %c0_7 = arith.constant 0 : index
    %c0_8 = arith.constant 0 : index
    %6 = vector.load %arg8[%c0_6, %c0_7, %c0_8] : memref<4x6x128xf32, #tpu.memory_space<vmem>>, vector<1x1x128xf32>
    %7 = vector.shape_cast %6 : vector<1x1x128xf32> to vector<1x128xf32>
    %8 = vector.broadcast %7 : vector<1x128xf32> to vector<128x128xf32>
    %9 = arith.addf %5, %8 : vector<128x128xf32>
    %cst_9 = arith.constant 0.000000e+00 : f32
    %10 = vector.broadcast %cst_9 : f32 to vector<128x128xf32>
    %11 = arith.maximumf %9, %10 : vector<128x128xf32>
    %12 = arith.truncf %11 : vector<128x128xf32> to vector<128x128xbf16>
    %c0_10 = arith.constant 0 : index
    %c0_11 = arith.constant 0 : index
    %c0_12 = arith.constant 0 : index
    %c0_13 = arith.constant 0 : index
    %13 = vector.load %arg6[%c0_10, %c0_11, %c0_12, %c0_13] : memref<4x4x128x128xbf16, #tpu.memory_space<vmem>>, vector<1x1x128x128xbf16>
    %14 = vector.shape_cast %13 : vector<1x1x128x128xbf16> to vector<128x128xbf16>
    %cst_14 = arith.constant dense<0.000000e+00> : vector<128x128xf32>
    %15 = tpu.matmul %12, %14, %cst_14 {dimension_numbers = #tpu.dot_dimension_numbers<[1], [0], [0], [1], [0, 0, 1, 1], [], []>} : vector<128x128xbf16>, vector<128x128xbf16>, vector<128x128xf32> -> vector<128x128xf32>
    %c0_15 = arith.constant 0 : index
    %c1 = arith.constant 1 : index
    %c0_16 = arith.constant 0 : index
    %16 = vector.load %arg8[%c0_15, %c1, %c0_16] : memref<4x6x128xf32, #tpu.memory_space<vmem>>, vector<1x1x128xf32>
    %17 = vector.shape_cast %16 : vector<1x1x128xf32> to vector<1x128xf32>
    %18 = vector.broadcast %17 : vector<1x128xf32> to vector<128x128xf32>
    %19 = arith.addf %15, %18 : vector<128x128xf32>
    %cst_17 = arith.constant 0.000000e+00 : f32
    %20 = vector.broadcast %cst_17 : f32 to vector<128x128xf32>
    %21 = arith.maximumf %19, %20 : vector<128x128xf32>
    %22 = arith.truncf %21 : vector<128x128xf32> to vector<128x128xbf16>
    %c0_18 = arith.constant 0 : index
    %c1_19 = arith.constant 1 : index
    %c0_20 = arith.constant 0 : index
    %c0_21 = arith.constant 0 : index
    %23 = vector.load %arg6[%c0_18, %c1_19, %c0_20, %c0_21] : memref<4x4x128x128xbf16, #tpu.memory_space<vmem>>, vector<1x1x128x128xbf16>
    %24 = vector.shape_cast %23 : vector<1x1x128x128xbf16> to vector<128x128xbf16>
    %cst_22 = arith.constant dense<0.000000e+00> : vector<128x128xf32>
    %25 = tpu.matmul %22, %24, %cst_22 {dimension_numbers = #tpu.dot_dimension_numbers<[1], [0], [0], [1], [0, 0, 1, 1], [], []>} : vector<128x128xbf16>, vector<128x128xbf16>, vector<128x128xf32> -> vector<128x128xf32>
    %c0_23 = arith.constant 0 : index
    %c2 = arith.constant 2 : index
    %c0_24 = arith.constant 0 : index
    %26 = vector.load %arg8[%c0_23, %c2, %c0_24] : memref<4x6x128xf32, #tpu.memory_space<vmem>>, vector<1x1x128xf32>
    %27 = vector.shape_cast %26 : vector<1x1x128xf32> to vector<1x128xf32>
    %28 = vector.broadcast %27 : vector<1x128xf32> to vector<128x128xf32>
    %29 = arith.addf %25, %28 : vector<128x128xf32>
    %cst_25 = arith.constant 0.000000e+00 : f32
    %30 = vector.broadcast %cst_25 : f32 to vector<128x128xf32>
    %31 = arith.maximumf %29, %30 : vector<128x128xf32>
    %32 = arith.truncf %31 : vector<128x128xf32> to vector<128x128xbf16>
    %c0_26 = arith.constant 0 : index
    %c2_27 = arith.constant 2 : index
    %c0_28 = arith.constant 0 : index
    %c0_29 = arith.constant 0 : index
    %33 = vector.load %arg6[%c0_26, %c2_27, %c0_28, %c0_29] : memref<4x4x128x128xbf16, #tpu.memory_space<vmem>>, vector<1x1x128x128xbf16>
    %34 = vector.shape_cast %33 : vector<1x1x128x128xbf16> to vector<128x128xbf16>
    %cst_30 = arith.constant dense<0.000000e+00> : vector<128x128xf32>
    %35 = tpu.matmul %32, %34, %cst_30 {dimension_numbers = #tpu.dot_dimension_numbers<[1], [0], [0], [1], [0, 0, 1, 1], [], []>} : vector<128x128xbf16>, vector<128x128xbf16>, vector<128x128xf32> -> vector<128x128xf32>
    %c0_31 = arith.constant 0 : index
    %c3 = arith.constant 3 : index
    %c0_32 = arith.constant 0 : index
    %36 = vector.load %arg8[%c0_31, %c3, %c0_32] : memref<4x6x128xf32, #tpu.memory_space<vmem>>, vector<1x1x128xf32>
    %37 = vector.shape_cast %36 : vector<1x1x128xf32> to vector<1x128xf32>
    %38 = vector.broadcast %37 : vector<1x128xf32> to vector<128x128xf32>
    %39 = arith.addf %35, %38 : vector<128x128xf32>
    %cst_33 = arith.constant 0.000000e+00 : f32
    %40 = vector.broadcast %cst_33 : f32 to vector<128x128xf32>
    %41 = arith.maximumf %39, %40 : vector<128x128xf32>
    %42 = arith.truncf %41 : vector<128x128xf32> to vector<128x128xbf16>
    %c0_34 = arith.constant 0 : index
    %c3_35 = arith.constant 3 : index
    %c0_36 = arith.constant 0 : index
    %c0_37 = arith.constant 0 : index
    %43 = vector.load %arg6[%c0_34, %c3_35, %c0_36, %c0_37] : memref<4x4x128x128xbf16, #tpu.memory_space<vmem>>, vector<1x1x128x128xbf16>
    %44 = vector.shape_cast %43 : vector<1x1x128x128xbf16> to vector<128x128xbf16>
    %cst_38 = arith.constant dense<0.000000e+00> : vector<128x128xf32>
    %45 = tpu.matmul %42, %44, %cst_38 {dimension_numbers = #tpu.dot_dimension_numbers<[1], [0], [0], [1], [0, 0, 1, 1], [], []>} : vector<128x128xbf16>, vector<128x128xbf16>, vector<128x128xf32> -> vector<128x128xf32>
    %c0_39 = arith.constant 0 : index
    %c4 = arith.constant 4 : index
    %c0_40 = arith.constant 0 : index
    %46 = vector.load %arg8[%c0_39, %c4, %c0_40] : memref<4x6x128xf32, #tpu.memory_space<vmem>>, vector<1x1x128xf32>
    %47 = vector.shape_cast %46 : vector<1x1x128xf32> to vector<1x128xf32>
    %48 = vector.broadcast %47 : vector<1x128xf32> to vector<128x128xf32>
    %49 = arith.addf %45, %48 : vector<128x128xf32>
    %cst_41 = arith.constant 0.000000e+00 : f32
    %50 = vector.broadcast %cst_41 : f32 to vector<128x128xf32>
    %51 = arith.maximumf %49, %50 : vector<128x128xf32>
    %52 = arith.truncf %51 : vector<128x128xf32> to vector<128x128xbf16>
    %c0_42 = arith.constant 0 : index
    %c0_43 = arith.constant 0 : index
    %c0_44 = arith.constant 0 : index
    %53 = vector.load %arg7[%c0_42, %c0_43, %c0_44] : memref<4x128x128xbf16, #tpu.memory_space<vmem>>, vector<1x128x128xbf16>
    %54 = vector.shape_cast %53 : vector<1x128x128xbf16> to vector<128x128xbf16>
    %cst_45 = arith.constant dense<0.000000e+00> : vector<128x128xf32>
    %55 = tpu.matmul %52, %54, %cst_45 {dimension_numbers = #tpu.dot_dimension_numbers<[1], [0], [0], [1], [0, 0, 1, 1], [], []>} : vector<128x128xbf16>, vector<128x128xbf16>, vector<128x128xf32> -> vector<128x128xf32>
    %c0_46 = arith.constant 0 : index
    %c5 = arith.constant 5 : index
    %c0_47 = arith.constant 0 : index
    %56 = vector.load %arg8[%c0_46, %c5, %c0_47] : memref<4x6x128xf32, #tpu.memory_space<vmem>>, vector<1x1x128xf32>
    %57 = vector.shape_cast %56 : vector<1x1x128xf32> to vector<1x128xf32>
    %58 = vector.broadcast %57 : vector<1x128xf32> to vector<128x128xf32>
    %59 = arith.addf %55, %58 : vector<128x128xf32>
    %60 = arith.addf %1, %59 : vector<128x128xf32>
    %61 = arith.truncf %60 : vector<128x128xf32> to vector<128x128xbf16>
    %c1_48 = arith.constant 1 : index
    %c0_49 = arith.constant 0 : index
    %c0_50 = arith.constant 0 : index
    %62 = vector.load %arg5[%c1_48, %c0_49, %c0_50] : memref<4x128x128xbf16, #tpu.memory_space<vmem>>, vector<1x128x128xbf16>
    %63 = vector.shape_cast %62 : vector<1x128x128xbf16> to vector<128x128xbf16>
    %cst_51 = arith.constant dense<0.000000e+00> : vector<128x128xf32>
    %64 = tpu.matmul %61, %63, %cst_51 {dimension_numbers = #tpu.dot_dimension_numbers<[1], [0], [0], [1], [0, 0, 1, 1], [], []>} : vector<128x128xbf16>, vector<128x128xbf16>, vector<128x128xf32> -> vector<128x128xf32>
    %c1_52 = arith.constant 1 : index
    %c0_53 = arith.constant 0 : index
    %c0_54 = arith.constant 0 : index
    %65 = vector.load %arg8[%c1_52, %c0_53, %c0_54] : memref<4x6x128xf32, #tpu.memory_space<vmem>>, vector<1x1x128xf32>
    %66 = vector.shape_cast %65 : vector<1x1x128xf32> to vector<1x128xf32>
    %67 = vector.broadcast %66 : vector<1x128xf32> to vector<128x128xf32>
    %68 = arith.addf %64, %67 : vector<128x128xf32>
    %cst_55 = arith.constant 0.000000e+00 : f32
    %69 = vector.broadcast %cst_55 : f32 to vector<128x128xf32>
    %70 = arith.maximumf %68, %69 : vector<128x128xf32>
    %71 = arith.truncf %70 : vector<128x128xf32> to vector<128x128xbf16>
    %c1_56 = arith.constant 1 : index
    %c0_57 = arith.constant 0 : index
    %c0_58 = arith.constant 0 : index
    %c0_59 = arith.constant 0 : index
    %72 = vector.load %arg6[%c1_56, %c0_57, %c0_58, %c0_59] : memref<4x4x128x128xbf16, #tpu.memory_space<vmem>>, vector<1x1x128x128xbf16>
    %73 = vector.shape_cast %72 : vector<1x1x128x128xbf16> to vector<128x128xbf16>
    %cst_60 = arith.constant dense<0.000000e+00> : vector<128x128xf32>
    %74 = tpu.matmul %71, %73, %cst_60 {dimension_numbers = #tpu.dot_dimension_numbers<[1], [0], [0], [1], [0, 0, 1, 1], [], []>} : vector<128x128xbf16>, vector<128x128xbf16>, vector<128x128xf32> -> vector<128x128xf32>
    %c1_61 = arith.constant 1 : index
    %c1_62 = arith.constant 1 : index
    %c0_63 = arith.constant 0 : index
    %75 = vector.load %arg8[%c1_61, %c1_62, %c0_63] : memref<4x6x128xf32, #tpu.memory_space<vmem>>, vector<1x1x128xf32>
    %76 = vector.shape_cast %75 : vector<1x1x128xf32> to vector<1x128xf32>
    %77 = vector.broadcast %76 : vector<1x128xf32> to vector<128x128xf32>
    %78 = arith.addf %74, %77 : vector<128x128xf32>
    %cst_64 = arith.constant 0.000000e+00 : f32
    %79 = vector.broadcast %cst_64 : f32 to vector<128x128xf32>
    %80 = arith.maximumf %78, %79 : vector<128x128xf32>
    %81 = arith.truncf %80 : vector<128x128xf32> to vector<128x128xbf16>
    %c1_65 = arith.constant 1 : index
    %c1_66 = arith.constant 1 : index
    %c0_67 = arith.constant 0 : index
    %c0_68 = arith.constant 0 : index
    %82 = vector.load %arg6[%c1_65, %c1_66, %c0_67, %c0_68] : memref<4x4x128x128xbf16, #tpu.memory_space<vmem>>, vector<1x1x128x128xbf16>
    %83 = vector.shape_cast %82 : vector<1x1x128x128xbf16> to vector<128x128xbf16>
    %cst_69 = arith.constant dense<0.000000e+00> : vector<128x128xf32>
    %84 = tpu.matmul %81, %83, %cst_69 {dimension_numbers = #tpu.dot_dimension_numbers<[1], [0], [0], [1], [0, 0, 1, 1], [], []>} : vector<128x128xbf16>, vector<128x128xbf16>, vector<128x128xf32> -> vector<128x128xf32>
    %c1_70 = arith.constant 1 : index
    %c2_71 = arith.constant 2 : index
    %c0_72 = arith.constant 0 : index
    %85 = vector.load %arg8[%c1_70, %c2_71, %c0_72] : memref<4x6x128xf32, #tpu.memory_space<vmem>>, vector<1x1x128xf32>
    %86 = vector.shape_cast %85 : vector<1x1x128xf32> to vector<1x128xf32>
    %87 = vector.broadcast %86 : vector<1x128xf32> to vector<128x128xf32>
    %88 = arith.addf %84, %87 : vector<128x128xf32>
    %cst_73 = arith.constant 0.000000e+00 : f32
    %89 = vector.broadcast %cst_73 : f32 to vector<128x128xf32>
    %90 = arith.maximumf %88, %89 : vector<128x128xf32>
    %91 = arith.truncf %90 : vector<128x128xf32> to vector<128x128xbf16>
    %c1_74 = arith.constant 1 : index
    %c2_75 = arith.constant 2 : index
    %c0_76 = arith.constant 0 : index
    %c0_77 = arith.constant 0 : index
    %92 = vector.load %arg6[%c1_74, %c2_75, %c0_76, %c0_77] : memref<4x4x128x128xbf16, #tpu.memory_space<vmem>>, vector<1x1x128x128xbf16>
    %93 = vector.shape_cast %92 : vector<1x1x128x128xbf16> to vector<128x128xbf16>
    %cst_78 = arith.constant dense<0.000000e+00> : vector<128x128xf32>
    %94 = tpu.matmul %91, %93, %cst_78 {dimension_numbers = #tpu.dot_dimension_numbers<[1], [0], [0], [1], [0, 0, 1, 1], [], []>} : vector<128x128xbf16>, vector<128x128xbf16>, vector<128x128xf32> -> vector<128x128xf32>
    %c1_79 = arith.constant 1 : index
    %c3_80 = arith.constant 3 : index
    %c0_81 = arith.constant 0 : index
    %95 = vector.load %arg8[%c1_79, %c3_80, %c0_81] : memref<4x6x128xf32, #tpu.memory_space<vmem>>, vector<1x1x128xf32>
    %96 = vector.shape_cast %95 : vector<1x1x128xf32> to vector<1x128xf32>
    %97 = vector.broadcast %96 : vector<1x128xf32> to vector<128x128xf32>
    %98 = arith.addf %94, %97 : vector<128x128xf32>
    %cst_82 = arith.constant 0.000000e+00 : f32
    %99 = vector.broadcast %cst_82 : f32 to vector<128x128xf32>
    %100 = arith.maximumf %98, %99 : vector<128x128xf32>
    %101 = arith.truncf %100 : vector<128x128xf32> to vector<128x128xbf16>
    %c1_83 = arith.constant 1 : index
    %c3_84 = arith.constant 3 : index
    %c0_85 = arith.constant 0 : index
    %c0_86 = arith.constant 0 : index
    %102 = vector.load %arg6[%c1_83, %c3_84, %c0_85, %c0_86] : memref<4x4x128x128xbf16, #tpu.memory_space<vmem>>, vector<1x1x128x128xbf16>
    %103 = vector.shape_cast %102 : vector<1x1x128x128xbf16> to vector<128x128xbf16>
    %cst_87 = arith.constant dense<0.000000e+00> : vector<128x128xf32>
    %104 = tpu.matmul %101, %103, %cst_87 {dimension_numbers = #tpu.dot_dimension_numbers<[1], [0], [0], [1], [0, 0, 1, 1], [], []>} : vector<128x128xbf16>, vector<128x128xbf16>, vector<128x128xf32> -> vector<128x128xf32>
    %c1_88 = arith.constant 1 : index
    %c4_89 = arith.constant 4 : index
    %c0_90 = arith.constant 0 : index
    %105 = vector.load %arg8[%c1_88, %c4_89, %c0_90] : memref<4x6x128xf32, #tpu.memory_space<vmem>>, vector<1x1x128xf32>
    %106 = vector.shape_cast %105 : vector<1x1x128xf32> to vector<1x128xf32>
    %107 = vector.broadcast %106 : vector<1x128xf32> to vector<128x128xf32>
    %108 = arith.addf %104, %107 : vector<128x128xf32>
    %cst_91 = arith.constant 0.000000e+00 : f32
    %109 = vector.broadcast %cst_91 : f32 to vector<128x128xf32>
    %110 = arith.maximumf %108, %109 : vector<128x128xf32>
    %111 = arith.truncf %110 : vector<128x128xf32> to vector<128x128xbf16>
    %c1_92 = arith.constant 1 : index
    %c0_93 = arith.constant 0 : index
    %c0_94 = arith.constant 0 : index
    %112 = vector.load %arg7[%c1_92, %c0_93, %c0_94] : memref<4x128x128xbf16, #tpu.memory_space<vmem>>, vector<1x128x128xbf16>
    %113 = vector.shape_cast %112 : vector<1x128x128xbf16> to vector<128x128xbf16>
    %cst_95 = arith.constant dense<0.000000e+00> : vector<128x128xf32>
    %114 = tpu.matmul %111, %113, %cst_95 {dimension_numbers = #tpu.dot_dimension_numbers<[1], [0], [0], [1], [0, 0, 1, 1], [], []>} : vector<128x128xbf16>, vector<128x128xbf16>, vector<128x128xf32> -> vector<128x128xf32>
    %c1_96 = arith.constant 1 : index
    %c5_97 = arith.constant 5 : index
    %c0_98 = arith.constant 0 : index
    %115 = vector.load %arg8[%c1_96, %c5_97, %c0_98] : memref<4x6x128xf32, #tpu.memory_space<vmem>>, vector<1x1x128xf32>
    %116 = vector.shape_cast %115 : vector<1x1x128xf32> to vector<1x128xf32>
    %117 = vector.broadcast %116 : vector<1x128xf32> to vector<128x128xf32>
    %118 = arith.addf %114, %117 : vector<128x128xf32>
    %119 = arith.addf %0, %118 : vector<128x128xf32>
    %120 = arith.truncf %60 : vector<128x128xf32> to vector<128x128xbf16>
    %c2_99 = arith.constant 2 : index
    %c0_100 = arith.constant 0 : index
    %c0_101 = arith.constant 0 : index
    %121 = vector.load %arg5[%c2_99, %c0_100, %c0_101] : memref<4x128x128xbf16, #tpu.memory_space<vmem>>, vector<1x128x128xbf16>
    %122 = vector.shape_cast %121 : vector<1x128x128xbf16> to vector<128x128xbf16>
    %cst_102 = arith.constant dense<0.000000e+00> : vector<128x128xf32>
    %123 = tpu.matmul %120, %122, %cst_102 {dimension_numbers = #tpu.dot_dimension_numbers<[1], [0], [0], [1], [0, 0, 1, 1], [], []>} : vector<128x128xbf16>, vector<128x128xbf16>, vector<128x128xf32> -> vector<128x128xf32>
    %c2_103 = arith.constant 2 : index
    %c0_104 = arith.constant 0 : index
    %c0_105 = arith.constant 0 : index
    %124 = vector.load %arg8[%c2_103, %c0_104, %c0_105] : memref<4x6x128xf32, #tpu.memory_space<vmem>>, vector<1x1x128xf32>
    %125 = vector.shape_cast %124 : vector<1x1x128xf32> to vector<1x128xf32>
    %126 = vector.broadcast %125 : vector<1x128xf32> to vector<128x128xf32>
    %127 = arith.addf %123, %126 : vector<128x128xf32>
    %cst_106 = arith.constant 0.000000e+00 : f32
    %128 = vector.broadcast %cst_106 : f32 to vector<128x128xf32>
    %129 = arith.maximumf %127, %128 : vector<128x128xf32>
    %130 = arith.truncf %129 : vector<128x128xf32> to vector<128x128xbf16>
    %c2_107 = arith.constant 2 : index
    %c0_108 = arith.constant 0 : index
    %c0_109 = arith.constant 0 : index
    %c0_110 = arith.constant 0 : index
    %131 = vector.load %arg6[%c2_107, %c0_108, %c0_109, %c0_110] : memref<4x4x128x128xbf16, #tpu.memory_space<vmem>>, vector<1x1x128x128xbf16>
    %132 = vector.shape_cast %131 : vector<1x1x128x128xbf16> to vector<128x128xbf16>
    %cst_111 = arith.constant dense<0.000000e+00> : vector<128x128xf32>
    %133 = tpu.matmul %130, %132, %cst_111 {dimension_numbers = #tpu.dot_dimension_numbers<[1], [0], [0], [1], [0, 0, 1, 1], [], []>} : vector<128x128xbf16>, vector<128x128xbf16>, vector<128x128xf32> -> vector<128x128xf32>
    %c2_112 = arith.constant 2 : index
    %c1_113 = arith.constant 1 : index
    %c0_114 = arith.constant 0 : index
    %134 = vector.load %arg8[%c2_112, %c1_113, %c0_114] : memref<4x6x128xf32, #tpu.memory_space<vmem>>, vector<1x1x128xf32>
    %135 = vector.shape_cast %134 : vector<1x1x128xf32> to vector<1x128xf32>
    %136 = vector.broadcast %135 : vector<1x128xf32> to vector<128x128xf32>
    %137 = arith.addf %133, %136 : vector<128x128xf32>
    %cst_115 = arith.constant 0.000000e+00 : f32
    %138 = vector.broadcast %cst_115 : f32 to vector<128x128xf32>
    %139 = arith.maximumf %137, %138 : vector<128x128xf32>
    %140 = arith.truncf %139 : vector<128x128xf32> to vector<128x128xbf16>
    %c2_116 = arith.constant 2 : index
    %c1_117 = arith.constant 1 : index
    %c0_118 = arith.constant 0 : index
    %c0_119 = arith.constant 0 : index
    %141 = vector.load %arg6[%c2_116, %c1_117, %c0_118, %c0_119] : memref<4x4x128x128xbf16, #tpu.memory_space<vmem>>, vector<1x1x128x128xbf16>
    %142 = vector.shape_cast %141 : vector<1x1x128x128xbf16> to vector<128x128xbf16>
    %cst_120 = arith.constant dense<0.000000e+00> : vector<128x128xf32>
    %143 = tpu.matmul %140, %142, %cst_120 {dimension_numbers = #tpu.dot_dimension_numbers<[1], [0], [0], [1], [0, 0, 1, 1], [], []>} : vector<128x128xbf16>, vector<128x128xbf16>, vector<128x128xf32> -> vector<128x128xf32>
    %c2_121 = arith.constant 2 : index
    %c2_122 = arith.constant 2 : index
    %c0_123 = arith.constant 0 : index
    %144 = vector.load %arg8[%c2_121, %c2_122, %c0_123] : memref<4x6x128xf32, #tpu.memory_space<vmem>>, vector<1x1x128xf32>
    %145 = vector.shape_cast %144 : vector<1x1x128xf32> to vector<1x128xf32>
    %146 = vector.broadcast %145 : vector<1x128xf32> to vector<128x128xf32>
    %147 = arith.addf %143, %146 : vector<128x128xf32>
    %cst_124 = arith.constant 0.000000e+00 : f32
    %148 = vector.broadcast %cst_124 : f32 to vector<128x128xf32>
    %149 = arith.maximumf %147, %148 : vector<128x128xf32>
    %150 = arith.truncf %149 : vector<128x128xf32> to vector<128x128xbf16>
    %c2_125 = arith.constant 2 : index
    %c2_126 = arith.constant 2 : index
    %c0_127 = arith.constant 0 : index
    %c0_128 = arith.constant 0 : index
    %151 = vector.load %arg6[%c2_125, %c2_126, %c0_127, %c0_128] : memref<4x4x128x128xbf16, #tpu.memory_space<vmem>>, vector<1x1x128x128xbf16>
    %152 = vector.shape_cast %151 : vector<1x1x128x128xbf16> to vector<128x128xbf16>
    %cst_129 = arith.constant dense<0.000000e+00> : vector<128x128xf32>
    %153 = tpu.matmul %150, %152, %cst_129 {dimension_numbers = #tpu.dot_dimension_numbers<[1], [0], [0], [1], [0, 0, 1, 1], [], []>} : vector<128x128xbf16>, vector<128x128xbf16>, vector<128x128xf32> -> vector<128x128xf32>
    %c2_130 = arith.constant 2 : index
    %c3_131 = arith.constant 3 : index
    %c0_132 = arith.constant 0 : index
    %154 = vector.load %arg8[%c2_130, %c3_131, %c0_132] : memref<4x6x128xf32, #tpu.memory_space<vmem>>, vector<1x1x128xf32>
    %155 = vector.shape_cast %154 : vector<1x1x128xf32> to vector<1x128xf32>
    %156 = vector.broadcast %155 : vector<1x128xf32> to vector<128x128xf32>
    %157 = arith.addf %153, %156 : vector<128x128xf32>
    %cst_133 = arith.constant 0.000000e+00 : f32
    %158 = vector.broadcast %cst_133 : f32 to vector<128x128xf32>
    %159 = arith.maximumf %157, %158 : vector<128x128xf32>
    %160 = arith.truncf %159 : vector<128x128xf32> to vector<128x128xbf16>
    %c2_134 = arith.constant 2 : index
    %c3_135 = arith.constant 3 : index
    %c0_136 = arith.constant 0 : index
    %c0_137 = arith.constant 0 : index
    %161 = vector.load %arg6[%c2_134, %c3_135, %c0_136, %c0_137] : memref<4x4x128x128xbf16, #tpu.memory_space<vmem>>, vector<1x1x128x128xbf16>
    %162 = vector.shape_cast %161 : vector<1x1x128x128xbf16> to vector<128x128xbf16>
    %cst_138 = arith.constant dense<0.000000e+00> : vector<128x128xf32>
    %163 = tpu.matmul %160, %162, %cst_138 {dimension_numbers = #tpu.dot_dimension_numbers<[1], [0], [0], [1], [0, 0, 1, 1], [], []>} : vector<128x128xbf16>, vector<128x128xbf16>, vector<128x128xf32> -> vector<128x128xf32>
    %c2_139 = arith.constant 2 : index
    %c4_140 = arith.constant 4 : index
    %c0_141 = arith.constant 0 : index
    %164 = vector.load %arg8[%c2_139, %c4_140, %c0_141] : memref<4x6x128xf32, #tpu.memory_space<vmem>>, vector<1x1x128xf32>
    %165 = vector.shape_cast %164 : vector<1x1x128xf32> to vector<1x128xf32>
    %166 = vector.broadcast %165 : vector<1x128xf32> to vector<128x128xf32>
    %167 = arith.addf %163, %166 : vector<128x128xf32>
    %cst_142 = arith.constant 0.000000e+00 : f32
    %168 = vector.broadcast %cst_142 : f32 to vector<128x128xf32>
    %169 = arith.maximumf %167, %168 : vector<128x128xf32>
    %170 = arith.truncf %169 : vector<128x128xf32> to vector<128x128xbf16>
    %c2_143 = arith.constant 2 : index
    %c0_144 = arith.constant 0 : index
    %c0_145 = arith.constant 0 : index
    %171 = vector.load %arg7[%c2_143, %c0_144, %c0_145] : memref<4x128x128xbf16, #tpu.memory_space<vmem>>, vector<1x128x128xbf16>
    %172 = vector.shape_cast %171 : vector<1x128x128xbf16> to vector<128x128xbf16>
    %cst_146 = arith.constant dense<0.000000e+00> : vector<128x128xf32>
    %173 = tpu.matmul %170, %172, %cst_146 {dimension_numbers = #tpu.dot_dimension_numbers<[1], [0], [0], [1], [0, 0, 1, 1], [], []>} : vector<128x128xbf16>, vector<128x128xbf16>, vector<128x128xf32> -> vector<128x128xf32>
    %c2_147 = arith.constant 2 : index
    %c5_148 = arith.constant 5 : index
    %c0_149 = arith.constant 0 : index
    %174 = vector.load %arg8[%c2_147, %c5_148, %c0_149] : memref<4x6x128xf32, #tpu.memory_space<vmem>>, vector<1x1x128xf32>
    %175 = vector.shape_cast %174 : vector<1x1x128xf32> to vector<1x128xf32>
    %176 = vector.broadcast %175 : vector<1x128xf32> to vector<128x128xf32>
    %177 = arith.addf %173, %176 : vector<128x128xf32>
    %178 = arith.addf %119, %177 : vector<128x128xf32>
    %179 = arith.truncf %178 : vector<128x128xf32> to vector<128x128xbf16>
    %c3_150 = arith.constant 3 : index
    %c0_151 = arith.constant 0 : index
    %c0_152 = arith.constant 0 : index
    %180 = vector.load %arg5[%c3_150, %c0_151, %c0_152] : memref<4x128x128xbf16, #tpu.memory_space<vmem>>, vector<1x128x128xbf16>
    %181 = vector.shape_cast %180 : vector<1x128x128xbf16> to vector<128x128xbf16>
    %cst_153 = arith.constant dense<0.000000e+00> : vector<128x128xf32>
    %182 = tpu.matmul %179, %181, %cst_153 {dimension_numbers = #tpu.dot_dimension_numbers<[1], [0], [0], [1], [0, 0, 1, 1], [], []>} : vector<128x128xbf16>, vector<128x128xbf16>, vector<128x128xf32> -> vector<128x128xf32>
    %c3_154 = arith.constant 3 : index
    %c0_155 = arith.constant 0 : index
    %c0_156 = arith.constant 0 : index
    %183 = vector.load %arg8[%c3_154, %c0_155, %c0_156] : memref<4x6x128xf32, #tpu.memory_space<vmem>>, vector<1x1x128xf32>
    %184 = vector.shape_cast %183 : vector<1x1x128xf32> to vector<1x128xf32>
    %185 = vector.broadcast %184 : vector<1x128xf32> to vector<128x128xf32>
    %186 = arith.addf %182, %185 : vector<128x128xf32>
    %cst_157 = arith.constant 0.000000e+00 : f32
    %187 = vector.broadcast %cst_157 : f32 to vector<128x128xf32>
    %188 = arith.maximumf %186, %187 : vector<128x128xf32>
    %189 = arith.truncf %188 : vector<128x128xf32> to vector<128x128xbf16>
    %c3_158 = arith.constant 3 : index
    %c0_159 = arith.constant 0 : index
    %c0_160 = arith.constant 0 : index
    %c0_161 = arith.constant 0 : index
    %190 = vector.load %arg6[%c3_158, %c0_159, %c0_160, %c0_161] : memref<4x4x128x128xbf16, #tpu.memory_space<vmem>>, vector<1x1x128x128xbf16>
    %191 = vector.shape_cast %190 : vector<1x1x128x128xbf16> to vector<128x128xbf16>
    %cst_162 = arith.constant dense<0.000000e+00> : vector<128x128xf32>
    %192 = tpu.matmul %189, %191, %cst_162 {dimension_numbers = #tpu.dot_dimension_numbers<[1], [0], [0], [1], [0, 0, 1, 1], [], []>} : vector<128x128xbf16>, vector<128x128xbf16>, vector<128x128xf32> -> vector<128x128xf32>
    %c3_163 = arith.constant 3 : index
    %c1_164 = arith.constant 1 : index
    %c0_165 = arith.constant 0 : index
    %193 = vector.load %arg8[%c3_163, %c1_164, %c0_165] : memref<4x6x128xf32, #tpu.memory_space<vmem>>, vector<1x1x128xf32>
    %194 = vector.shape_cast %193 : vector<1x1x128xf32> to vector<1x128xf32>
    %195 = vector.broadcast %194 : vector<1x128xf32> to vector<128x128xf32>
    %196 = arith.addf %192, %195 : vector<128x128xf32>
    %cst_166 = arith.constant 0.000000e+00 : f32
    %197 = vector.broadcast %cst_166 : f32 to vector<128x128xf32>
    %198 = arith.maximumf %196, %197 : vector<128x128xf32>
    %199 = arith.truncf %198 : vector<128x128xf32> to vector<128x128xbf16>
    %c3_167 = arith.constant 3 : index
    %c1_168 = arith.constant 1 : index
    %c0_169 = arith.constant 0 : index
    %c0_170 = arith.constant 0 : index
    %200 = vector.load %arg6[%c3_167, %c1_168, %c0_169, %c0_170] : memref<4x4x128x128xbf16, #tpu.memory_space<vmem>>, vector<1x1x128x128xbf16>
    %201 = vector.shape_cast %200 : vector<1x1x128x128xbf16> to vector<128x128xbf16>
    %cst_171 = arith.constant dense<0.000000e+00> : vector<128x128xf32>
    %202 = tpu.matmul %199, %201, %cst_171 {dimension_numbers = #tpu.dot_dimension_numbers<[1], [0], [0], [1], [0, 0, 1, 1], [], []>} : vector<128x128xbf16>, vector<128x128xbf16>, vector<128x128xf32> -> vector<128x128xf32>
    %c3_172 = arith.constant 3 : index
    %c2_173 = arith.constant 2 : index
    %c0_174 = arith.constant 0 : index
    %203 = vector.load %arg8[%c3_172, %c2_173, %c0_174] : memref<4x6x128xf32, #tpu.memory_space<vmem>>, vector<1x1x128xf32>
    %204 = vector.shape_cast %203 : vector<1x1x128xf32> to vector<1x128xf32>
    %205 = vector.broadcast %204 : vector<1x128xf32> to vector<128x128xf32>
    %206 = arith.addf %202, %205 : vector<128x128xf32>
    %cst_175 = arith.constant 0.000000e+00 : f32
    %207 = vector.broadcast %cst_175 : f32 to vector<128x128xf32>
    %208 = arith.maximumf %206, %207 : vector<128x128xf32>
    %209 = arith.truncf %208 : vector<128x128xf32> to vector<128x128xbf16>
    %c3_176 = arith.constant 3 : index
    %c2_177 = arith.constant 2 : index
    %c0_178 = arith.constant 0 : index
    %c0_179 = arith.constant 0 : index
    %210 = vector.load %arg6[%c3_176, %c2_177, %c0_178, %c0_179] : memref<4x4x128x128xbf16, #tpu.memory_space<vmem>>, vector<1x1x128x128xbf16>
    %211 = vector.shape_cast %210 : vector<1x1x128x128xbf16> to vector<128x128xbf16>
    %cst_180 = arith.constant dense<0.000000e+00> : vector<128x128xf32>
    %212 = tpu.matmul %209, %211, %cst_180 {dimension_numbers = #tpu.dot_dimension_numbers<[1], [0], [0], [1], [0, 0, 1, 1], [], []>} : vector<128x128xbf16>, vector<128x128xbf16>, vector<128x128xf32> -> vector<128x128xf32>
    %c3_181 = arith.constant 3 : index
    %c3_182 = arith.constant 3 : index
    %c0_183 = arith.constant 0 : index
    %213 = vector.load %arg8[%c3_181, %c3_182, %c0_183] : memref<4x6x128xf32, #tpu.memory_space<vmem>>, vector<1x1x128xf32>
    %214 = vector.shape_cast %213 : vector<1x1x128xf32> to vector<1x128xf32>
    %215 = vector.broadcast %214 : vector<1x128xf32> to vector<128x128xf32>
    %216 = arith.addf %212, %215 : vector<128x128xf32>
    %cst_184 = arith.constant 0.000000e+00 : f32
    %217 = vector.broadcast %cst_184 : f32 to vector<128x128xf32>
    %218 = arith.maximumf %216, %217 : vector<128x128xf32>
    %219 = arith.truncf %218 : vector<128x128xf32> to vector<128x128xbf16>
    %c3_185 = arith.constant 3 : index
    %c3_186 = arith.constant 3 : index
    %c0_187 = arith.constant 0 : index
    %c0_188 = arith.constant 0 : index
    %220 = vector.load %arg6[%c3_185, %c3_186, %c0_187, %c0_188] : memref<4x4x128x128xbf16, #tpu.memory_space<vmem>>, vector<1x1x128x128xbf16>
    %221 = vector.shape_cast %220 : vector<1x1x128x128xbf16> to vector<128x128xbf16>
    %cst_189 = arith.constant dense<0.000000e+00> : vector<128x128xf32>
    %222 = tpu.matmul %219, %221, %cst_189 {dimension_numbers = #tpu.dot_dimension_numbers<[1], [0], [0], [1], [0, 0, 1, 1], [], []>} : vector<128x128xbf16>, vector<128x128xbf16>, vector<128x128xf32> -> vector<128x128xf32>
    %c3_190 = arith.constant 3 : index
    %c4_191 = arith.constant 4 : index
    %c0_192 = arith.constant 0 : index
    %223 = vector.load %arg8[%c3_190, %c4_191, %c0_192] : memref<4x6x128xf32, #tpu.memory_space<vmem>>, vector<1x1x128xf32>
    %224 = vector.shape_cast %223 : vector<1x1x128xf32> to vector<1x128xf32>
    %225 = vector.broadcast %224 : vector<1x128xf32> to vector<128x128xf32>
    %226 = arith.addf %222, %225 : vector<128x128xf32>
    %cst_193 = arith.constant 0.000000e+00 : f32
    %227 = vector.broadcast %cst_193 : f32 to vector<128x128xf32>
    %228 = arith.maximumf %226, %227 : vector<128x128xf32>
    %229 = arith.truncf %228 : vector<128x128xf32> to vector<128x128xbf16>
    %c3_194 = arith.constant 3 : index
    %c0_195 = arith.constant 0 : index
    %c0_196 = arith.constant 0 : index
    %230 = vector.load %arg7[%c3_194, %c0_195, %c0_196] : memref<4x128x128xbf16, #tpu.memory_space<vmem>>, vector<1x128x128xbf16>
    %231 = vector.shape_cast %230 : vector<1x128x128xbf16> to vector<128x128xbf16>
    %cst_197 = arith.constant dense<0.000000e+00> : vector<128x128xf32>
    %232 = tpu.matmul %229, %231, %cst_197 {dimension_numbers = #tpu.dot_dimension_numbers<[1], [0], [0], [1], [0, 0, 1, 1], [], []>} : vector<128x128xbf16>, vector<128x128xbf16>, vector<128x128xf32> -> vector<128x128xf32>
    %c3_198 = arith.constant 3 : index
    %c5_199 = arith.constant 5 : index
    %c0_200 = arith.constant 0 : index
    %233 = vector.load %arg8[%c3_198, %c5_199, %c0_200] : memref<4x6x128xf32, #tpu.memory_space<vmem>>, vector<1x1x128xf32>
    %234 = vector.shape_cast %233 : vector<1x1x128xf32> to vector<1x128xf32>
    %235 = vector.broadcast %234 : vector<1x128xf32> to vector<128x128xf32>
    %236 = arith.addf %232, %235 : vector<128x128xf32>
    %237 = arith.addf %60, %236 : vector<128x128xf32>
    %c0_201 = arith.constant 0 : index
    %c0_202 = arith.constant 0 : index
    %238 = vector.load %arg3[%c0_201, %c0_202] : memref<1x128xf32, #tpu.memory_space<vmem>>, vector<1x128xf32>
    %239 = vector.broadcast %238 : vector<1x128xf32> to vector<128x128xf32>
    %240 = arith.mulf %239, %178 : vector<128x128xf32>
    %c0_203 = arith.constant 0 : index
    %c0_204 = arith.constant 0 : index
    %241 = vector.load %arg9[%c0_203, %c0_204] : memref<128x128xf32, #tpu.memory_space<vmem>>, vector<128x128xf32>
    tpu.vector_store %arg9[%c0_203, %c0_204], %240 {strides = array<i32>} : memref<128x128xf32, #tpu.memory_space<vmem>>, vector<128x128xf32>,
    %c0_205 = arith.constant 0 : index
    %c0_206 = arith.constant 0 : index
    %242 = vector.load %arg4[%c0_205, %c0_206] : memref<1x128xf32, #tpu.memory_space<vmem>>, vector<1x128xf32>
    %243 = vector.broadcast %242 : vector<1x128xf32> to vector<128x128xf32>
    %244 = arith.mulf %243, %237 : vector<128x128xf32>
    %c0_207 = arith.constant 0 : index
    %c0_208 = arith.constant 0 : index
    %245 = vector.load %arg10[%c0_207, %c0_208] : memref<128x128xf32, #tpu.memory_space<vmem>>, vector<128x128xf32>
    tpu.vector_store %arg10[%c0_207, %c0_208], %244 {strides = array<i32>} : memref<128x128xf32, #tpu.memory_space<vmem>>, vector<128x128xf32>,
    return
  }
  func.func @transform_0(%arg0: i32) -> (i32, i32) {
    %c0_i32 = arith.constant 0 : i32
    %c0_i32_0 = arith.constant 0 : i32
    return %arg0, %c0_i32 : i32, i32
  }
  func.func @transform_1(%arg0: i32) -> (i32, i32) {
    %c0_i32 = arith.constant 0 : i32
    %c0_i32_0 = arith.constant 0 : i32
    return %arg0, %c0_i32 : i32, i32
  }
  func.func @transform_2(%arg0: i32) -> (i32, i32) {
    %c0_i32 = arith.constant 0 : i32
    %c0_i32_0 = arith.constant 0 : i32
    %c0_i32_1 = arith.constant 0 : i32
    return %c0_i32, %c0_i32_0 : i32, i32
  }
  func.func @transform_3(%arg0: i32) -> (i32, i32) {
    %c0_i32 = arith.constant 0 : i32
    %c0_i32_0 = arith.constant 0 : i32
    %c0_i32_1 = arith.constant 0 : i32
    return %c0_i32, %c0_i32_0 : i32, i32
  }
  func.func @transform_4(%arg0: i32) -> (i32, i32, i32) {
    %c0_i32 = arith.constant 0 : i32
    %c0_i32_0 = arith.constant 0 : i32
    %c0_i32_1 = arith.constant 0 : i32
    %c0_i32_2 = arith.constant 0 : i32
    return %c0_i32, %c0_i32_0, %c0_i32_1 : i32, i32, i32
  }
  func.func @transform_5(%arg0: i32) -> (i32, i32, i32, i32) {
    %c0_i32 = arith.constant 0 : i32
    %c0_i32_0 = arith.constant 0 : i32
    %c0_i32_1 = arith.constant 0 : i32
    %c0_i32_2 = arith.constant 0 : i32
    %c0_i32_3 = arith.constant 0 : i32
    return %c0_i32, %c0_i32_0, %c0_i32_1, %c0_i32_2 : i32, i32, i32, i32
  }
  func.func @transform_6(%arg0: i32) -> (i32, i32, i32) {
    %c0_i32 = arith.constant 0 : i32
    %c0_i32_0 = arith.constant 0 : i32
    %c0_i32_1 = arith.constant 0 : i32
    %c0_i32_2 = arith.constant 0 : i32
    return %c0_i32, %c0_i32_0, %c0_i32_1 : i32, i32, i32
  }
  func.func @transform_7(%arg0: i32) -> (i32, i32, i32) {
    %c0_i32 = arith.constant 0 : i32
    %c0_i32_0 = arith.constant 0 : i32
    %c0_i32_1 = arith.constant 0 : i32
    %c0_i32_2 = arith.constant 0 : i32
    return %c0_i32, %c0_i32_0, %c0_i32_1 : i32, i32, i32
  }
  func.func @transform_8(%arg0: i32) -> (i32, i32) {
    %c0_i32 = arith.constant 0 : i32
    %c0_i32_0 = arith.constant 0 : i32
    return %arg0, %c0_i32 : i32, i32
  }
  func.func @transform_9(%arg0: i32) -> (i32, i32) {
    %c0_i32 = arith.constant 0 : i32
    %c0_i32_0 = arith.constant 0 : i32
    return %arg0, %c0_i32 : i32, i32
  }
}

</mosaic_0001>

<bundles_post_ra>
// kernel: nice_forward.1
= control target key start
LH: loop header
LB: loop body
LE: loop exit
PB: predicated region body
PF: predicated region fallthrough
CT: control target
= control target key end

     0   :  { %15 = vsyncpa [#allocation3], 0  ;;  %s8205_s0 = inlined_call_operand.vmem [shape: f32[256,128], index: 0, kind: input, shape index: {}]   ;;  %s8206_s1 = inlined_call_operand.vmem [shape: f32[256,128], index: 1, kind: input, shape index: {}]   ;;  %s8207_s2 = inlined_call_operand.vmem [shape: f32[1,128], index: 2, kind: input, shape index: {}]   ;;  %s8208_s3 = inlined_call_operand.vmem [shape: f32[1,128], index: 3, kind: input, shape index: {}]   ;;  %s8209_s4 = inlined_call_operand.hbm [shape: bf16[4,128,128], index: 4, kind: input, shape index: {}]   ;;  %s8210_s5 = inlined_call_operand.vmem [shape: bf16[4,4,128,128], index: 5, kind: input, shape index: {}]   ;;  %s8211_s6 = inlined_call_operand.hbm [shape: bf16[4,128,128], index: 6, kind: input, shape index: {}]   ;;  %s8212_s7 = inlined_call_operand.vmem [shape: f32[4,6,128], index: 7, kind: input, shape index: {}]   ;;  %s8213_s8 = inlined_call_operand.vmem [shape: f32[256,128], index: 8, kind: output, shape index: {0}]   ;;  %s8214_s9 = inlined_call_operand.vmem [shape: f32[256,128], index: 9, kind: output, shape index: {1}]  }
   0x1   :  { %16 = vsyncpa [#allocation5], 0  ;;  %s7289_s30 = smov 0  }
   0x2 LB: > { %s5213_s10 = sadd.s32 4294967295, %s7233_s30   ;;  %p5215_p0 = scmp.ge.s32.totalorder %s7233_s30, 1  ;;  %s7233_s30 = sphi %s7289_s30, %s22_s30  }
   0x3   : > { %p257_p1 = scmp.lt.s32.totalorder %s7233_s30, 3  ;;  %s7235_s11 = smov [#allocation2]  }
   0x4   : > { %s275_s12 = sshll.u32 %s7235_s11, 4  ;;  %p7303_p3 = scmp.eq.s32.totalorder %s5213_s10, 0  ;;  %s276_s12 = int_to_ptr.vmem [resolvable:$true] %s275_s12 }
   0x5   : > { %p7297_p2 = pnand %p5215_p0, %p257_p1  ;;  %s7236_s15 = smov [#allocation4]  }
   0x6   : > { %s8219_s14 = scalar_select %p7303_p3, 1, 0 }
   0x7   : > { %s8218_s13 = scalar_select %p7297_p2, 1, 0 }
   0x8   : > { %p6932_p4 = pneg %p7297_p2  ;;  %s291_s16 = sshll.u32 %s7236_s15, 4  ;;  %s7315_s16 = int_to_ptr.vmem [resolvable:$true] %s291_s16 }
   0x9   : > { %s7163_s20 = scalar_lea.hbm %s8209_s4, 4096 }
   0xa   : > { %p7311_p5 = pnand %p7303_p3, %p6932_p4  ;;  %p7164_p6 = scmp.ne.s32.totalorder %s8209_s4, %s7163_s20 }
   0xb   : > { %p7170_p10 = scmp.lt.u32.totalorder %s7163_s20, %s8209_s4 }
   0xc   : > { %p7165_p7 = pneg %p7311_p5 }
   0xe   : > { %p7166_p8 = pnand %p7165_p7, %p7164_p6 }
  0x10   : > { %p7167_p9 = pneg %p7166_p8 }
  0x12   : > { %p7172_p11 = pnand %p7170_p10, %p7167_p9 }
  0x14   : > { %7175 = shalt.err (!%p7172_p11)
}
  0x15   : > { %s7176_s25 = scalar_lea.vmem %s276_s12, 4096  ;;  %p7184_p1 = scmp.lt.s32.totalorder %s276_s12, %s276_s12 }
  0x16   : > { %p7177_p12 = scmp.ne.s32.totalorder %s276_s12, %s7176_s25  ;;  %p7185_p4 = scmp.lt.s32.totalorder %s7176_s25, %s7176_s25 }
  0x18   : > { %p7179_p13 = pnand %p7177_p12, %p7165_p7  ;;  %p7186_p3 = por %p7185_p4, %p7184_p1 }
  0x1a   : > { %p7180_p0 = pneg %p7179_p13 }
  0x1c   : > { %p7187_p2 = pnand %p7186_p3, %p7180_p0 }
  0x1e   : > { %7190 = shalt.err (!%p7187_p2)
}
  0x1f   : > { %s7237_s26 = smov 64   ;;  %s7238_s27 = smov 4  }
  0x20   : > { %6935 = dma.hbm_to_vmem [thread:$0]  (!%p7311_p5), %s8209_s4, 4096, %s276_s12, [#allocation3], %s7237_s26, %s7237_s26, %s7238_s27  }
  0x21   : > { %s7191_s18 = scalar_lea.hbm %s8211_s6, 4096 }
  0x22   : > { %p7192_p6 = scmp.ne.s32.totalorder %s8211_s6, %s7191_s18  ;;  %p7198_p8 = scmp.lt.u32.totalorder %s7191_s18, %s8211_s6 }
  0x24   : > { %p7194_p2 = pnand %p7192_p6, %p7165_p7 }
  0x26   : > { %p7195_p3 = pneg %p7194_p2 }
  0x28   : > { %p7200_p9 = pnand %p7198_p8, %p7195_p3 }
  0x2a   : > { %7203 = shalt.err (!%p7200_p9)
}
  0x2b   : > { %s7204_s12 = scalar_lea.vmem %s7315_s16, 4096  ;;  %p7212_p13 = scmp.lt.s32.totalorder %s7315_s16, %s7315_s16 }
  0x2c   : > { %p7205_p10 = scmp.ne.s32.totalorder %s7315_s16, %s7204_s12  ;;  %p7213_p0 = scmp.lt.s32.totalorder %s7204_s12, %s7204_s12 }
  0x2e   : > { %p7207_p11 = pnand %p7205_p10, %p7165_p7  ;;  %p7214_p1 = por %p7213_p0, %p7212_p13 }
  0x30   : > { %p7208_p12 = pneg %p7207_p11 }
  0x32   : > { %p7215_p4 = pnand %p7214_p1, %p7208_p12 }
  0x34   : > { %7218 = shalt.err (!%p7215_p4)
}
  0x35   : > { %6938 = dma.hbm_to_vmem [thread:$0]  (!%p7311_p5), %s8211_s6, 4096, %s7315_s16, [#allocation5], %s7237_s26, %s7237_s26, %s7238_s27  }
  0x36   : > { %p8221_p6 = scmp.ne.s32.totalorder %s8218_s13, 0 }
  0x37   : > { %p8222_p2 = scmp.ne.s32.totalorder (!%p8221_p6), %s8219_s14, 0 }
  0x38   : > { %328 = sbr.rel (%p8221_p6) target bundleno = 5037 (0x13ad), region = 52 }
  0x3f   : > { %7224 = dma.done.wait (%p8222_p2), [#allocation3], 4096  }
  0x40   : > { %7226 = vsyncadd (%p8222_p2), [#allocation3], 4294963200 }
  0x41   : > { %7228 = dma.done.wait (%p8222_p2), [#allocation5], 4096  }
  0x42   : > { %7230 = vsyncadd (%p8222_p2), [#allocation5], 4294963200  ;;  %s5222_s17 = sshll.u32 %s5213_s10, 4  ;;  %v6955_v0 = vld [vmem:[#allocation2] sm:$0xff]   ;;  %v6956_v1 = vld [vmem:[#allocation2 + $0x8] sm:$0xff]  }
  0x43   : > { %p379_p7 = scmp.lt.s32.totalorder %s5222_s17, 31  ;;  %6092 = vmatprep.subr.bf16.mxu0 %v6955_v0  ;;  %v6957_v2 = vld [vmem:[#allocation2 + $0x10] sm:$0xff]   ;;  %v6958_v3 = vld [vmem:[#allocation2 + $0x18] sm:$0xff]   ;;  %v6959_v7 = vld [vmem:[#allocation2 + $0x20] sm:$0xff]  }
  0x44   : > { %6093 = vmatpush3.bf16.msra.mxu0 %v6955_v0  ;;  %v6963_v8 = vld [vmem:[%s8210_s5] sm:$0xff]   ;;  %v6964_v9 = vld [vmem:[%s8210_s5 + $0x8] sm:$0xff]   ;;  %v6965_v11 = vld [vmem:[%s8210_s5 + $0x10] sm:$0xff]  }
  0x45   : > { %s8224_s17 = smov (!%p379_p7, %s5222_s17), 31  ;;  %6094 = vmatprep.subr.bf16.mxu0 %v6956_v1  ;;  %v6960_v10 = vld [vmem:[#allocation2 + $0x28] sm:$0xff]   ;;  %6124 = vmatprep.subr.bf16.mxu1 %v6963_v8  ;;  %v6961_v12 = vld [vmem:[#allocation2 + $0x30] sm:$0xff]   ;;  %v6966_v13 = vld [vmem:[%s8210_s5 + $0x18] sm:$0xff]  }
  0x46   : > { %s7376_s13 = sshll.u32 %s8224_s17, 3  ;;  %6125 = vmatpush3.bf16.msra.mxu1 %v6963_v8  ;;  %v6962_v14 = vld [vmem:[#allocation2 + $0x38] sm:$0xff]   ;;  %v6967_v15 = vld [vmem:[%s8210_s5 + $0x20] sm:$0xff]   ;;  %v6968_v20 = vld [vmem:[%s8210_s5 + $0x28] sm:$0xff]  }
  0x47   : > { %s7382_s26 = scalar_lea.vmem %s8205_s0, %s7376_s13  ;;  %6126 = vmatprep.subr.bf16.mxu1 %v6964_v9  ;;  %v6969_v38 = vld [vmem:[%s8210_s5 + $0x30] sm:$0xff]   ;;  %v6970_v39 = vld [vmem:[%s8210_s5 + $0x38] sm:$0xff]   ;;  %v6971_v40 = vld [vmem:[%s8210_s5 + $0x40] sm:$0xff]   ;;  %s7538_s10 = scalar_lea.vmem %s8206_s1, %s7376_s13 }
  0x48   : > { %6095 = vmatpush3.bf16.msra.mxu0 %v6956_v1  ;;  %v403_v4 = vld [vmem:[%s7382_s26] sm:$0xff]  ;;  %v404_v5 = vld [vmem:[%s7382_s26 + $0x8] sm:$0xff]  ;;  %v405_v16 = vld [vmem:[%s7382_s26 + $0x10] sm:$0xff]  ;;  %s7964_s23 = scalar_lea.vmem %s8213_s8, %s7376_s13  ;;  %s8140_s15 = scalar_lea.vmem %s8214_s9, %s7376_s13 }
  0x49   : > { %6096 = vmatprep.subr.bf16.mxu0 %v6957_v2  ;;  %v435_v6 = vpack.c.bf16 %v404_v5, %v403_v4  ;;  %v406_v17 = vld [vmem:[%s7382_s26 + $0x18] sm:$0xff]  ;;  %v407_v18 = vld [vmem:[%s7382_s26 + $0x20] sm:$0xff]  ;;  %v408_v19 = vld [vmem:[%s7382_s26 + $0x28] sm:$0xff] }
  0x4a   : > { %6127 = vmatpush3.bf16.msra.mxu1 %v6964_v9  ;;  %v436_v21 = vpack.c.bf16 %v406_v17, %v405_v16  ;;  %v437_v22 = vpack.c.bf16 %v408_v19, %v407_v18  ;;  %v409_v23 = vld [vmem:[%s7382_s26 + $0x30] sm:$0xff]  ;;  %v410_v24 = vld [vmem:[%s7382_s26 + $0x38] sm:$0xff]  ;;  %v411_v25 = vld [vmem:[%s7382_s26 + $0x40] sm:$0xff] }
  0x4b   : > { %6108 = vmatprep.mubr.bf16.mxu0 %v435_v6  ;;  %6128 = vmatprep.subr.bf16.mxu1 %v6965_v11  ;;  %v412_v26 = vld [vmem:[%s7382_s26 + $0x48] sm:$0xff]  ;;  %v438_v27 = vpack.c.bf16 %v410_v24, %v409_v23  ;;  %v413_v29 = vld [vmem:[%s7382_s26 + $0x50] sm:$0xff]  ;;  %v414_v30 = vld [vmem:[%s7382_s26 + $0x58] sm:$0xff] }
  0x4c   : > { %6097 = vmatpush3.bf16.msra.mxu0 %v6957_v2  ;;  %v439_v28 = vpack.c.bf16 %v412_v26, %v411_v25  ;;  %v415_v31 = vld [vmem:[%s7382_s26 + $0x60] sm:$0xff]  ;;  %v416_v32 = vld [vmem:[%s7382_s26 + $0x68] sm:$0xff]  ;;  %v440_v33 = vpack.c.bf16 %v414_v30, %v413_v29  ;;  %v417_v35 = vld [vmem:[%s7382_s26 + $0x70] sm:$0xff] }
  0x4d   : > { %6098 = vmatprep.subr.bf16.mxu0 %v6958_v3  ;;  %v441_v34 = vpack.c.bf16 %v416_v32, %v415_v31  ;;  %v418_v36 = vld [vmem:[%s7382_s26 + $0x78] sm:$0xff]  ;;  %v6972_v41 = vld [vmem:[%s8210_s5 + $0x48] sm:$0xff]   ;;  %v6973_v42 = vld [vmem:[%s8210_s5 + $0x50] sm:$0xff]  }
  0x4e   : > { %6129 = vmatpush3.bf16.msra.mxu1 %v6965_v11  ;;  %v442_v37 = vpack.c.bf16 %v418_v36, %v417_v35  ;;  %v6974_v43 = vld [vmem:[%s8210_s5 + $0x58] sm:$0xff]   ;;  %v6975_v44 = vld [vmem:[%s8210_s5 + $0x60] sm:$0xff]   ;;  %v6976_v45 = vld [vmem:[%s8210_s5 + $0x68] sm:$0xff]  }
  0x4f   : > { %6130 = vmatprep.subr.bf16.mxu1 %v6966_v13  ;;  %v5230_v46 = vld [vmem:[%s8212_s7] ss:$0 sm:$0xff] }
  0x50   : > { %6099 = vmatpush3.bf16.msra.mxu0 %v6958_v3 }
  0x51   : > { %6100 = vmatprep.subr.bf16.mxu0 %v6959_v7 }
  0x52   : > { %6131 = vmatpush3.bf16.msra.mxu1 %v6966_v13 }
  0x53   : > { %6132 = vmatprep.subr.bf16.mxu1 %v6967_v15 }
  0x54   : > { %6101 = vmatpush3.bf16.msra.mxu0 %v6959_v7 }
  0x55   : > { %6102 = vmatprep.subr.bf16.mxu0 %v6960_v10 }
  0x56   : > { %6133 = vmatpush3.bf16.msra.mxu1 %v6967_v15 }
  0x57   : > { %6134 = vmatprep.subr.bf16.mxu1 %v6968_v20 }
  0x58   : > { %6103 = vmatpush3.bf16.msra.mxu0 %v6960_v10 }
  0x59   : > { %6104 = vmatprep.subr.bf16.mxu0 %v6961_v12 }
  0x5a   : > { %6135 = vmatpush3.bf16.msra.mxu1 %v6968_v20 }
  0x5b   : > { %6136 = vmatprep.subr.bf16.mxu1 %v6969_v38 }
  0x5c   : > { %6105 = vmatpush3.bf16.msra.mxu0 %v6961_v12 }
  0x5d   : > { %6106 = vmatprep.subr.bf16.mxu0 %v6962_v14 }
  0x5e   : > { %6137 = vmatpush3.bf16.msra.mxu1 %v6969_v38 }
  0x5f   : > { %6138 = vmatprep.subr.bf16.mxu1 %v6970_v39 }
  0x60   : > { %6107 = vmatpush3.bf16.msra.mxu0 %v6962_v14 }
  0x61   : > { %6156 = vmatprep.subr.bf16.mxu0 %v6971_v40 }
  0x62   : > { %6139 = vmatpush3.bf16.msra.mxu1 %v6970_v39  ;;  %v6977_v39 = vld [vmem:[%s8210_s5 + $0x70] sm:$0xff]  }
  0x63   : > { %6109 = vmatmul.mubr.bf16.vlgmr.msra.gmra.mrb[0].mxu0 %v436_v21 }
  0x64   : > { %6112 = vmatprep.mubr.bf16.mxu0 %v437_v22  ;;  %6157 = vmatpush3.bf16.msra.mxu0 %v6971_v40  ;;  %v6978_v40 = vld [vmem:[%s8210_s5 + $0x78] sm:$0xff]  }
  0x65   : > { %6158 = vmatprep.subr.bf16.mxu0 %v6972_v41 }
  0x68   : > { %6159 = vmatpush3.bf16.msra.mxu0 %v6972_v41  ;;  %v6979_v41 = vld [vmem:[%s8210_s5 + $0x80] sm:$0xff]  }
  0x69   : > { %6160 = vmatprep.subr.bf16.mxu0 %v6973_v42  ;;  %6188 = vmatprep.subr.bf16.mxu1 %v6979_v41 }
  0x6b   : > { %6113 = vmatmul.mubr.bf16.gmra.mrb[4].mxu0 %v438_v27 }
  0x6c   : > { %6116 = vmatprep.mubr.bf16.mxu0 %v439_v28  ;;  %6161 = vmatpush3.bf16.msra.mxu0 %v6973_v42  ;;  %v6980_v42 = vld [vmem:[%s8210_s5 + $0x88] sm:$0xff]  }
  0x6d   : > { %6162 = vmatprep.subr.bf16.mxu0 %v6974_v43 }
  0x70   : > { %6163 = vmatpush3.bf16.msra.mxu0 %v6974_v43  ;;  %v6981_v43 = vld [vmem:[%s8210_s5 + $0x90] sm:$0xff]  }
  0x71   : > { %6164 = vmatprep.subr.bf16.mxu0 %v6975_v44 }
  0x73   : > { %6117 = vmatmul.mubr.bf16.gmra.mrb[8].mxu0 %v440_v33 }
  0x74   : > { %6120 = vmatprep.mubr.bf16.mxu0 %v441_v34  ;;  %6165 = vmatpush3.bf16.msra.mxu0 %v6975_v44  ;;  %v6982_v44 = vld [vmem:[%s8210_s5 + $0x98] sm:$0xff]  }
  0x75   : > { %6166 = vmatprep.subr.bf16.mxu0 %v6976_v45 }
  0x78   : > { %6167 = vmatpush3.bf16.msra.mxu0 %v6976_v45  ;;  %v6983_v45 = vld [vmem:[%s8210_s5 + $0xa0] sm:$0xff]  }
  0x79   : > { %6168 = vmatprep.subr.bf16.mxu0 %v6977_v39 }
  0x7b   : > { %6121 = vmatmul.mubr.bf16.gmra.mrb[12].mxu0 %v442_v37 }
  0x7c   : > { %6169 = vmatpush3.bf16.msra.mxu0 %v6977_v39 }
  0x7d   : > { %6170 = vmatprep.subr.bf16.mxu0 %v6978_v40 }
  0x80   : > { %6171 = vmatpush3.bf16.msra.mxu0 %v6978_v40  ;;  %v6985_v40 = vld [vmem:[%s8210_s5 + $0xb0] sm:$0xff]  }
 0x136   : > { %v6110_v47 = vpop.f32.mrb[0].mxu0 }
 0x137   : > { %v555_v48 = vadd.f32 %v6110_v47, %v5230_v46  ;;  %v546_v49 = vpop.f32.mrb[1].mxu0  ;;  %v5239_v47 = vld [vmem:[%s8212_s7 + $0x1] ss:$0 sm:$0xff] }
 0x138   : > { %v547_v50 = vadd.f32 %v5230_v46, %v546_v49  ;;  %v6111_v51 = vpop.f32.mrb[2].mxu0 }
 0x139   : > { %v558_v52 = vadd.f32 %v6111_v51, %v5230_v46  ;;  %v549_v53 = vpop.f32.mrb[3].mxu0  ;;  %v611_v55 = vmax.f32 %v555_v48, 0.0 }
 0x13a   : > { %v550_v54 = vadd.f32 %v5230_v46, %v549_v53  ;;  %v609_v57 = vmax.f32 %v547_v50, 0.0 }
 0x13b   : > { %v612_v56 = vmax.f32 %v558_v52, 0.0 }
 0x13c   : > { %v610_v58 = vmax.f32 %v550_v54, 0.0 }
 0x13d   : > { %v626_v59 = vpack.c.bf16 %v612_v56, %v611_v55 }
 0x13e   : > { %v6114_v60 = vpop.f32.mrb[4].mxu0  ;;  %v625_v61 = vpack.c.bf16 %v610_v58, %v609_v57 }
 0x13f   : > { %v571_v62 = vadd.f32 %v6114_v60, %v5230_v46  ;;  %v562_v63 = vpop.f32.mrb[5].mxu0 }
 0x140   : > { %v563_v0 = vadd.f32 %v5230_v46, %v562_v63  ;;  %v6115_v1 = vpop.f32.mrb[6].mxu0  ;;  %6140 = vmatprep.mubr.bf16.mxu1 %v625_v61 }
 0x141   : > { %v574_v2 = vadd.f32 %v6115_v1, %v5230_v46  ;;  %v565_v3 = vpop.f32.mrb[7].mxu0  ;;  %6141 = vmatmul.mubr.bf16.vlgmr.msra.gmra.mrb[0].mxu1 %v626_v59  ;;  %v615_v5 = vmax.f32 %v571_v62, 0.0 }
 0x142   : > { %v566_v4 = vadd.f32 %v5230_v46, %v565_v3  ;;  %v613_v7 = vmax.f32 %v563_v0, 0.0  ;;  %6189 = vmatpush3.bf16.msra.mxu1 %v6979_v41  ;;  %v6986_v41 = vld [vmem:[%s8210_s5 + $0xb8] sm:$0xff]  }
 0x143   : > { %v616_v6 = vmax.f32 %v574_v2, 0.0  ;;  %6190 = vmatprep.subr.bf16.mxu1 %v6980_v42 }
 0x144   : > { %v614_v8 = vmax.f32 %v566_v4, 0.0 }
 0x145   : > { %v628_v9 = vpack.c.bf16 %v616_v6, %v615_v5 }
 0x146   : > { %v627_v10 = vpack.c.bf16 %v614_v8, %v613_v7  ;;  %v6118_v11 = vpop.f32.mrb[8].mxu0  ;;  %6191 = vmatpush3.bf16.msra.mxu1 %v6980_v42  ;;  %v6987_v42 = vld [vmem:[%s8210_s5 + $0xc0] sm:$0xff]  }
 0x147   : > { %v587_v12 = vadd.f32 %v6118_v11, %v5230_v46  ;;  %v578_v13 = vpop.f32.mrb[9].mxu0  ;;  %6192 = vmatprep.subr.bf16.mxu1 %v6981_v43  ;;  %6220 = vmatprep.subr.bf16.mxu0 %v6987_v42 }
 0x148   : > { %v579_v14 = vadd.f32 %v5230_v46, %v578_v13  ;;  %v6119_v15 = vpop.f32.mrb[10].mxu0  ;;  %6144 = vmatprep.mubr.bf16.mxu1 %v627_v10 }
 0x149   : > { %v590_v16 = vadd.f32 %v6119_v15, %v5230_v46  ;;  %v581_v17 = vpop.f32.mrb[11].mxu0  ;;  %6145 = vmatmul.mubr.bf16.gmra.mrb[4].mxu1 %v628_v9  ;;  %v619_v19 = vmax.f32 %v587_v12, 0.0 }
 0x14a   : > { %v582_v18 = vadd.f32 %v5230_v46, %v581_v17  ;;  %v617_v21 = vmax.f32 %v579_v14, 0.0  ;;  %6193 = vmatpush3.bf16.msra.mxu1 %v6981_v43  ;;  %v6988_v43 = vld [vmem:[%s8210_s5 + $0xc8] sm:$0xff]  }
 0x14b   : > { %v620_v20 = vmax.f32 %v590_v16, 0.0  ;;  %6194 = vmatprep.subr.bf16.mxu1 %v6982_v44 }
 0x14c   : > { %v618_v22 = vmax.f32 %v582_v18, 0.0 }
 0x14d   : > { %v630_v23 = vpack.c.bf16 %v620_v20, %v619_v19 }
 0x14e   : > { %v629_v24 = vpack.c.bf16 %v618_v22, %v617_v21  ;;  %v6122_v25 = vpop.f32.mrb[12].mxu0  ;;  %6195 = vmatpush3.bf16.msra.mxu1 %v6982_v44  ;;  %v6989_v44 = vld [vmem:[%s8210_s5 + $0xd0] sm:$0xff]  }
 0x14f   : > { %v603_v26 = vadd.f32 %v6122_v25, %v5230_v46  ;;  %v594_v27 = vpop.f32.mrb[13].mxu0  ;;  %6196 = vmatprep.subr.bf16.mxu1 %v6983_v45 }
 0x150   : > { %v595_v28 = vadd.f32 %v5230_v46, %v594_v27  ;;  %v6123_v29 = vpop.f32.mrb[14].mxu0  ;;  %6148 = vmatprep.mubr.bf16.mxu1 %v629_v24 }
 0x151   : > { %v606_v30 = vadd.f32 %v6123_v29, %v5230_v46  ;;  %v597_v31 = vpop.f32.mrb[15].mxu0  ;;  %6149 = vmatmul.mubr.bf16.gmra.mrb[8].mxu1 %v630_v23  ;;  %v623_v33 = vmax.f32 %v603_v26, 0.0 }
 0x152   : > { %v598_v32 = vadd.f32 %v5230_v46, %v597_v31  ;;  %v621_v35 = vmax.f32 %v595_v28, 0.0  ;;  %v6984_v46 = vld [vmem:[%s8210_s5 + $0xa8] sm:$0xff]   ;;  %6197 = vmatpush3.bf16.msra.mxu1 %v6983_v45  ;;  %v6990_v45 = vld [vmem:[%s8210_s5 + $0xd8] sm:$0xff]  }
 0x153   : > { %v624_v34 = vmax.f32 %v606_v30, 0.0  ;;  %6198 = vmatprep.subr.bf16.mxu1 %v6984_v46 }
 0x154   : > { %v622_v36 = vmax.f32 %v598_v32, 0.0 }
 0x155   : > { %v632_v37 = vpack.c.bf16 %v624_v34, %v623_v33 }
 0x156   : > { %v631_v38 = vpack.c.bf16 %v622_v36, %v621_v35  ;;  %6199 = vmatpush3.bf16.msra.mxu1 %v6984_v46  ;;  %v6991_v46 = vld [vmem:[%s8210_s5 + $0xe0] sm:$0xff]  }
 0x157   : > { %6200 = vmatprep.subr.bf16.mxu1 %v6985_v40 }
 0x158   : > { %6152 = vmatprep.mubr.bf16.mxu1 %v631_v38 }
 0x159   : > { %6153 = vmatmul.mubr.bf16.gmra.mrb[12].mxu1 %v632_v37 }
 0x15a   : > { %6201 = vmatpush3.bf16.msra.mxu1 %v6985_v40 }
 0x15b   : > { %6202 = vmatprep.subr.bf16.mxu1 %v6986_v41 }
 0x15e   : > { %6203 = vmatpush3.bf16.msra.mxu1 %v6986_v41  ;;  %v6993_v41 = vld [vmem:[%s8210_s5 + $0xf0] sm:$0xff]  }
 0x214   : > { %v6142_v48 = vpop.f32.mrb[0].mxu1 }
 0x215   : > { %v745_v49 = vadd.f32 %v6142_v48, %v5239_v47  ;;  %v736_v50 = vpop.f32.mrb[1].mxu1  ;;  %v5264_v48 = vld [vmem:[%s8212_s7 + $0x2] ss:$0 sm:$0xff] }
 0x216   : > { %v737_v51 = vadd.f32 %v5239_v47, %v736_v50  ;;  %v6143_v52 = vpop.f32.mrb[2].mxu1 }
 0x217   : > { %v748_v53 = vadd.f32 %v6143_v52, %v5239_v47  ;;  %v739_v54 = vpop.f32.mrb[3].mxu1  ;;  %v801_v56 = vmax.f32 %v745_v49, 0.0 }
 0x218   : > { %v740_v55 = vadd.f32 %v5239_v47, %v739_v54  ;;  %v799_v58 = vmax.f32 %v737_v51, 0.0 }
 0x219   : > { %v802_v57 = vmax.f32 %v748_v53, 0.0 }
 0x21a   : > { %v800_v59 = vmax.f32 %v740_v55, 0.0 }
 0x21b   : > { %v816_v60 = vpack.c.bf16 %v802_v57, %v801_v56 }
 0x21c   : > { %v815_v61 = vpack.c.bf16 %v800_v59, %v799_v58  ;;  %v6146_v62 = vpop.f32.mrb[4].mxu1 }
 0x21d   : > { %v761_v63 = vadd.f32 %v6146_v62, %v5239_v47  ;;  %v752_v0 = vpop.f32.mrb[5].mxu1 }
 0x21e   : > { %v753_v1 = vadd.f32 %v5239_v47, %v752_v0  ;;  %v6147_v2 = vpop.f32.mrb[6].mxu1  ;;  %6172 = vmatprep.mubr.bf16.mxu0 %v815_v61 }
 0x21f   : > { %v764_v3 = vadd.f32 %v6147_v2, %v5239_v47  ;;  %v755_v4 = vpop.f32.mrb[7].mxu1  ;;  %6173 = vmatmul.mubr.bf16.vlgmr.msra.gmra.mrb[16].mxu0 %v816_v60  ;;  %v805_v6 = vmax.f32 %v761_v63, 0.0 }
 0x220   : > { %v756_v5 = vadd.f32 %v5239_v47, %v755_v4  ;;  %v803_v8 = vmax.f32 %v753_v1, 0.0  ;;  %6221 = vmatpush3.bf16.msra.mxu0 %v6987_v42  ;;  %v6994_v42 = vld [vmem:[%s8210_s5 + $0xf8] sm:$0xff]  }
 0x221   : > { %v806_v7 = vmax.f32 %v764_v3, 0.0  ;;  %6222 = vmatprep.subr.bf16.mxu0 %v6988_v43 }
 0x222   : > { %v804_v9 = vmax.f32 %v756_v5, 0.0 }
 0x223   : > { %v818_v10 = vpack.c.bf16 %v806_v7, %v805_v6 }
 0x224   : > { %v817_v11 = vpack.c.bf16 %v804_v9, %v803_v8  ;;  %v6150_v12 = vpop.f32.mrb[8].mxu1  ;;  %6223 = vmatpush3.bf16.msra.mxu0 %v6988_v43  ;;  %v6995_v43 = vld [vmem:[#allocation4] sm:$0xff]  }
 0x225   : > { %v777_v13 = vadd.f32 %v6150_v12, %v5239_v47  ;;  %v768_v14 = vpop.f32.mrb[9].mxu1  ;;  %6224 = vmatprep.subr.bf16.mxu0 %v6989_v44  ;;  %6252 = vmatprep.subr.bf16.mxu1 %v6995_v43 }
 0x226   : > { %v769_v15 = vadd.f32 %v5239_v47, %v768_v14  ;;  %v6151_v16 = vpop.f32.mrb[10].mxu1  ;;  %6176 = vmatprep.mubr.bf16.mxu0 %v817_v11 }
 0x227   : > { %v780_v17 = vadd.f32 %v6151_v16, %v5239_v47  ;;  %v771_v18 = vpop.f32.mrb[11].mxu1  ;;  %6177 = vmatmul.mubr.bf16.gmra.mrb[20].mxu0 %v818_v10  ;;  %v809_v20 = vmax.f32 %v777_v13, 0.0 }
 0x228   : > { %v772_v19 = vadd.f32 %v5239_v47, %v771_v18  ;;  %v807_v22 = vmax.f32 %v769_v15, 0.0  ;;  %6225 = vmatpush3.bf16.msra.mxu0 %v6989_v44  ;;  %v6996_v44 = vld [vmem:[#allocation4 + $0x8] sm:$0xff]  }
 0x229   : > { %v810_v21 = vmax.f32 %v780_v17, 0.0  ;;  %6226 = vmatprep.subr.bf16.mxu0 %v6990_v45 }
 0x22a   : > { %v808_v23 = vmax.f32 %v772_v19, 0.0 }
 0x22b   : > { %v820_v24 = vpack.c.bf16 %v810_v21, %v809_v20 }
 0x22c   : > { %v819_v25 = vpack.c.bf16 %v808_v23, %v807_v22  ;;  %v6154_v26 = vpop.f32.mrb[12].mxu1  ;;  %6227 = vmatpush3.bf16.msra.mxu0 %v6990_v45  ;;  %v6997_v45 = vld [vmem:[#allocation4 + $0x10] sm:$0xff]  }
 0x22d   : > { %v793_v27 = vadd.f32 %v6154_v26, %v5239_v47  ;;  %v784_v28 = vpop.f32.mrb[13].mxu1  ;;  %6228 = vmatprep.subr.bf16.mxu0 %v6991_v46 }
 0x22e   : > { %v785_v29 = vadd.f32 %v5239_v47, %v784_v28  ;;  %v6155_v30 = vpop.f32.mrb[14].mxu1  ;;  %6180 = vmatprep.mubr.bf16.mxu0 %v819_v25 }
 0x22f   : > { %v796_v31 = vadd.f32 %v6155_v30, %v5239_v47  ;;  %v787_v32 = vpop.f32.mrb[15].mxu1  ;;  %6181 = vmatmul.mubr.bf16.gmra.mrb[24].mxu0 %v820_v24  ;;  %v813_v34 = vmax.f32 %v793_v27, 0.0 }
 0x230   : > { %v788_v33 = vadd.f32 %v5239_v47, %v787_v32  ;;  %v811_v36 = vmax.f32 %v785_v29, 0.0  ;;  %v6992_v47 = vld [vmem:[%s8210_s5 + $0xe8] sm:$0xff]   ;;  %6229 = vmatpush3.bf16.msra.mxu0 %v6991_v46  ;;  %v6998_v46 = vld [vmem:[#allocation4 + $0x18] sm:$0xff]  }
 0x231   : > { %v814_v35 = vmax.f32 %v796_v31, 0.0  ;;  %6230 = vmatprep.subr.bf16.mxu0 %v6992_v47 }
 0x232   : > { %v812_v37 = vmax.f32 %v788_v33, 0.0 }
 0x233   : > { %v822_v38 = vpack.c.bf16 %v814_v35, %v813_v34 }
 0x234   : > { %v821_v39 = vpack.c.bf16 %v812_v37, %v811_v36  ;;  %6231 = vmatpush3.bf16.msra.mxu0 %v6992_v47  ;;  %v6999_v47 = vld [vmem:[#allocation4 + $0x20] sm:$0xff]  }
 0x235   : > { %6232 = vmatprep.subr.bf16.mxu0 %v6993_v41 }
 0x236   : > { %6184 = vmatprep.mubr.bf16.mxu0 %v821_v39 }
 0x237   : > { %6185 = vmatmul.mubr.bf16.gmra.mrb[28].mxu0 %v822_v38 }
 0x238   : > { %6233 = vmatpush3.bf16.msra.mxu0 %v6993_v41 }
 0x239   : > { %6234 = vmatprep.subr.bf16.mxu0 %v6994_v42 }
 0x23c   : > { %6235 = vmatpush3.bf16.msra.mxu0 %v6994_v42  ;;  %v7001_v42 = vld [vmem:[#allocation4 + $0x30] sm:$0xff]  }
 0x2f2   : > { %v6174_v49 = vpop.f32.mrb[16].mxu0 }
 0x2f3   : > { %v936_v50 = vadd.f32 %v6174_v49, %v5264_v48  ;;  %v927_v51 = vpop.f32.mrb[17].mxu0  ;;  %v5289_v49 = vld [vmem:[%s8212_s7 + $0x3] ss:$0 sm:$0xff] }
 0x2f4   : > { %v928_v52 = vadd.f32 %v5264_v48, %v927_v51  ;;  %v6175_v53 = vpop.f32.mrb[18].mxu0 }
 0x2f5   : > { %v939_v54 = vadd.f32 %v6175_v53, %v5264_v48  ;;  %v930_v55 = vpop.f32.mrb[19].mxu0  ;;  %v992_v57 = vmax.f32 %v936_v50, 0.0 }
 0x2f6   : > { %v931_v56 = vadd.f32 %v5264_v48, %v930_v55  ;;  %v990_v59 = vmax.f32 %v928_v52, 0.0 }
 0x2f7   : > { %v993_v58 = vmax.f32 %v939_v54, 0.0 }
 0x2f8   : > { %v991_v60 = vmax.f32 %v931_v56, 0.0 }
 0x2f9   : > { %v1007_v61 = vpack.c.bf16 %v993_v58, %v992_v57 }
 0x2fa   : > { %v1006_v62 = vpack.c.bf16 %v991_v60, %v990_v59  ;;  %v6178_v63 = vpop.f32.mrb[20].mxu0 }
 0x2fb   : > { %v952_v0 = vadd.f32 %v6178_v63, %v5264_v48  ;;  %v943_v1 = vpop.f32.mrb[21].mxu0 }
 0x2fc   : > { %v944_v2 = vadd.f32 %v5264_v48, %v943_v1  ;;  %v6179_v3 = vpop.f32.mrb[22].mxu0  ;;  %6204 = vmatprep.mubr.bf16.mxu1 %v1006_v62 }
 0x2fd   : > { %v955_v4 = vadd.f32 %v6179_v3, %v5264_v48  ;;  %v946_v5 = vpop.f32.mrb[23].mxu0  ;;  %6205 = vmatmul.mubr.bf16.vlgmr.msra.gmra.mrb[16].mxu1 %v1007_v61  ;;  %v996_v7 = vmax.f32 %v952_v0, 0.0 }
 0x2fe   : > { %v947_v6 = vadd.f32 %v5264_v48, %v946_v5  ;;  %v994_v9 = vmax.f32 %v944_v2, 0.0  ;;  %6253 = vmatpush3.bf16.msra.mxu1 %v6995_v43  ;;  %v7002_v43 = vld [vmem:[#allocation4 + $0x38] sm:$0xff]  }
 0x2ff   : > { %v997_v8 = vmax.f32 %v955_v4, 0.0  ;;  %6254 = vmatprep.subr.bf16.mxu1 %v6996_v44 }
 0x300   : > { %v995_v10 = vmax.f32 %v947_v6, 0.0 }
 0x301   : > { %v1009_v11 = vpack.c.bf16 %v997_v8, %v996_v7 }
 0x302   : > { %v1008_v12 = vpack.c.bf16 %v995_v10, %v994_v9  ;;  %v6182_v13 = vpop.f32.mrb[24].mxu0  ;;  %6255 = vmatpush3.bf16.msra.mxu1 %v6996_v44  ;;  %v7003_v44 = vld [vmem:[#allocation2 + $0x40] sm:$0xff]  }
 0x303   : > { %v968_v14 = vadd.f32 %v6182_v13, %v5264_v48  ;;  %v959_v15 = vpop.f32.mrb[25].mxu0  ;;  %6256 = vmatprep.subr.bf16.mxu1 %v6997_v45  ;;  %6284 = vmatprep.subr.bf16.mxu0 %v7003_v44 }
 0x304   : > { %v960_v16 = vadd.f32 %v5264_v48, %v959_v15  ;;  %v6183_v17 = vpop.f32.mrb[26].mxu0  ;;  %6208 = vmatprep.mubr.bf16.mxu1 %v1008_v12 }
 0x305   : > { %v971_v18 = vadd.f32 %v6183_v17, %v5264_v48  ;;  %v962_v19 = vpop.f32.mrb[27].mxu0  ;;  %6209 = vmatmul.mubr.bf16.gmra.mrb[20].mxu1 %v1009_v11  ;;  %v1000_v21 = vmax.f32 %v968_v14, 0.0 }
 0x306   : > { %v963_v20 = vadd.f32 %v5264_v48, %v962_v19  ;;  %v998_v23 = vmax.f32 %v960_v16, 0.0  ;;  %6257 = vmatpush3.bf16.msra.mxu1 %v6997_v45  ;;  %v7004_v45 = vld [vmem:[#allocation2 + $0x48] sm:$0xff]  }
 0x307   : > { %v1001_v22 = vmax.f32 %v971_v18, 0.0  ;;  %6258 = vmatprep.subr.bf16.mxu1 %v6998_v46 }
 0x308   : > { %v999_v24 = vmax.f32 %v963_v20, 0.0 }
 0x309   : > { %v1011_v25 = vpack.c.bf16 %v1001_v22, %v1000_v21 }
 0x30a   : > { %v1010_v26 = vpack.c.bf16 %v999_v24, %v998_v23  ;;  %v6186_v27 = vpop.f32.mrb[28].mxu0  ;;  %6259 = vmatpush3.bf16.msra.mxu1 %v6998_v46  ;;  %v7005_v46 = vld [vmem:[#allocation2 + $0x50] sm:$0xff]  }
 0x30b   : > { %v984_v28 = vadd.f32 %v6186_v27, %v5264_v48  ;;  %v975_v29 = vpop.f32.mrb[29].mxu0  ;;  %6260 = vmatprep.subr.bf16.mxu1 %v6999_v47 }
 0x30c   : > { %v976_v30 = vadd.f32 %v5264_v48, %v975_v29  ;;  %v6187_v31 = vpop.f32.mrb[30].mxu0  ;;  %6212 = vmatprep.mubr.bf16.mxu1 %v1010_v26 }
 0x30d   : > { %v987_v32 = vadd.f32 %v6187_v31, %v5264_v48  ;;  %v978_v33 = vpop.f32.mrb[31].mxu0  ;;  %6213 = vmatmul.mubr.bf16.gmra.mrb[24].mxu1 %v1011_v25  ;;  %v1004_v35 = vmax.f32 %v984_v28, 0.0 }
 0x30e   : > { %v979_v34 = vadd.f32 %v5264_v48, %v978_v33  ;;  %v1002_v37 = vmax.f32 %v976_v30, 0.0  ;;  %v7000_v48 = vld [vmem:[#allocation4 + $0x28] sm:$0xff]   ;;  %6261 = vmatpush3.bf16.msra.mxu1 %v6999_v47  ;;  %v7006_v47 = vld [vmem:[#allocation2 + $0x58] sm:$0xff]  }
 0x30f   : > { %v1005_v36 = vmax.f32 %v987_v32, 0.0  ;;  %6262 = vmatprep.subr.bf16.mxu1 %v7000_v48 }
 0x310   : > { %v1003_v38 = vmax.f32 %v979_v34, 0.0 }
 0x311   : > { %v1013_v39 = vpack.c.bf16 %v1005_v36, %v1004_v35 }
 0x312   : > { %v1012_v40 = vpack.c.bf16 %v1003_v38, %v1002_v37  ;;  %6263 = vmatpush3.bf16.msra.mxu1 %v7000_v48  ;;  %v7007_v48 = vld [vmem:[#allocation2 + $0x60] sm:$0xff]  }
 0x313   : > { %6264 = vmatprep.subr.bf16.mxu1 %v7001_v42 }
 0x314   : > { %6216 = vmatprep.mubr.bf16.mxu1 %v1012_v40 }
 0x315   : > { %6217 = vmatmul.mubr.bf16.gmra.mrb[28].mxu1 %v1013_v39 }
 0x316   : > { %6265 = vmatpush3.bf16.msra.mxu1 %v7001_v42 }
 0x317   : > { %6266 = vmatprep.subr.bf16.mxu1 %v7002_v43 }
 0x31a   : > { %6267 = vmatpush3.bf16.msra.mxu1 %v7002_v43  ;;  %v7009_v43 = vld [vmem:[#allocation2 + $0x70] sm:$0xff]  }
 0x3d0   : > { %v6206_v50 = vpop.f32.mrb[16].mxu1 }
 0x3d1   : > { %v1127_v51 = vadd.f32 %v6206_v50, %v5289_v49  ;;  %v1118_v52 = vpop.f32.mrb[17].mxu1  ;;  %v5314_v50 = vld [vmem:[%s8212_s7 + $0x4] ss:$0 sm:$0xff] }
 0x3d2   : > { %v1119_v53 = vadd.f32 %v5289_v49, %v1118_v52  ;;  %v6207_v54 = vpop.f32.mrb[18].mxu1 }
 0x3d3   : > { %v1130_v55 = vadd.f32 %v6207_v54, %v5289_v49  ;;  %v1121_v56 = vpop.f32.mrb[19].mxu1  ;;  %v1183_v58 = vmax.f32 %v1127_v51, 0.0 }
 0x3d4   : > { %v1122_v57 = vadd.f32 %v5289_v49, %v1121_v56  ;;  %v1181_v60 = vmax.f32 %v1119_v53, 0.0 }
 0x3d5   : > { %v1184_v59 = vmax.f32 %v1130_v55, 0.0 }
 0x3d6   : > { %v1182_v61 = vmax.f32 %v1122_v57, 0.0 }
 0x3d7   : > { %v1198_v62 = vpack.c.bf16 %v1184_v59, %v1183_v58 }
 0x3d8   : > { %v1197_v63 = vpack.c.bf16 %v1182_v61, %v1181_v60  ;;  %v6210_v0 = vpop.f32.mrb[20].mxu1 }
 0x3d9   : > { %v1143_v1 = vadd.f32 %v6210_v0, %v5289_v49  ;;  %v1134_v2 = vpop.f32.mrb[21].mxu1 }
 0x3da   : > { %v1135_v3 = vadd.f32 %v5289_v49, %v1134_v2  ;;  %v6211_v4 = vpop.f32.mrb[22].mxu1  ;;  %6236 = vmatprep.mubr.bf16.mxu0 %v1197_v63 }
 0x3db   : > { %v1146_v5 = vadd.f32 %v6211_v4, %v5289_v49  ;;  %v1137_v6 = vpop.f32.mrb[23].mxu1  ;;  %6237 = vmatmul.mubr.bf16.vlgmr.msra.gmra.mrb[32].mxu0 %v1198_v62  ;;  %v1187_v8 = vmax.f32 %v1143_v1, 0.0 }
 0x3dc   : > { %v1138_v7 = vadd.f32 %v5289_v49, %v1137_v6  ;;  %v1185_v10 = vmax.f32 %v1135_v3, 0.0  ;;  %6285 = vmatpush3.bf16.msra.mxu0 %v7003_v44  ;;  %v7010_v44 = vld [vmem:[#allocation2 + $0x78] sm:$0xff]  }
 0x3dd   : > { %v1188_v9 = vmax.f32 %v1146_v5, 0.0  ;;  %6286 = vmatprep.subr.bf16.mxu0 %v7004_v45 }
 0x3de   : > { %v1186_v11 = vmax.f32 %v1138_v7, 0.0 }
 0x3df   : > { %v1200_v12 = vpack.c.bf16 %v1188_v9, %v1187_v8 }
 0x3e0   : > { %v1199_v13 = vpack.c.bf16 %v1186_v11, %v1185_v10  ;;  %v6214_v14 = vpop.f32.mrb[24].mxu1  ;;  %6287 = vmatpush3.bf16.msra.mxu0 %v7004_v45  ;;  %v7011_v45 = vld [vmem:[%s8210_s5 + $0x100] sm:$0xff]  }
 0x3e1   : > { %v1159_v15 = vadd.f32 %v6214_v14, %v5289_v49  ;;  %v1150_v16 = vpop.f32.mrb[25].mxu1  ;;  %6288 = vmatprep.subr.bf16.mxu0 %v7005_v46  ;;  %6316 = vmatprep.subr.bf16.mxu1 %v7011_v45 }
 0x3e2   : > { %v1151_v17 = vadd.f32 %v5289_v49, %v1150_v16  ;;  %v6215_v18 = vpop.f32.mrb[26].mxu1  ;;  %6240 = vmatprep.mubr.bf16.mxu0 %v1199_v13 }
 0x3e3   : > { %v1162_v19 = vadd.f32 %v6215_v18, %v5289_v49  ;;  %v1153_v20 = vpop.f32.mrb[27].mxu1  ;;  %6241 = vmatmul.mubr.bf16.gmra.mrb[36].mxu0 %v1200_v12  ;;  %v1191_v22 = vmax.f32 %v1159_v15, 0.0 }
 0x3e4   : > { %v1154_v21 = vadd.f32 %v5289_v49, %v1153_v20  ;;  %v1189_v24 = vmax.f32 %v1151_v17, 0.0  ;;  %6289 = vmatpush3.bf16.msra.mxu0 %v7005_v46  ;;  %v7012_v46 = vld [vmem:[%s8210_s5 + $0x108] sm:$0xff]  }
 0x3e5   : > { %v1192_v23 = vmax.f32 %v1162_v19, 0.0  ;;  %6290 = vmatprep.subr.bf16.mxu0 %v7006_v47 }
 0x3e6   : > { %v1190_v25 = vmax.f32 %v1154_v21, 0.0 }
 0x3e7   : > { %v1202_v26 = vpack.c.bf16 %v1192_v23, %v1191_v22 }
 0x3e8   : > { %v1201_v27 = vpack.c.bf16 %v1190_v25, %v1189_v24  ;;  %v6218_v28 = vpop.f32.mrb[28].mxu1  ;;  %6291 = vmatpush3.bf16.msra.mxu0 %v7006_v47  ;;  %v7013_v47 = vld [vmem:[%s8210_s5 + $0x110] sm:$0xff]  }
 0x3e9   : > { %v1175_v29 = vadd.f32 %v6218_v28, %v5289_v49  ;;  %v1166_v30 = vpop.f32.mrb[29].mxu1  ;;  %6292 = vmatprep.subr.bf16.mxu0 %v7007_v48 }
 0x3ea   : > { %v1167_v31 = vadd.f32 %v5289_v49, %v1166_v30  ;;  %v6219_v32 = vpop.f32.mrb[30].mxu1  ;;  %6244 = vmatprep.mubr.bf16.mxu0 %v1201_v27 }
 0x3eb   : > { %v1178_v33 = vadd.f32 %v6219_v32, %v5289_v49  ;;  %v1169_v34 = vpop.f32.mrb[31].mxu1  ;;  %6245 = vmatmul.mubr.bf16.gmra.mrb[40].mxu0 %v1202_v26  ;;  %v1195_v36 = vmax.f32 %v1175_v29, 0.0 }
 0x3ec   : > { %v1170_v35 = vadd.f32 %v5289_v49, %v1169_v34  ;;  %v1193_v38 = vmax.f32 %v1167_v31, 0.0  ;;  %v7008_v49 = vld [vmem:[#allocation2 + $0x68] sm:$0xff]   ;;  %6293 = vmatpush3.bf16.msra.mxu0 %v7007_v48  ;;  %v7014_v48 = vld [vmem:[%s8210_s5 + $0x118] sm:$0xff]  }
 0x3ed   : > { %v1196_v37 = vmax.f32 %v1178_v33, 0.0  ;;  %6294 = vmatprep.subr.bf16.mxu0 %v7008_v49 }
 0x3ee   : > { %v1194_v39 = vmax.f32 %v1170_v35, 0.0 }
 0x3ef   : > { %v1204_v40 = vpack.c.bf16 %v1196_v37, %v1195_v36 }
 0x3f0   : > { %v1203_v41 = vpack.c.bf16 %v1194_v39, %v1193_v38  ;;  %6295 = vmatpush3.bf16.msra.mxu0 %v7008_v49  ;;  %v7015_v49 = vld [vmem:[%s8210_s5 + $0x120] sm:$0xff]  }
 0x3f1   : > { %6296 = vmatprep.subr.bf16.mxu0 %v7009_v43 }
 0x3f2   : > { %6248 = vmatprep.mubr.bf16.mxu0 %v1203_v41 }
 0x3f3   : > { %6249 = vmatmul.mubr.bf16.gmra.mrb[44].mxu0 %v1204_v40 }
 0x3f4   : > { %6297 = vmatpush3.bf16.msra.mxu0 %v7009_v43 }
 0x3f5   : > { %6298 = vmatprep.subr.bf16.mxu0 %v7010_v44 }
 0x3f8   : > { %6299 = vmatpush3.bf16.msra.mxu0 %v7010_v44 }
 0x4ae   : > { %v6238_v51 = vpop.f32.mrb[32].mxu0 }
 0x4af   : > { %v1318_v52 = vadd.f32 %v6238_v51, %v5314_v50  ;;  %v1309_v53 = vpop.f32.mrb[33].mxu0  ;;  %v7532_v51 = vld [vmem:[%s8212_s7 + $0x5] ss:$0 sm:$0xff] }
 0x4b0   : > { %v1310_v54 = vadd.f32 %v5314_v50, %v1309_v53  ;;  %v6239_v55 = vpop.f32.mrb[34].mxu0 }
 0x4b1   : > { %v1321_v56 = vadd.f32 %v6239_v55, %v5314_v50  ;;  %v1312_v57 = vpop.f32.mrb[35].mxu0  ;;  %v1374_v59 = vmax.f32 %v1318_v52, 0.0  ;;  %v422_v55 = vld [vmem:[%s7538_s10 + $0x18] sm:$0xff] }
 0x4b2   : > { %v1313_v58 = vadd.f32 %v5314_v50, %v1312_v57  ;;  %v1372_v61 = vmax.f32 %v1310_v54, 0.0 }
 0x4b3   : > { %v1375_v60 = vmax.f32 %v1321_v56, 0.0 }
 0x4b4   : > { %v1373_v62 = vmax.f32 %v1313_v58, 0.0  ;;  %v419_v58 = vld [vmem:[%s7538_s10] sm:$0xff] }
 0x4b5   : > { %v1389_v63 = vpack.c.bf16 %v1375_v60, %v1374_v59  ;;  %v420_v60 = vld [vmem:[%s7538_s10 + $0x8] sm:$0xff] }
 0x4b6   : > { %v1388_v0 = vpack.c.bf16 %v1373_v62, %v1372_v61  ;;  %v6242_v1 = vpop.f32.mrb[36].mxu0  ;;  %v421_v62 = vld [vmem:[%s7538_s10 + $0x10] sm:$0xff] }
 0x4b7   : > { %v1334_v2 = vadd.f32 %v6242_v1, %v5314_v50  ;;  %v1325_v3 = vpop.f32.mrb[37].mxu0 }
 0x4b8   : > { %v1326_v4 = vadd.f32 %v5314_v50, %v1325_v3  ;;  %v6243_v5 = vpop.f32.mrb[38].mxu0  ;;  %6268 = vmatprep.mubr.bf16.mxu1 %v1388_v0 }
 0x4b9   : > { %v1337_v6 = vadd.f32 %v6243_v5, %v5314_v50  ;;  %v1328_v7 = vpop.f32.mrb[39].mxu0  ;;  %6269 = vmatmul.mubr.bf16.vlgmr.msra.gmra.mrb[32].mxu1 %v1389_v63  ;;  %v1378_v9 = vmax.f32 %v1334_v2, 0.0 }
 0x4ba   : > { %v1329_v8 = vadd.f32 %v5314_v50, %v1328_v7  ;;  %v1376_v11 = vmax.f32 %v1326_v4, 0.0  ;;  %6317 = vmatpush3.bf16.msra.mxu1 %v7011_v45  ;;  %v434_v45 = vld [vmem:[%s7538_s10 + $0x78] sm:$0xff] }
 0x4bb   : > { %v1379_v10 = vmax.f32 %v1337_v6, 0.0  ;;  %6318 = vmatprep.subr.bf16.mxu1 %v7012_v46 }
 0x4bc   : > { %v1377_v12 = vmax.f32 %v1329_v8, 0.0 }
 0x4bd   : > { %v1391_v13 = vpack.c.bf16 %v1379_v10, %v1378_v9  ;;  %v426_v9 = vld [vmem:[%s7538_s10 + $0x38] sm:$0xff] }
 0x4be   : > { %v1390_v14 = vpack.c.bf16 %v1377_v12, %v1376_v11  ;;  %v6246_v15 = vpop.f32.mrb[40].mxu0  ;;  %6319 = vmatpush3.bf16.msra.mxu1 %v7012_v46  ;;  %v423_v12 = vld [vmem:[%s7538_s10 + $0x20] sm:$0xff] }
 0x4bf   : > { %v1350_v16 = vadd.f32 %v6246_v15, %v5314_v50  ;;  %v1341_v17 = vpop.f32.mrb[41].mxu0  ;;  %6320 = vmatprep.subr.bf16.mxu1 %v7013_v47 }
 0x4c0   : > { %v1342_v18 = vadd.f32 %v5314_v50, %v1341_v17  ;;  %v6247_v19 = vpop.f32.mrb[42].mxu0  ;;  %6272 = vmatprep.mubr.bf16.mxu1 %v1390_v14  ;;  %v424_v14 = vld [vmem:[%s7538_s10 + $0x28] sm:$0xff] }
 0x4c1   : > { %v1353_v20 = vadd.f32 %v6247_v19, %v5314_v50  ;;  %v1344_v21 = vpop.f32.mrb[43].mxu0  ;;  %6273 = vmatmul.mubr.bf16.gmra.mrb[36].mxu1 %v1391_v13  ;;  %v1382_v23 = vmax.f32 %v1350_v16, 0.0  ;;  %v425_v16 = vld [vmem:[%s7538_s10 + $0x30] sm:$0xff] }
 0x4c2   : > { %v1345_v22 = vadd.f32 %v5314_v50, %v1344_v21  ;;  %v1380_v25 = vmax.f32 %v1342_v18, 0.0  ;;  %6321 = vmatpush3.bf16.msra.mxu1 %v7013_v47 }
 0x4c3   : > { %v1383_v24 = vmax.f32 %v1353_v20, 0.0  ;;  %6322 = vmatprep.subr.bf16.mxu1 %v7014_v48 }
 0x4c4   : > { %v1381_v26 = vmax.f32 %v1345_v22, 0.0 }
 0x4c5   : > { %v1393_v27 = vpack.c.bf16 %v1383_v24, %v1382_v23 }
 0x4c6   : > { %v1392_v28 = vpack.c.bf16 %v1381_v26, %v1380_v25  ;;  %v6250_v29 = vpop.f32.mrb[44].mxu0  ;;  %6323 = vmatpush3.bf16.msra.mxu1 %v7014_v48  ;;  %v431_v48 = vld [vmem:[%s7538_s10 + $0x60] sm:$0xff] }
 0x4c7   : > { %v1366_v30 = vadd.f32 %v6250_v29, %v5314_v50  ;;  %v1357_v31 = vpop.f32.mrb[45].mxu0  ;;  %6324 = vmatprep.subr.bf16.mxu1 %v7015_v49 }
 0x4c8   : > { %v1358_v32 = vadd.f32 %v5314_v50, %v1357_v31  ;;  %v6251_v33 = vpop.f32.mrb[46].mxu0  ;;  %6276 = vmatprep.mubr.bf16.mxu1 %v1392_v28 }
 0x4c9   : > { %v1369_v34 = vadd.f32 %v6251_v33, %v5314_v50  ;;  %v1360_v35 = vpop.f32.mrb[47].mxu0  ;;  %6277 = vmatmul.mubr.bf16.gmra.mrb[40].mxu1 %v1393_v27  ;;  %v1386_v37 = vmax.f32 %v1366_v30, 0.0  ;;  %v430_v27 = vld [vmem:[%s7538_s10 + $0x58] sm:$0xff]  ;;  %v427_v30 = vld [vmem:[%s7538_s10 + $0x40] sm:$0xff] }
 0x4ca   : > { %v1361_v36 = vadd.f32 %v5314_v50, %v1360_v35  ;;  %v1384_v39 = vmax.f32 %v1358_v32, 0.0  ;;  %v7016_v50 = vld [vmem:[%s8210_s5 + $0x128] sm:$0xff]   ;;  %6325 = vmatpush3.bf16.msra.mxu1 %v7015_v49 }
 0x4cb   : > { %v1387_v38 = vmax.f32 %v1369_v34, 0.0  ;;  %6326 = vmatprep.subr.bf16.mxu1 %v7016_v50  ;;  %v428_v32 = vld [vmem:[%s7538_s10 + $0x48] sm:$0xff]  ;;  %v429_v34 = vld [vmem:[%s7538_s10 + $0x50] sm:$0xff] }
 0x4cc   : > { %v1385_v40 = vmax.f32 %v1361_v36, 0.0 }
 0x4cd   : > { %v1395_v41 = vpack.c.bf16 %v1387_v38, %v1386_v37 }
 0x4ce   : > { %v1394_v42 = vpack.c.bf16 %v1385_v40, %v1384_v39  ;;  %6327 = vmatpush3.bf16.msra.mxu1 %v7016_v50  ;;  %v432_v50 = vld [vmem:[%s7538_s10 + $0x68] sm:$0xff] }
 0x4d0   : > { %6280 = vmatprep.mubr.bf16.mxu1 %v1394_v42 }
 0x4d1   : > { %6281 = vmatmul.mubr.bf16.gmra.mrb[44].mxu1 %v1395_v41 }
 0x58c   : > { %v6270_v52 = vpop.f32.mrb[32].mxu1 }
 0x58d   : > { %v1499_v53 = vpop.f32.mrb[33].mxu1  ;;  %v1508_v57 = vadd.f32 %v6270_v52, %v7532_v51 }
 0x58e   : > { %v1500_v54 = vadd.f32 %v7532_v51, %v1499_v53  ;;  %v6271_v56 = vpop.f32.mrb[34].mxu1  ;;  %v433_v53 = vld [vmem:[%s7538_s10 + $0x70] sm:$0xff] }
 0x58f   : > { %v1511_v59 = vadd.f32 %v6271_v56, %v7532_v51  ;;  %v1502_v61 = vpop.f32.mrb[35].mxu1  ;;  %v7554_v3 = vadd.f32 %v1508_v57, %v421_v62  ;;  %v7019_v62 = vld [vmem:[%s8210_s5 + $0x140] sm:$0xff]  }
 0x590   : > { %v1503_v63 = vadd.f32 %v7532_v51, %v1502_v61  ;;  %v7550_v1 = vadd.f32 %v1500_v54, %v419_v58  ;;  %v7018_v61 = vld [vmem:[%s8210_s5 + $0x138] sm:$0xff]   ;;  %6348 = vmatprep.subr.bf16.mxu0 %v7019_v62 }
 0x591   : > { %v7548_v0 = vadd.f32 %v1511_v59, %v422_v55 }
 0x592   : > { %v7552_v2 = vadd.f32 %v1503_v63, %v420_v60  ;;  %v7020_v63 = vld [vmem:[%s8210_s5 + $0x148] sm:$0xff]  }
 0x593   : > { %v7562_v6 = vpack.c.bf16 %v7548_v0, %v7554_v3 }
 0x594   : > { %v6274_v4 = vpop.f32.mrb[36].mxu1  ;;  %v7558_v5 = vpack.c.bf16 %v7552_v2, %v7550_v1 }
 0x595   : > { %v1515_v7 = vpop.f32.mrb[37].mxu1  ;;  %v1524_v11 = vadd.f32 %v6274_v4, %v7532_v51  ;;  %v7021_v4 = vld [vmem:[%s8210_s5 + $0x150] sm:$0xff]  }
 0x596   : > { %v1516_v8 = vadd.f32 %v7532_v51, %v1515_v7  ;;  %v6275_v10 = vpop.f32.mrb[38].mxu1  ;;  %6300 = vmatprep.mubr.bf16.mxu0 %v7558_v5  ;;  %v7022_v7 = vld [vmem:[%s8210_s5 + $0x158] sm:$0xff]  }
 0x597   : > { %v1527_v13 = vadd.f32 %v6275_v10, %v7532_v51  ;;  %v1518_v15 = vpop.f32.mrb[39].mxu1  ;;  %6301 = vmatmul.mubr.bf16.vlgmr.msra.gmra.mrb[48].mxu0 %v7562_v6  ;;  %v7580_v21 = vadd.f32 %v1524_v11, %v425_v16  ;;  %v5333_v10 = vld [vmem:[%s8212_s7 + $0x8] ss:$0 sm:$0xff] }
 0x598   : > { %v1519_v17 = vadd.f32 %v7532_v51, %v1518_v15  ;;  %v7576_v19 = vadd.f32 %v1516_v8, %v423_v12  ;;  %6349 = vmatpush3.bf16.msra.mxu0 %v7019_v62  ;;  %v7023_v8 = vld [vmem:[%s8210_s5 + $0x160] sm:$0xff]  }
 0x599   : > { %v7574_v18 = vadd.f32 %v1527_v13, %v426_v9  ;;  %6350 = vmatprep.subr.bf16.mxu0 %v7020_v63  ;;  %v7024_v9 = vld [vmem:[%s8210_s5 + $0x168] sm:$0xff]  }
 0x59a   : > { %v7578_v20 = vadd.f32 %v1519_v17, %v424_v14 }
 0x59b   : > { %v7588_v25 = vpack.c.bf16 %v7574_v18, %v7580_v21 }
 0x59c   : > { %v6278_v22 = vpop.f32.mrb[40].mxu1  ;;  %v7584_v23 = vpack.c.bf16 %v7578_v20, %v7576_v19  ;;  %6351 = vmatpush3.bf16.msra.mxu0 %v7020_v63 }
 0x59d   : > { %v1531_v24 = vpop.f32.mrb[41].mxu1  ;;  %v1540_v29 = vadd.f32 %v6278_v22, %v7532_v51  ;;  %6352 = vmatprep.subr.bf16.mxu0 %v7021_v4 }
 0x59e   : > { %v1532_v26 = vadd.f32 %v7532_v51, %v1531_v24  ;;  %v6279_v28 = vpop.f32.mrb[42].mxu1  ;;  %6304 = vmatprep.mubr.bf16.mxu0 %v7584_v23 }
 0x59f   : > { %v1543_v31 = vadd.f32 %v6279_v28, %v7532_v51  ;;  %v1534_v33 = vpop.f32.mrb[43].mxu1  ;;  %6305 = vmatmul.mubr.bf16.gmra.mrb[52].mxu0 %v7588_v25  ;;  %v7606_v39 = vadd.f32 %v1540_v29, %v429_v34 }
 0x5a0   : > { %v1535_v35 = vadd.f32 %v7532_v51, %v1534_v33  ;;  %v7602_v37 = vadd.f32 %v1532_v26, %v427_v30  ;;  %6353 = vmatpush3.bf16.msra.mxu0 %v7021_v4 }
 0x5a1   : > { %v7600_v36 = vadd.f32 %v1543_v31, %v430_v27  ;;  %6354 = vmatprep.subr.bf16.mxu0 %v7022_v7 }
 0x5a2   : > { %v7604_v38 = vadd.f32 %v1535_v35, %v428_v32 }
 0x5a3   : > { %v7614_v43 = vpack.c.bf16 %v7600_v36, %v7606_v39 }
 0x5a4   : > { %v6282_v40 = vpop.f32.mrb[44].mxu1  ;;  %v7610_v41 = vpack.c.bf16 %v7604_v38, %v7602_v37  ;;  %6355 = vmatpush3.bf16.msra.mxu0 %v7022_v7 }
 0x5a5   : > { %v1547_v42 = vpop.f32.mrb[45].mxu1  ;;  %v1556_v47 = vadd.f32 %v6282_v40, %v7532_v51  ;;  %6356 = vmatprep.subr.bf16.mxu0 %v7023_v8 }
 0x5a6   : > { %v1548_v44 = vadd.f32 %v7532_v51, %v1547_v42  ;;  %v6283_v46 = vpop.f32.mrb[46].mxu1  ;;  %6308 = vmatprep.mubr.bf16.mxu0 %v7610_v41 }
 0x5a7   : > { %v1559_v49 = vadd.f32 %v6283_v46, %v7532_v51  ;;  %v1550_v52 = vpop.f32.mrb[47].mxu1  ;;  %6309 = vmatmul.mubr.bf16.gmra.mrb[56].mxu0 %v7614_v43  ;;  %v7632_v58 = vadd.f32 %v1556_v47, %v433_v53 }
 0x5a8   : > { %v1551_v54 = vadd.f32 %v7532_v51, %v1550_v52  ;;  %v7628_v56 = vadd.f32 %v1548_v44, %v431_v48  ;;  %v7017_v51 = vld [vmem:[%s8210_s5 + $0x130] sm:$0xff]   ;;  %6357 = vmatpush3.bf16.msra.mxu0 %v7023_v8 }
 0x5a9   : > { %v7626_v55 = vadd.f32 %v1559_v49, %v434_v45  ;;  %6328 = vmatprep.subr.bf16.mxu1 %v7017_v51  ;;  %6358 = vmatprep.subr.bf16.mxu0 %v7024_v9 }
 0x5aa   : > { %v7630_v57 = vadd.f32 %v1551_v54, %v432_v50  ;;  %6329 = vmatpush3.bf16.msra.mxu1 %v7017_v51 }
 0x5ab   : > { %v7640_v60 = vpack.c.bf16 %v7626_v55, %v7632_v58  ;;  %6330 = vmatprep.subr.bf16.mxu1 %v7018_v61 }
 0x5ac   : > { %v7636_v59 = vpack.c.bf16 %v7630_v57, %v7628_v56  ;;  %6359 = vmatpush3.bf16.msra.mxu0 %v7024_v9 }
 0x5ae   : > { %6312 = vmatprep.mubr.bf16.mxu0 %v7636_v59  ;;  %6331 = vmatpush3.bf16.msra.mxu1 %v7018_v61 }
 0x5af   : > { %6313 = vmatmul.mubr.bf16.gmra.mrb[60].mxu0 %v7640_v60 }
 0x66a   : > { %v6302_v11 = vpop.f32.mrb[48].mxu0 }
 0x66b   : > { %v1700_v12 = vadd.f32 %v6302_v11, %v5333_v10  ;;  %v1691_v13 = vpop.f32.mrb[49].mxu0 }
 0x66c   : > { %v1692_v14 = vadd.f32 %v5333_v10, %v1691_v13  ;;  %v6303_v15 = vpop.f32.mrb[50].mxu0 }
 0x66d   : > { %v1703_v16 = vadd.f32 %v6303_v15, %v5333_v10  ;;  %v1694_v17 = vpop.f32.mrb[51].mxu0  ;;  %v1756_v24 = vmax.f32 %v1700_v12, 0.0 }
 0x66e   : > { %v1695_v22 = vadd.f32 %v5333_v10, %v1694_v17  ;;  %v1754_v27 = vmax.f32 %v1692_v14, 0.0 }
 0x66f   : > { %v1757_v26 = vmax.f32 %v1703_v16, 0.0 }
 0x670   : > { %v1755_v28 = vmax.f32 %v1695_v22, 0.0 }
 0x671   : > { %v1771_v29 = vpack.c.bf16 %v1757_v26, %v1756_v24 }
 0x672   : > { %v1770_v30 = vpack.c.bf16 %v1755_v28, %v1754_v27  ;;  %v6306_v31 = vpop.f32.mrb[52].mxu0 }
 0x673   : > { %v1716_v32 = vadd.f32 %v6306_v31, %v5333_v10  ;;  %v1707_v33 = vpop.f32.mrb[53].mxu0 }
 0x674   : > { %v1708_v34 = vadd.f32 %v5333_v10, %v1707_v33  ;;  %v6307_v35 = vpop.f32.mrb[54].mxu0  ;;  %6332 = vmatprep.mubr.bf16.mxu1 %v1770_v30 }
 0x675   : > { %v1719_v40 = vadd.f32 %v6307_v35, %v5333_v10  ;;  %v1710_v42 = vpop.f32.mrb[55].mxu0  ;;  %6333 = vmatmul.mubr.bf16.vlgmr.msra.gmra.mrb[48].mxu1 %v1771_v29  ;;  %v1760_v45 = vmax.f32 %v1716_v32, 0.0  ;;  %v7026_v35 = vld [vmem:[%s8210_s5 + $0x178] sm:$0xff]  }
 0x676   : > { %v1711_v44 = vadd.f32 %v5333_v10, %v1710_v42  ;;  %v1758_v47 = vmax.f32 %v1708_v34, 0.0  ;;  %v7025_v34 = vld [vmem:[%s8210_s5 + $0x170] sm:$0xff]  }
 0x677   : > { %v1761_v46 = vmax.f32 %v1719_v40, 0.0  ;;  %6360 = vmatprep.subr.bf16.mxu0 %v7025_v34  ;;  %v7028_v40 = vld [vmem:[%s8210_s5 + $0x188] sm:$0xff]   ;;  %v7029_v42 = vld [vmem:[%s8210_s5 + $0x190] sm:$0xff]  }
 0x678   : > { %v1759_v48 = vmax.f32 %v1711_v44, 0.0  ;;  %6361 = vmatpush3.bf16.msra.mxu0 %v7025_v34  ;;  %v7030_v44 = vld [vmem:[%s8210_s5 + $0x198] sm:$0xff]  }
 0x679   : > { %v1773_v49 = vpack.c.bf16 %v1761_v46, %v1760_v45  ;;  %6362 = vmatprep.subr.bf16.mxu0 %v7026_v35  ;;  %v7031_v45 = vld [vmem:[%s8210_s5 + $0x1a0] sm:$0xff]   ;;  %v7032_v46 = vld [vmem:[%s8210_s5 + $0x1a8] sm:$0xff]  }
 0x67a   : > { %v1772_v50 = vpack.c.bf16 %v1759_v48, %v1758_v47  ;;  %v6310_v52 = vpop.f32.mrb[56].mxu0  ;;  %v5359_v47 = vld [vmem:[%s8212_s7 + $0x9] ss:$0 sm:$0xff] }
 0x67b   : > { %v1732_v53 = vadd.f32 %v6310_v52, %v5333_v10  ;;  %v1723_v54 = vpop.f32.mrb[57].mxu0 }
 0x67c   : > { %v1724_v51 = vadd.f32 %v5333_v10, %v1723_v54  ;;  %v6311_v61 = vpop.f32.mrb[58].mxu0  ;;  %6336 = vmatprep.mubr.bf16.mxu1 %v1772_v50  ;;  %6363 = vmatpush3.bf16.msra.mxu0 %v7026_v35 }
 0x67d   : > { %v1735_v62 = vadd.f32 %v6311_v61, %v5333_v10  ;;  %v1726_v63 = vpop.f32.mrb[59].mxu0  ;;  %6337 = vmatmul.mubr.bf16.gmra.mrb[52].mxu1 %v1773_v49  ;;  %v1764_v7 = vmax.f32 %v1732_v53, 0.0 }
 0x67e   : > { %v1727_v4 = vadd.f32 %v5333_v10, %v1726_v63  ;;  %v1762_v9 = vmax.f32 %v1724_v51, 0.0 }
 0x67f   : > { %v1765_v8 = vmax.f32 %v1735_v62, 0.0 }
 0x680   : > { %v1763_v11 = vmax.f32 %v1727_v4, 0.0 }
 0x681   : > { %v1775_v12 = vpack.c.bf16 %v1765_v8, %v1764_v7 }
 0x682   : > { %v1774_v13 = vpack.c.bf16 %v1763_v11, %v1762_v9  ;;  %v6314_v14 = vpop.f32.mrb[60].mxu0 }
 0x683   : > { %v1748_v15 = vadd.f32 %v6314_v14, %v5333_v10  ;;  %v1739_v16 = vpop.f32.mrb[61].mxu0 }
 0x684   : > { %v1740_v17 = vadd.f32 %v5333_v10, %v1739_v16  ;;  %v6315_v22 = vpop.f32.mrb[62].mxu0  ;;  %6340 = vmatprep.mubr.bf16.mxu1 %v1774_v13 }
 0x685   : > { %v1751_v24 = vadd.f32 %v6315_v22, %v5333_v10  ;;  %v1742_v26 = vpop.f32.mrb[63].mxu0  ;;  %6341 = vmatmul.mubr.bf16.gmra.mrb[56].mxu1 %v1775_v12  ;;  %v1768_v28 = vmax.f32 %v1748_v15, 0.0 }
 0x686   : > { %v1743_v27 = vadd.f32 %v5333_v10, %v1742_v26  ;;  %v1766_v30 = vmax.f32 %v1740_v17, 0.0  ;;  %v7027_v10 = vld [vmem:[%s8210_s5 + $0x180] sm:$0xff]  }
 0x687   : > { %v1769_v29 = vmax.f32 %v1751_v24, 0.0  ;;  %6380 = vmatprep.subr.bf16.mxu1 %v7027_v10 }
 0x688   : > { %v1767_v31 = vmax.f32 %v1743_v27, 0.0  ;;  %6381 = vmatpush3.bf16.msra.mxu1 %v7027_v10 }
 0x689   : > { %v1777_v32 = vpack.c.bf16 %v1769_v29, %v1768_v28  ;;  %6382 = vmatprep.subr.bf16.mxu1 %v7028_v40 }
 0x68a   : > { %v1776_v33 = vpack.c.bf16 %v1767_v31, %v1766_v30 }
 0x68c   : > { %6344 = vmatprep.mubr.bf16.mxu1 %v1776_v33  ;;  %6383 = vmatpush3.bf16.msra.mxu1 %v7028_v40 }
 0x68d   : > { %6345 = vmatmul.mubr.bf16.gmra.mrb[60].mxu1 %v1777_v32  ;;  %6384 = vmatprep.subr.bf16.mxu1 %v7029_v42 }
 0x690   : > { %6385 = vmatpush3.bf16.msra.mxu1 %v7029_v42 }
 0x691   : > { %6386 = vmatprep.subr.bf16.mxu1 %v7030_v44 }
 0x694   : > { %6387 = vmatpush3.bf16.msra.mxu1 %v7030_v44 }
 0x695   : > { %6388 = vmatprep.subr.bf16.mxu1 %v7031_v45 }
 0x698   : > { %6389 = vmatpush3.bf16.msra.mxu1 %v7031_v45 }
 0x699   : > { %6390 = vmatprep.subr.bf16.mxu1 %v7032_v46 }
 0x69c   : > { %6391 = vmatpush3.bf16.msra.mxu1 %v7032_v46 }
 0x748   : > { %v6334_v48 = vpop.f32.mrb[48].mxu1 }
 0x749   : > { %v1891_v49 = vadd.f32 %v6334_v48, %v5359_v47  ;;  %v1882_v50 = vpop.f32.mrb[49].mxu1 }
 0x74a   : > { %v1883_v52 = vadd.f32 %v5359_v47, %v1882_v50  ;;  %v6335_v53 = vpop.f32.mrb[50].mxu1 }
 0x74b   : > { %v1894_v54 = vadd.f32 %v6335_v53, %v5359_v47  ;;  %v1885_v51 = vpop.f32.mrb[51].mxu1  ;;  %v1947_v62 = vmax.f32 %v1891_v49, 0.0 }
 0x74c   : > { %v1886_v61 = vadd.f32 %v5359_v47, %v1885_v51  ;;  %v1945_v4 = vmax.f32 %v1883_v52, 0.0 }
 0x74d   : > { %v1948_v63 = vmax.f32 %v1894_v54, 0.0 }
 0x74e   : > { %v1946_v7 = vmax.f32 %v1886_v61, 0.0 }
 0x74f   : > { %v1962_v8 = vpack.c.bf16 %v1948_v63, %v1947_v62 }
 0x750   : > { %v1961_v9 = vpack.c.bf16 %v1946_v7, %v1945_v4  ;;  %v6338_v11 = vpop.f32.mrb[52].mxu1 }
 0x751   : > { %v1907_v12 = vadd.f32 %v6338_v11, %v5359_v47  ;;  %v1898_v13 = vpop.f32.mrb[53].mxu1 }
 0x752   : > { %v1899_v14 = vadd.f32 %v5359_v47, %v1898_v13  ;;  %v6339_v15 = vpop.f32.mrb[54].mxu1  ;;  %6364 = vmatprep.mubr.bf16.mxu0 %v1961_v9 }
 0x753   : > { %v1910_v16 = vadd.f32 %v6339_v15, %v5359_v47  ;;  %v1901_v17 = vpop.f32.mrb[55].mxu1  ;;  %6365 = vmatmul.mubr.bf16.vlgmr.msra.gmra.mrb[64].mxu0 %v1962_v8  ;;  %v1951_v24 = vmax.f32 %v1907_v12, 0.0  ;;  %v7034_v15 = vld [vmem:[%s8210_s5 + $0x1b8] sm:$0xff]  }
 0x754   : > { %v1902_v22 = vadd.f32 %v5359_v47, %v1901_v17  ;;  %v1949_v27 = vmax.f32 %v1899_v14, 0.0  ;;  %v7033_v14 = vld [vmem:[%s8210_s5 + $0x1b0] sm:$0xff]  }
 0x755   : > { %v1952_v26 = vmax.f32 %v1910_v16, 0.0  ;;  %6392 = vmatprep.subr.bf16.mxu1 %v7033_v14  ;;  %v7036_v16 = vld [vmem:[%s8210_s5 + $0x1c8] sm:$0xff]   ;;  %v7037_v17 = vld [vmem:[%s8210_s5 + $0x1d0] sm:$0xff]  }
 0x756   : > { %v1950_v28 = vmax.f32 %v1902_v22, 0.0  ;;  %6393 = vmatpush3.bf16.msra.mxu1 %v7033_v14  ;;  %v7038_v22 = vld [vmem:[%s8210_s5 + $0x1d8] sm:$0xff]  }
 0x757   : > { %v1964_v29 = vpack.c.bf16 %v1952_v26, %v1951_v24  ;;  %6394 = vmatprep.subr.bf16.mxu1 %v7034_v15  ;;  %v7039_v24 = vld [vmem:[%s8210_s5 + $0x1e0] sm:$0xff]   ;;  %v7040_v26 = vld [vmem:[%s8210_s5 + $0x1e8] sm:$0xff]  }
 0x758   : > { %v1963_v30 = vpack.c.bf16 %v1950_v28, %v1949_v27  ;;  %v6342_v31 = vpop.f32.mrb[56].mxu1  ;;  %v5385_v27 = vld [vmem:[%s8212_s7 + $0xa] ss:$0 sm:$0xff] }
 0x759   : > { %v1923_v32 = vadd.f32 %v6342_v31, %v5359_v47  ;;  %v1914_v33 = vpop.f32.mrb[57].mxu1 }
 0x75a   : > { %v1915_v34 = vadd.f32 %v5359_v47, %v1914_v33  ;;  %v6343_v35 = vpop.f32.mrb[58].mxu1  ;;  %6368 = vmatprep.mubr.bf16.mxu0 %v1963_v30  ;;  %6395 = vmatpush3.bf16.msra.mxu1 %v7034_v15 }
 0x75b   : > { %v1926_v10 = vadd.f32 %v6343_v35, %v5359_v47  ;;  %v1917_v40 = vpop.f32.mrb[59].mxu1  ;;  %6369 = vmatmul.mubr.bf16.gmra.mrb[68].mxu0 %v1964_v29  ;;  %v1955_v44 = vmax.f32 %v1923_v32, 0.0 }
 0x75c   : > { %v1918_v42 = vadd.f32 %v5359_v47, %v1917_v40  ;;  %v1953_v46 = vmax.f32 %v1915_v34, 0.0 }
 0x75d   : > { %v1956_v45 = vmax.f32 %v1926_v10, 0.0 }
 0x75e   : > { %v1954_v48 = vmax.f32 %v1918_v42, 0.0 }
 0x75f   : > { %v1966_v49 = vpack.c.bf16 %v1956_v45, %v1955_v44 }
 0x760   : > { %v1965_v50 = vpack.c.bf16 %v1954_v48, %v1953_v46  ;;  %v6346_v52 = vpop.f32.mrb[60].mxu1 }
 0x761   : > { %v1939_v53 = vadd.f32 %v6346_v52, %v5359_v47  ;;  %v1930_v54 = vpop.f32.mrb[61].mxu1 }
 0x762   : > { %v1931_v51 = vadd.f32 %v5359_v47, %v1930_v54  ;;  %v6347_v61 = vpop.f32.mrb[62].mxu1  ;;  %6372 = vmatprep.mubr.bf16.mxu0 %v1965_v50 }
 0x763   : > { %v1942_v62 = vadd.f32 %v6347_v61, %v5359_v47  ;;  %v1933_v63 = vpop.f32.mrb[63].mxu1  ;;  %6373 = vmatmul.mubr.bf16.gmra.mrb[72].mxu0 %v1966_v49  ;;  %v1959_v7 = vmax.f32 %v1939_v53, 0.0 }
 0x764   : > { %v1934_v4 = vadd.f32 %v5359_v47, %v1933_v63  ;;  %v1957_v9 = vmax.f32 %v1931_v51, 0.0  ;;  %v7035_v47 = vld [vmem:[%s8210_s5 + $0x1c0] sm:$0xff]  }
 0x765   : > { %v1960_v8 = vmax.f32 %v1942_v62, 0.0  ;;  %6412 = vmatprep.subr.bf16.mxu0 %v7035_v47 }
 0x766   : > { %v1958_v11 = vmax.f32 %v1934_v4, 0.0  ;;  %6413 = vmatpush3.bf16.msra.mxu0 %v7035_v47 }
 0x767   : > { %v1968_v12 = vpack.c.bf16 %v1960_v8, %v1959_v7  ;;  %6414 = vmatprep.subr.bf16.mxu0 %v7036_v16 }
 0x768   : > { %v1967_v13 = vpack.c.bf16 %v1958_v11, %v1957_v9 }
 0x76a   : > { %6376 = vmatprep.mubr.bf16.mxu0 %v1967_v13  ;;  %6415 = vmatpush3.bf16.msra.mxu0 %v7036_v16 }
 0x76b   : > { %6377 = vmatmul.mubr.bf16.gmra.mrb[76].mxu0 %v1968_v12  ;;  %6416 = vmatprep.subr.bf16.mxu0 %v7037_v17 }
 0x76e   : > { %6417 = vmatpush3.bf16.msra.mxu0 %v7037_v17 }
 0x76f   : > { %6418 = vmatprep.subr.bf16.mxu0 %v7038_v22 }
 0x772   : > { %6419 = vmatpush3.bf16.msra.mxu0 %v7038_v22 }
 0x773   : > { %6420 = vmatprep.subr.bf16.mxu0 %v7039_v24 }
 0x776   : > { %6421 = vmatpush3.bf16.msra.mxu0 %v7039_v24 }
 0x777   : > { %6422 = vmatprep.subr.bf16.mxu0 %v7040_v26 }
 0x77a   : > { %6423 = vmatpush3.bf16.msra.mxu0 %v7040_v26 }
 0x826   : > { %v6366_v28 = vpop.f32.mrb[64].mxu0 }
 0x827   : > { %v2082_v29 = vadd.f32 %v6366_v28, %v5385_v27  ;;  %v2073_v30 = vpop.f32.mrb[65].mxu0 }
 0x828   : > { %v2074_v31 = vadd.f32 %v5385_v27, %v2073_v30  ;;  %v6367_v32 = vpop.f32.mrb[66].mxu0 }
 0x829   : > { %v2085_v33 = vadd.f32 %v6367_v32, %v5385_v27  ;;  %v2076_v34 = vpop.f32.mrb[67].mxu0  ;;  %v2138_v10 = vmax.f32 %v2082_v29, 0.0 }
 0x82a   : > { %v2077_v35 = vadd.f32 %v5385_v27, %v2076_v34  ;;  %v2136_v42 = vmax.f32 %v2074_v31, 0.0 }
 0x82b   : > { %v2139_v40 = vmax.f32 %v2085_v33, 0.0 }
 0x82c   : > { %v2137_v44 = vmax.f32 %v2077_v35, 0.0 }
 0x82d   : > { %v2153_v45 = vpack.c.bf16 %v2139_v40, %v2138_v10 }
 0x82e   : > { %v2152_v46 = vpack.c.bf16 %v2137_v44, %v2136_v42  ;;  %v6370_v48 = vpop.f32.mrb[68].mxu0 }
 0x82f   : > { %v2098_v49 = vadd.f32 %v6370_v48, %v5385_v27  ;;  %v2089_v50 = vpop.f32.mrb[69].mxu0 }
 0x830   : > { %v2090_v52 = vadd.f32 %v5385_v27, %v2089_v50  ;;  %v6371_v53 = vpop.f32.mrb[70].mxu0  ;;  %6396 = vmatprep.mubr.bf16.mxu1 %v2152_v46 }
 0x831   : > { %v2101_v54 = vadd.f32 %v6371_v53, %v5385_v27  ;;  %v2092_v51 = vpop.f32.mrb[71].mxu0  ;;  %6397 = vmatmul.mubr.bf16.vlgmr.msra.gmra.mrb[64].mxu1 %v2153_v45  ;;  %v2142_v62 = vmax.f32 %v2098_v49, 0.0  ;;  %v7042_v53 = vld [vmem:[%s8210_s5 + $0x1f8] sm:$0xff]  }
 0x832   : > { %v2093_v61 = vadd.f32 %v5385_v27, %v2092_v51  ;;  %v2140_v4 = vmax.f32 %v2090_v52, 0.0  ;;  %v7041_v52 = vld [vmem:[%s8210_s5 + $0x1f0] sm:$0xff]   ;;  %v7052_v51 = vld [vmem:[#allocation4 + $0x48] sm:$0xff]  }
 0x833   : > { %v2143_v63 = vmax.f32 %v2101_v54, 0.0  ;;  %6424 = vmatprep.subr.bf16.mxu0 %v7041_v52  ;;  %v7051_v54 = vld [vmem:[#allocation4 + $0x40] sm:$0xff]  }
 0x834   : > { %v2141_v7 = vmax.f32 %v2093_v61, 0.0  ;;  %6425 = vmatpush3.bf16.msra.mxu0 %v7041_v52  ;;  %6444 = vmatprep.subr.bf16.mxu1 %v7051_v54  ;;  %v7053_v61 = vld [vmem:[#allocation4 + $0x50] sm:$0xff]  }
 0x835   : > { %v2155_v8 = vpack.c.bf16 %v2143_v63, %v2142_v62  ;;  %6426 = vmatprep.subr.bf16.mxu0 %v7042_v53  ;;  %6445 = vmatpush3.bf16.msra.mxu1 %v7051_v54  ;;  %v7054_v62 = vld [vmem:[#allocation4 + $0x58] sm:$0xff]   ;;  %v7055_v63 = vld [vmem:[#allocation4 + $0x60] sm:$0xff]  }
 0x836   : > { %v2154_v9 = vpack.c.bf16 %v2141_v7, %v2140_v4  ;;  %v6374_v11 = vpop.f32.mrb[72].mxu0  ;;  %6446 = vmatprep.subr.bf16.mxu1 %v7052_v51  ;;  %v7056_v4 = vld [vmem:[#allocation4 + $0x68] sm:$0xff]  }
 0x837   : > { %v2114_v12 = vadd.f32 %v6374_v11, %v5385_v27  ;;  %v2105_v13 = vpop.f32.mrb[73].mxu0  ;;  %v7734_v7 = vld [vmem:[%s8212_s7 + $0xb] ss:$0 sm:$0xff] }
 0x838   : > { %v2106_v14 = vadd.f32 %v5385_v27, %v2105_v13  ;;  %v6375_v15 = vpop.f32.mrb[74].mxu0  ;;  %6400 = vmatprep.mubr.bf16.mxu1 %v2154_v9  ;;  %6427 = vmatpush3.bf16.msra.mxu0 %v7042_v53 }
 0x839   : > { %v2117_v47 = vadd.f32 %v6375_v15, %v5385_v27  ;;  %v2108_v16 = vpop.f32.mrb[75].mxu0  ;;  %6401 = vmatmul.mubr.bf16.gmra.mrb[68].mxu1 %v2155_v8  ;;  %v2146_v22 = vmax.f32 %v2114_v12, 0.0 }
 0x83a   : > { %v2109_v17 = vadd.f32 %v5385_v27, %v2108_v16  ;;  %v2144_v26 = vmax.f32 %v2106_v14, 0.0  ;;  %6447 = vmatpush3.bf16.msra.mxu1 %v7052_v51  ;;  %v7046_v51 = vld [vmem:[#allocation2 + $0x98] sm:$0xff]  }
 0x83b   : > { %v2147_v24 = vmax.f32 %v2117_v47, 0.0  ;;  %6448 = vmatprep.subr.bf16.mxu1 %v7053_v61 }
 0x83c   : > { %v2145_v28 = vmax.f32 %v2109_v17, 0.0 }
 0x83d   : > { %v2157_v29 = vpack.c.bf16 %v2147_v24, %v2146_v22 }
 0x83e   : > { %v2156_v30 = vpack.c.bf16 %v2145_v28, %v2144_v26  ;;  %v6378_v31 = vpop.f32.mrb[76].mxu0  ;;  %6449 = vmatpush3.bf16.msra.mxu1 %v7053_v61 }
 0x83f   : > { %v2130_v32 = vadd.f32 %v6378_v31, %v5385_v27  ;;  %v2121_v33 = vpop.f32.mrb[77].mxu0  ;;  %6450 = vmatprep.subr.bf16.mxu1 %v7054_v62 }
 0x840   : > { %v2122_v34 = vadd.f32 %v5385_v27, %v2121_v33  ;;  %v6379_v35 = vpop.f32.mrb[78].mxu0  ;;  %6404 = vmatprep.mubr.bf16.mxu1 %v2156_v30 }
 0x841   : > { %v2133_v10 = vadd.f32 %v6379_v35, %v5385_v27  ;;  %v2124_v40 = vpop.f32.mrb[79].mxu0  ;;  %6405 = vmatmul.mubr.bf16.gmra.mrb[72].mxu1 %v2157_v29  ;;  %v2150_v44 = vmax.f32 %v2130_v32, 0.0  ;;  %v7044_v32 = vld [vmem:[#allocation2 + $0x88] sm:$0xff]  }
 0x842   : > { %v2125_v42 = vadd.f32 %v5385_v27, %v2124_v40  ;;  %v2148_v46 = vmax.f32 %v2122_v34, 0.0  ;;  %v7043_v27 = vld [vmem:[#allocation2 + $0x80] sm:$0xff]   ;;  %6451 = vmatpush3.bf16.msra.mxu1 %v7054_v62 }
 0x843   : > { %v2151_v45 = vmax.f32 %v2133_v10, 0.0  ;;  %6476 = vmatprep.subr.bf16.mxu0 %v7043_v27  ;;  %6452 = vmatprep.subr.bf16.mxu1 %v7055_v63 }
 0x844   : > { %v2149_v48 = vmax.f32 %v2125_v42, 0.0 }
 0x845   : > { %v2159_v49 = vpack.c.bf16 %v2151_v45, %v2150_v44  ;;  %v7045_v45 = vld [vmem:[#allocation2 + $0x90] sm:$0xff]  }
 0x846   : > { %v2158_v50 = vpack.c.bf16 %v2149_v48, %v2148_v46  ;;  %6453 = vmatpush3.bf16.msra.mxu1 %v7055_v63 }
 0x847   : > { %6454 = vmatprep.subr.bf16.mxu1 %v7056_v4 }
 0x848   : > { %6408 = vmatprep.mubr.bf16.mxu1 %v2158_v50 }
 0x849   : > { %6409 = vmatmul.mubr.bf16.gmra.mrb[76].mxu1 %v2159_v49 }
 0x84a   : > { %6455 = vmatpush3.bf16.msra.mxu1 %v7056_v4 }
 0x904   : > { %v6398_v8 = vpop.f32.mrb[64].mxu1 }
 0x905   : > { %v2273_v9 = vadd.f32 %v6398_v8, %v7734_v7  ;;  %v2264_v11 = vpop.f32.mrb[65].mxu1 }
 0x906   : > { %v2265_v12 = vadd.f32 %v7734_v7, %v2264_v11  ;;  %v6399_v13 = vpop.f32.mrb[66].mxu1  ;;  %v7047_v11 = vld [vmem:[#allocation2 + $0xa0] sm:$0xff]  }
 0x907   : > { %v2276_v14 = vadd.f32 %v6399_v13, %v7734_v7  ;;  %v2267_v15 = vpop.f32.mrb[67].mxu1  ;;  %v2329_v16 = vmax.f32 %v2273_v9, 0.0 }
 0x908   : > { %v2268_v47 = vadd.f32 %v7734_v7, %v2267_v15  ;;  %v2327_v22 = vmax.f32 %v2265_v12, 0.0 }
 0x909   : > { %v2330_v17 = vmax.f32 %v2276_v14, 0.0 }
 0x90a   : > { %v2328_v24 = vmax.f32 %v2268_v47, 0.0 }
 0x90b   : > { %v2344_v26 = vpack.c.bf16 %v2330_v17, %v2329_v16 }
 0x90c   : > { %v2343_v28 = vpack.c.bf16 %v2328_v24, %v2327_v22  ;;  %v6402_v29 = vpop.f32.mrb[68].mxu1  ;;  %v7048_v22 = vld [vmem:[#allocation2 + $0xa8] sm:$0xff]  }
 0x90d   : > { %v2289_v30 = vadd.f32 %v6402_v29, %v7734_v7  ;;  %v2280_v31 = vpop.f32.mrb[69].mxu1 }
 0x90e   : > { %v2281_v33 = vadd.f32 %v7734_v7, %v2280_v31  ;;  %v6403_v34 = vpop.f32.mrb[70].mxu1  ;;  %6428 = vmatprep.mubr.bf16.mxu0 %v2343_v28 }
 0x90f   : > { %v2292_v35 = vadd.f32 %v6403_v34, %v7734_v7  ;;  %v2283_v10 = vpop.f32.mrb[71].mxu1  ;;  %6429 = vmatmul.mubr.bf16.vlgmr.msra.gmra.mrb[80].mxu0 %v2344_v26  ;;  %v2333_v42 = vmax.f32 %v2289_v30, 0.0 }
 0x910   : > { %v2284_v40 = vadd.f32 %v7734_v7, %v2283_v10  ;;  %6477 = vmatpush3.bf16.msra.mxu0 %v7043_v27  ;;  %v2331_v46 = vmax.f32 %v2281_v33, 0.0  ;;  %v7049_v33 = vld [vmem:[#allocation2 + $0xb0] sm:$0xff]  }
 0x911   : > { %v2334_v44 = vmax.f32 %v2292_v35, 0.0  ;;  %6478 = vmatprep.subr.bf16.mxu0 %v7044_v32 }
 0x912   : > { %v2332_v48 = vmax.f32 %v2284_v40, 0.0 }
 0x913   : > { %v2346_v49 = vpack.c.bf16 %v2334_v44, %v2333_v42  ;;  %v7050_v42 = vld [vmem:[#allocation2 + $0xb8] sm:$0xff]   ;;  %v7784_v44 = vld [vmem:[%s8212_s7 + $0xc] ss:$0 sm:$0xff] }
 0x914   : > { %v2345_v50 = vpack.c.bf16 %v2332_v48, %v2331_v46  ;;  %6479 = vmatpush3.bf16.msra.mxu0 %v7044_v32  ;;  %v6406_v52 = vpop.f32.mrb[72].mxu1 }
 0x915   : > { %v2305_v53 = vadd.f32 %v6406_v52, %v7734_v7  ;;  %v2296_v54 = vpop.f32.mrb[73].mxu1  ;;  %6480 = vmatprep.subr.bf16.mxu0 %v7045_v45 }
 0x916   : > { %v2297_v61 = vadd.f32 %v7734_v7, %v2296_v54  ;;  %v6407_v62 = vpop.f32.mrb[74].mxu1  ;;  %6432 = vmatprep.mubr.bf16.mxu0 %v2345_v50 }
 0x917   : > { %v2308_v27 = vadd.f32 %v6407_v62, %v7734_v7  ;;  %v2299_v63 = vpop.f32.mrb[75].mxu1  ;;  %6433 = vmatmul.mubr.bf16.gmra.mrb[84].mxu0 %v2346_v49  ;;  %v2337_v8 = vmax.f32 %v2305_v53, 0.0 }
 0x918   : > { %v2300_v4 = vadd.f32 %v7734_v7, %v2299_v63  ;;  %6481 = vmatpush3.bf16.msra.mxu0 %v7045_v45  ;;  %v2335_v12 = vmax.f32 %v2297_v61, 0.0 }
 0x919   : > { %v2338_v9 = vmax.f32 %v2308_v27, 0.0  ;;  %6482 = vmatprep.subr.bf16.mxu0 %v7046_v51 }
 0x91a   : > { %v2336_v13 = vmax.f32 %v2300_v4, 0.0 }
 0x91b   : > { %v2348_v14 = vpack.c.bf16 %v2338_v9, %v2337_v8 }
 0x91c   : > { %v2347_v15 = vpack.c.bf16 %v2336_v13, %v2335_v12  ;;  %6483 = vmatpush3.bf16.msra.mxu0 %v7046_v51  ;;  %v6410_v47 = vpop.f32.mrb[76].mxu1  ;;  %v7060_v12 = vld [vmem:[%s8210_s5 + $0x208] sm:$0xff]  }
 0x91d   : > { %v2321_v16 = vadd.f32 %v6410_v47, %v7734_v7  ;;  %v2312_v17 = vpop.f32.mrb[77].mxu1  ;;  %6484 = vmatprep.subr.bf16.mxu0 %v7047_v11 }
 0x91e   : > { %v2313_v24 = vadd.f32 %v7734_v7, %v2312_v17  ;;  %v6411_v26 = vpop.f32.mrb[78].mxu1  ;;  %6436 = vmatprep.mubr.bf16.mxu0 %v2347_v15 }
 0x91f   : > { %v2324_v28 = vadd.f32 %v6411_v26, %v7734_v7  ;;  %v2315_v29 = vpop.f32.mrb[79].mxu1  ;;  %6437 = vmatmul.mubr.bf16.gmra.mrb[88].mxu0 %v2348_v14  ;;  %v2341_v31 = vmax.f32 %v2321_v16, 0.0 }
 0x920   : > { %v2316_v30 = vadd.f32 %v7734_v7, %v2315_v29  ;;  %6485 = vmatpush3.bf16.msra.mxu0 %v7047_v11  ;;  %v2339_v34 = vmax.f32 %v2313_v24, 0.0  ;;  %v7057_v7 = vld [vmem:[#allocation4 + $0x70] sm:$0xff]  }
 0x921   : > { %v2342_v32 = vmax.f32 %v2324_v28, 0.0  ;;  %6486 = vmatprep.subr.bf16.mxu0 %v7048_v22  ;;  %6456 = vmatprep.subr.bf16.mxu1 %v7057_v7  ;;  %v7061_v24 = vld [vmem:[%s8210_s5 + $0x210] sm:$0xff]  }
 0x922   : > { %v2340_v35 = vmax.f32 %v2316_v30, 0.0  ;;  %6457 = vmatpush3.bf16.msra.mxu1 %v7057_v7 }
 0x923   : > { %v2350_v10 = vpack.c.bf16 %v2342_v32, %v2341_v31 }
 0x924   : > { %v2349_v40 = vpack.c.bf16 %v2340_v35, %v2339_v34  ;;  %6487 = vmatpush3.bf16.msra.mxu0 %v7048_v22  ;;  %v7062_v34 = vld [vmem:[%s8210_s5 + $0x218] sm:$0xff]  }
 0x925   : > { %6488 = vmatprep.subr.bf16.mxu0 %v7049_v33 }
 0x926   : > { %6440 = vmatprep.mubr.bf16.mxu0 %v2349_v40 }
 0x927   : > { %6441 = vmatmul.mubr.bf16.gmra.mrb[92].mxu0 %v2350_v10 }
 0x928   : > { %6489 = vmatpush3.bf16.msra.mxu0 %v7049_v33  ;;  %6492 = vmatprep.mubr.bf16.mxu0 %v7558_v5  ;;  %v7058_v5 = vld [vmem:[#allocation4 + $0x78] sm:$0xff]  }
 0x929   : > { %6490 = vmatprep.subr.bf16.mxu0 %v7050_v42  ;;  %6458 = vmatprep.subr.bf16.mxu1 %v7058_v5 }
 0x92a   : > { %6459 = vmatpush3.bf16.msra.mxu1 %v7058_v5 }
 0x92c   : > { %6491 = vmatpush3.bf16.msra.mxu0 %v7050_v42 }
 0x92f   : > { %6493 = vmatmul.mubr.bf16.vlgmr.msra.gmra.mrb[96].mxu0 %v7562_v6  ;;  %v7059_v6 = vld [vmem:[%s8210_s5 + $0x200] sm:$0xff]  }
 0x930   : > { %6496 = vmatprep.mubr.bf16.mxu0 %v7584_v23  ;;  %6508 = vmatprep.subr.bf16.mxu1 %v7059_v6  ;;  %v7067_v23 = vld [vmem:[%s8210_s5 + $0x240] sm:$0xff]  }
 0x931   : > { %6540 = vmatprep.subr.bf16.mxu0 %v7067_v23 }
 0x932   : > { %6541 = vmatpush3.bf16.msra.mxu0 %v7067_v23  ;;  %v7063_v23 = vld [vmem:[%s8210_s5 + $0x220] sm:$0xff]  }
 0x937   : > { %6497 = vmatmul.mubr.bf16.gmra.mrb[100].mxu0 %v7588_v25  ;;  %v7068_v25 = vld [vmem:[%s8210_s5 + $0x248] sm:$0xff]  }
 0x938   : > { %6500 = vmatprep.mubr.bf16.mxu0 %v7610_v41  ;;  %6542 = vmatprep.subr.bf16.mxu0 %v7068_v25  ;;  %v7069_v41 = vld [vmem:[%s8210_s5 + $0x250] sm:$0xff]  }
 0x939   : > { %6543 = vmatpush3.bf16.msra.mxu0 %v7068_v25 }
 0x93a   : > { %6544 = vmatprep.subr.bf16.mxu0 %v7069_v41 }
 0x93d   : > { %6545 = vmatpush3.bf16.msra.mxu0 %v7069_v41 }
 0x93f   : > { %6501 = vmatmul.mubr.bf16.gmra.mrb[104].mxu0 %v7614_v43  ;;  %v7070_v43 = vld [vmem:[%s8210_s5 + $0x258] sm:$0xff]  }
 0x940   : > { %6504 = vmatprep.mubr.bf16.mxu0 %v7636_v59  ;;  %6546 = vmatprep.subr.bf16.mxu0 %v7070_v43  ;;  %v7071_v59 = vld [vmem:[%s8210_s5 + $0x260] sm:$0xff]  }
 0x941   : > { %6547 = vmatpush3.bf16.msra.mxu0 %v7070_v43 }
 0x942   : > { %6548 = vmatprep.subr.bf16.mxu0 %v7071_v59 }
 0x945   : > { %6549 = vmatpush3.bf16.msra.mxu0 %v7071_v59 }
 0x947   : > { %6505 = vmatmul.mubr.bf16.gmra.mrb[108].mxu0 %v7640_v60  ;;  %v7072_v60 = vld [vmem:[%s8210_s5 + $0x268] sm:$0xff]  }
 0x948   : > { %6550 = vmatprep.subr.bf16.mxu0 %v7072_v60 }
 0x949   : > { %6551 = vmatpush3.bf16.msra.mxu0 %v7072_v60 }
 0x9e2   : > { %v6430_v45 = vpop.f32.mrb[80].mxu0 }
 0x9e3   : > { %v2464_v46 = vadd.f32 %v6430_v45, %v7784_v44  ;;  %v2455_v48 = vpop.f32.mrb[81].mxu0 }
 0x9e4   : > { %v2456_v49 = vadd.f32 %v7784_v44, %v2455_v48  ;;  %v6431_v50 = vpop.f32.mrb[82].mxu0  ;;  %v7064_v48 = vld [vmem:[%s8210_s5 + $0x228] sm:$0xff]  }
 0x9e5   : > { %v2467_v52 = vadd.f32 %v6431_v50, %v7784_v44  ;;  %v2458_v53 = vpop.f32.mrb[83].mxu0  ;;  %v2520_v51 = vmax.f32 %v2464_v46, 0.0 }
 0x9e6   : > { %v2459_v54 = vadd.f32 %v7784_v44, %v2458_v53  ;;  %v2518_v62 = vmax.f32 %v2456_v49, 0.0 }
 0x9e7   : > { %v2521_v61 = vmax.f32 %v2467_v52, 0.0 }
 0x9e8   : > { %v2519_v27 = vmax.f32 %v2459_v54, 0.0 }
 0x9e9   : > { %v2535_v63 = vpack.c.bf16 %v2521_v61, %v2520_v51 }
 0x9ea   : > { %v2534_v4 = vpack.c.bf16 %v2519_v27, %v2518_v62  ;;  %v6434_v8 = vpop.f32.mrb[84].mxu0  ;;  %v7065_v62 = vld [vmem:[%s8210_s5 + $0x230] sm:$0xff]  }
 0x9eb   : > { %v2480_v9 = vadd.f32 %v6434_v8, %v7784_v44  ;;  %v2471_v11 = vpop.f32.mrb[85].mxu0 }
 0x9ec   : > { %v2472_v13 = vadd.f32 %v7784_v44, %v2471_v11  ;;  %v6435_v14 = vpop.f32.mrb[86].mxu0  ;;  %6460 = vmatprep.mubr.bf16.mxu1 %v2534_v4  ;;  %v7823_v4 = vld [vmem:[%s8212_s7 + $0x10] ss:$0 sm:$0xff] }
 0x9ed   : > { %v2483_v15 = vadd.f32 %v6435_v14, %v7784_v44  ;;  %v2474_v47 = vpop.f32.mrb[87].mxu0  ;;  %6461 = vmatmul.mubr.bf16.vlgmr.msra.gmra.mrb[80].mxu1 %v2535_v63  ;;  %v2524_v17 = vmax.f32 %v2480_v9, 0.0 }
 0x9ee   : > { %v2475_v16 = vadd.f32 %v7784_v44, %v2474_v47  ;;  %6509 = vmatpush3.bf16.msra.mxu1 %v7059_v6  ;;  %v2522_v26 = vmax.f32 %v2472_v13, 0.0  ;;  %v7066_v13 = vld [vmem:[%s8210_s5 + $0x238] sm:$0xff]  }
 0x9ef   : > { %v2525_v22 = vmax.f32 %v2483_v15, 0.0  ;;  %6510 = vmatprep.subr.bf16.mxu1 %v7060_v12 }
 0x9f0   : > { %v2523_v28 = vmax.f32 %v2475_v16, 0.0 }
 0x9f1   : > { %v2537_v29 = vpack.c.bf16 %v2525_v22, %v2524_v17 }
 0x9f2   : > { %v2536_v30 = vpack.c.bf16 %v2523_v28, %v2522_v26  ;;  %6511 = vmatpush3.bf16.msra.mxu1 %v7060_v12  ;;  %v6438_v31 = vpop.f32.mrb[88].mxu0 }
 0x9f3   : > { %v2496_v32 = vadd.f32 %v6438_v31, %v7784_v44  ;;  %v2487_v33 = vpop.f32.mrb[89].mxu0  ;;  %6512 = vmatprep.subr.bf16.mxu1 %v7061_v24 }
 0x9f4   : > { %v2488_v35 = vadd.f32 %v7784_v44, %v2487_v33  ;;  %v6439_v10 = vpop.f32.mrb[90].mxu0  ;;  %6464 = vmatprep.mubr.bf16.mxu1 %v2536_v30 }
 0x9f5   : > { %v2499_v40 = vadd.f32 %v6439_v10, %v7784_v44  ;;  %v2490_v42 = vpop.f32.mrb[91].mxu0  ;;  %6465 = vmatmul.mubr.bf16.gmra.mrb[84].mxu1 %v2537_v29  ;;  %v2528_v5 = vmax.f32 %v2496_v32, 0.0 }
 0x9f6   : > { %v2491_v7 = vadd.f32 %v7784_v44, %v2490_v42  ;;  %6513 = vmatpush3.bf16.msra.mxu1 %v7061_v24  ;;  %v2526_v25 = vmax.f32 %v2488_v35, 0.0 }
 0x9f7   : > { %v2529_v6 = vmax.f32 %v2499_v40, 0.0  ;;  %6514 = vmatprep.subr.bf16.mxu1 %v7062_v34 }
 0x9f8   : > { %v2527_v41 = vmax.f32 %v2491_v7, 0.0 }
 0x9f9   : > { %v2539_v43 = vpack.c.bf16 %v2529_v6, %v2528_v5 }
 0x9fa   : > { %v2538_v59 = vpack.c.bf16 %v2527_v41, %v2526_v25  ;;  %6515 = vmatpush3.bf16.msra.mxu1 %v7062_v34  ;;  %v6442_v60 = vpop.f32.mrb[92].mxu0 }
 0x9fb   : > { %v2512_v45 = vadd.f32 %v6442_v60, %v7784_v44  ;;  %v2503_v46 = vpop.f32.mrb[93].mxu0  ;;  %6516 = vmatprep.subr.bf16.mxu1 %v7063_v23 }
 0x9fc   : > { %v2504_v49 = vadd.f32 %v7784_v44, %v2503_v46  ;;  %v6443_v50 = vpop.f32.mrb[94].mxu0  ;;  %6468 = vmatprep.mubr.bf16.mxu1 %v2538_v59 }
 0x9fd   : > { %v2515_v52 = vadd.f32 %v6443_v50, %v7784_v44  ;;  %v2506_v53 = vpop.f32.mrb[95].mxu0  ;;  %6469 = vmatmul.mubr.bf16.gmra.mrb[88].mxu1 %v2539_v43  ;;  %v2532_v51 = vmax.f32 %v2512_v45, 0.0 }
 0x9fe   : > { %v2507_v54 = vadd.f32 %v7784_v44, %v2506_v53  ;;  %6517 = vmatpush3.bf16.msra.mxu1 %v7063_v23  ;;  %v2530_v27 = vmax.f32 %v2504_v49, 0.0 }
 0x9ff   : > { %v2533_v61 = vmax.f32 %v2515_v52, 0.0  ;;  %6518 = vmatprep.subr.bf16.mxu1 %v7064_v48 }
 0xa00   : > { %v2531_v63 = vmax.f32 %v2507_v54, 0.0 }
 0xa01   : > { %v2541_v8 = vpack.c.bf16 %v2533_v61, %v2532_v51 }
 0xa02   : > { %v2540_v9 = vpack.c.bf16 %v2531_v63, %v2530_v27  ;;  %6519 = vmatpush3.bf16.msra.mxu1 %v7064_v48  ;;  %v6494_v11 = vpop.f32.mrb[96].mxu0 }
 0xa03   : > { %v2839_v44 = vadd.f32 %v6494_v11, %v7823_v4  ;;  %v2830_v12 = vpop.f32.mrb[97].mxu0  ;;  %6520 = vmatprep.subr.bf16.mxu1 %v7065_v62 }
 0xa04   : > { %v2831_v14 = vadd.f32 %v7823_v4, %v2830_v12  ;;  %6472 = vmatprep.mubr.bf16.mxu1 %v2540_v9  ;;  %v6495_v15 = vpop.f32.mrb[98].mxu0 }
 0xa05   : > { %v2842_v47 = vadd.f32 %v6495_v15, %v7823_v4  ;;  %6473 = vmatmul.mubr.bf16.gmra.mrb[92].mxu1 %v2541_v8  ;;  %v2833_v16 = vpop.f32.mrb[99].mxu0  ;;  %v2895_v22 = vmax.f32 %v2839_v44, 0.0 }
 0xa06   : > { %v2834_v17 = vadd.f32 %v7823_v4, %v2833_v16  ;;  %6521 = vmatpush3.bf16.msra.mxu1 %v7065_v62  ;;  %v2893_v26 = vmax.f32 %v2831_v14, 0.0 }
 0xa07   : > { %v2896_v24 = vmax.f32 %v2842_v47, 0.0  ;;  %6522 = vmatprep.subr.bf16.mxu1 %v7066_v13 }
 0xa08   : > { %v2894_v28 = vmax.f32 %v2834_v17, 0.0 }
 0xa09   : > { %v2910_v29 = vpack.c.bf16 %v2896_v24, %v2895_v22  ;;  %v7073_v24 = vld [vmem:[%s8210_s5 + $0x270] sm:$0xff]  }
 0xa0a   : > { %v2909_v30 = vpack.c.bf16 %v2894_v28, %v2893_v26  ;;  %6523 = vmatpush3.bf16.msra.mxu1 %v7066_v13  ;;  %v6498_v31 = vpop.f32.mrb[100].mxu0  ;;  %6552 = vmatprep.subr.bf16.mxu0 %v7073_v24  ;;  %v7074_v26 = vld [vmem:[%s8210_s5 + $0x278] sm:$0xff]   ;;  %v7076_v28 = vld [vmem:[%s8210_s5 + $0x288] sm:$0xff]  }
 0xa0b   : > { %v2855_v32 = vadd.f32 %v6498_v31, %v7823_v4  ;;  %v2846_v33 = vpop.f32.mrb[101].mxu0  ;;  %6553 = vmatpush3.bf16.msra.mxu0 %v7073_v24  ;;  %v7079_v31 = vld [vmem:[%s8210_s5 + $0x2a0] sm:$0xff]  }
 0xa0c   : > { %v2847_v34 = vadd.f32 %v7823_v4, %v2846_v33  ;;  %v6499_v35 = vpop.f32.mrb[102].mxu0  ;;  %6524 = vmatprep.mubr.bf16.mxu1 %v2909_v30  ;;  %6554 = vmatprep.subr.bf16.mxu0 %v7074_v26  ;;  %v7078_v30 = vld [vmem:[%s8210_s5 + $0x298] sm:$0xff]   ;;  %v5483_v33 = vld [vmem:[%s8212_s7 + $0x11] ss:$0 sm:$0xff] }
 0xa0d   : > { %v2858_v10 = vadd.f32 %v6499_v35, %v7823_v4  ;;  %v2849_v40 = vpop.f32.mrb[103].mxu0  ;;  %6525 = vmatmul.mubr.bf16.vlgmr.msra.gmra.mrb[96].mxu1 %v2910_v29  ;;  %v2899_v7 = vmax.f32 %v2855_v32, 0.0  ;;  %v7077_v29 = vld [vmem:[%s8210_s5 + $0x290] sm:$0xff]   ;;  %v7080_v32 = vld [vmem:[%s8210_s5 + $0x2a8] sm:$0xff]  }
 0xa0e   : > { %v2850_v42 = vadd.f32 %v7823_v4, %v2849_v40  ;;  %v2897_v6 = vmax.f32 %v2847_v34, 0.0 }
 0xa0f   : > { %v2900_v5 = vmax.f32 %v2858_v10, 0.0  ;;  %6555 = vmatpush3.bf16.msra.mxu0 %v7074_v26 }
 0xa10   : > { %v2898_v23 = vmax.f32 %v2850_v42, 0.0 }
 0xa11   : > { %v2912_v25 = vpack.c.bf16 %v2900_v5, %v2899_v7 }
 0xa12   : > { %v2911_v41 = vpack.c.bf16 %v2898_v23, %v2897_v6  ;;  %v6502_v43 = vpop.f32.mrb[104].mxu0 }
 0xa13   : > { %v2871_v59 = vadd.f32 %v6502_v43, %v7823_v4  ;;  %v2862_v60 = vpop.f32.mrb[105].mxu0 }
 0xa14   : > { %v2863_v45 = vadd.f32 %v7823_v4, %v2862_v60  ;;  %v6503_v46 = vpop.f32.mrb[106].mxu0  ;;  %6528 = vmatprep.mubr.bf16.mxu1 %v2911_v41 }
 0xa15   : > { %v2874_v48 = vadd.f32 %v6503_v46, %v7823_v4  ;;  %v2865_v49 = vpop.f32.mrb[107].mxu0  ;;  %6529 = vmatmul.mubr.bf16.gmra.mrb[100].mxu1 %v2912_v25  ;;  %v2903_v52 = vmax.f32 %v2871_v59, 0.0 }
 0xa16   : > { %v2866_v50 = vadd.f32 %v7823_v4, %v2865_v49  ;;  %v2901_v54 = vmax.f32 %v2863_v45, 0.0 }
 0xa17   : > { %v2904_v53 = vmax.f32 %v2874_v48, 0.0 }
 0xa18   : > { %v2902_v51 = vmax.f32 %v2866_v50, 0.0 }
 0xa19   : > { %v2914_v61 = vpack.c.bf16 %v2904_v53, %v2903_v52 }
 0xa1a   : > { %v2913_v62 = vpack.c.bf16 %v2902_v51, %v2901_v54  ;;  %v6506_v27 = vpop.f32.mrb[108].mxu0 }
 0xa1b   : > { %v2887_v63 = vadd.f32 %v6506_v27, %v7823_v4  ;;  %v2878_v8 = vpop.f32.mrb[109].mxu0 }
 0xa1c   : > { %v2879_v9 = vadd.f32 %v7823_v4, %v2878_v8  ;;  %v6507_v11 = vpop.f32.mrb[110].mxu0  ;;  %6532 = vmatprep.mubr.bf16.mxu1 %v2913_v62 }
 0xa1d   : > { %v2890_v44 = vadd.f32 %v6507_v11, %v7823_v4  ;;  %v2881_v12 = vpop.f32.mrb[111].mxu0  ;;  %6533 = vmatmul.mubr.bf16.gmra.mrb[104].mxu1 %v2914_v61  ;;  %v2907_v14 = vmax.f32 %v2887_v63, 0.0 }
 0xa1e   : > { %v2882_v13 = vadd.f32 %v7823_v4, %v2881_v12  ;;  %v2905_v47 = vmax.f32 %v2879_v9, 0.0  ;;  %v7075_v4 = vld [vmem:[%s8210_s5 + $0x280] sm:$0xff]  }
 0xa1f   : > { %v2908_v15 = vmax.f32 %v2890_v44, 0.0  ;;  %6572 = vmatprep.subr.bf16.mxu1 %v7075_v4 }
 0xa20   : > { %v2906_v16 = vmax.f32 %v2882_v13, 0.0  ;;  %6573 = vmatpush3.bf16.msra.mxu1 %v7075_v4 }
 0xa21   : > { %v2916_v17 = vpack.c.bf16 %v2908_v15, %v2907_v14  ;;  %6574 = vmatprep.subr.bf16.mxu1 %v7076_v28 }
 0xa22   : > { %v2915_v22 = vpack.c.bf16 %v2906_v16, %v2905_v47 }
 0xa24   : > { %6536 = vmatprep.mubr.bf16.mxu1 %v2915_v22  ;;  %6575 = vmatpush3.bf16.msra.mxu1 %v7076_v28 }
 0xa25   : > { %6537 = vmatmul.mubr.bf16.gmra.mrb[108].mxu1 %v2916_v17  ;;  %6576 = vmatprep.subr.bf16.mxu1 %v7077_v29 }
 0xa28   : > { %6577 = vmatpush3.bf16.msra.mxu1 %v7077_v29 }
 0xa29   : > { %6578 = vmatprep.subr.bf16.mxu1 %v7078_v30 }
 0xa2c   : > { %6579 = vmatpush3.bf16.msra.mxu1 %v7078_v30 }
 0xa2d   : > { %6580 = vmatprep.subr.bf16.mxu1 %v7079_v31 }
 0xa30   : > { %6581 = vmatpush3.bf16.msra.mxu1 %v7079_v31 }
 0xa31   : > { %6582 = vmatprep.subr.bf16.mxu1 %v7080_v32 }
 0xa34   : > { %6583 = vmatpush3.bf16.msra.mxu1 %v7080_v32 }
 0xae0   : > { %v6526_v34 = vpop.f32.mrb[96].mxu1 }
 0xae1   : > { %v3030_v35 = vadd.f32 %v6526_v34, %v5483_v33  ;;  %v3021_v10 = vpop.f32.mrb[97].mxu1 }
 0xae2   : > { %v3022_v40 = vadd.f32 %v5483_v33, %v3021_v10  ;;  %v6527_v42 = vpop.f32.mrb[98].mxu1 }
 0xae3   : > { %v3033_v7 = vadd.f32 %v6527_v42, %v5483_v33  ;;  %v3024_v5 = vpop.f32.mrb[99].mxu1  ;;  %v3086_v23 = vmax.f32 %v3030_v35, 0.0 }
 0xae4   : > { %v3025_v6 = vadd.f32 %v5483_v33, %v3024_v5  ;;  %v3084_v41 = vmax.f32 %v3022_v40, 0.0 }
 0xae5   : > { %v3087_v25 = vmax.f32 %v3033_v7, 0.0 }
 0xae6   : > { %v3085_v43 = vmax.f32 %v3025_v6, 0.0 }
 0xae7   : > { %v3101_v59 = vpack.c.bf16 %v3087_v25, %v3086_v23  ;;  %v7081_v25 = vld [vmem:[%s8210_s5 + $0x2b0] sm:$0xff]  }
 0xae8   : > { %v3100_v60 = vpack.c.bf16 %v3085_v43, %v3084_v41  ;;  %v6530_v45 = vpop.f32.mrb[100].mxu1  ;;  %6584 = vmatprep.subr.bf16.mxu1 %v7081_v25  ;;  %v7082_v41 = vld [vmem:[%s8210_s5 + $0x2b8] sm:$0xff]   ;;  %v7084_v43 = vld [vmem:[%s8210_s5 + $0x2c8] sm:$0xff]  }
 0xae9   : > { %v3046_v46 = vadd.f32 %v6530_v45, %v5483_v33  ;;  %v3037_v48 = vpop.f32.mrb[101].mxu1  ;;  %6585 = vmatpush3.bf16.msra.mxu1 %v7081_v25  ;;  %v7087_v45 = vld [vmem:[%s8210_s5 + $0x2e0] sm:$0xff]  }
 0xaea   : > { %v3038_v49 = vadd.f32 %v5483_v33, %v3037_v48  ;;  %v6531_v50 = vpop.f32.mrb[102].mxu1  ;;  %6556 = vmatprep.mubr.bf16.mxu0 %v3100_v60  ;;  %6586 = vmatprep.subr.bf16.mxu1 %v7082_v41  ;;  %v7086_v60 = vld [vmem:[%s8210_s5 + $0x2d8] sm:$0xff]   ;;  %v5509_v48 = vld [vmem:[%s8212_s7 + $0x12] ss:$0 sm:$0xff] }
 0xaeb   : > { %v3049_v52 = vadd.f32 %v6531_v50, %v5483_v33  ;;  %v3040_v53 = vpop.f32.mrb[103].mxu1  ;;  %6557 = vmatmul.mubr.bf16.vlgmr.msra.gmra.mrb[112].mxu0 %v3101_v59  ;;  %v3090_v51 = vmax.f32 %v3046_v46, 0.0  ;;  %v7085_v59 = vld [vmem:[%s8210_s5 + $0x2d0] sm:$0xff]   ;;  %v7088_v46 = vld [vmem:[%s8210_s5 + $0x2e8] sm:$0xff]  }
 0xaec   : > { %v3041_v54 = vadd.f32 %v5483_v33, %v3040_v53  ;;  %v3088_v62 = vmax.f32 %v3038_v49, 0.0 }
 0xaed   : > { %v3091_v61 = vmax.f32 %v3049_v52, 0.0  ;;  %6587 = vmatpush3.bf16.msra.mxu1 %v7082_v41 }
 0xaee   : > { %v3089_v27 = vmax.f32 %v3041_v54, 0.0 }
 0xaef   : > { %v3103_v63 = vpack.c.bf16 %v3091_v61, %v3090_v51 }
 0xaf0   : > { %v3102_v8 = vpack.c.bf16 %v3089_v27, %v3088_v62  ;;  %v6534_v9 = vpop.f32.mrb[104].mxu1 }
 0xaf1   : > { %v3062_v11 = vadd.f32 %v6534_v9, %v5483_v33  ;;  %v3053_v44 = vpop.f32.mrb[105].mxu1 }
 0xaf2   : > { %v3054_v12 = vadd.f32 %v5483_v33, %v3053_v44  ;;  %v6535_v13 = vpop.f32.mrb[106].mxu1  ;;  %6560 = vmatprep.mubr.bf16.mxu0 %v3102_v8 }
 0xaf3   : > { %v3065_v14 = vadd.f32 %v6535_v13, %v5483_v33  ;;  %v3056_v15 = vpop.f32.mrb[107].mxu1  ;;  %6561 = vmatmul.mubr.bf16.gmra.mrb[116].mxu0 %v3103_v63  ;;  %v3094_v16 = vmax.f32 %v3062_v11, 0.0 }
 0xaf4   : > { %v3057_v47 = vadd.f32 %v5483_v33, %v3056_v15  ;;  %v3092_v22 = vmax.f32 %v3054_v12, 0.0 }
 0xaf5   : > { %v3095_v17 = vmax.f32 %v3065_v14, 0.0 }
 0xaf6   : > { %v3093_v24 = vmax.f32 %v3057_v47, 0.0 }
 0xaf7   : > { %v3105_v26 = vpack.c.bf16 %v3095_v17, %v3094_v16 }
 0xaf8   : > { %v3104_v4 = vpack.c.bf16 %v3093_v24, %v3092_v22  ;;  %v6538_v28 = vpop.f32.mrb[108].mxu1 }
 0xaf9   : > { %v3078_v29 = vadd.f32 %v6538_v28, %v5483_v33  ;;  %v3069_v30 = vpop.f32.mrb[109].mxu1 }
 0xafa   : > { %v3070_v31 = vadd.f32 %v5483_v33, %v3069_v30  ;;  %v6539_v32 = vpop.f32.mrb[110].mxu1  ;;  %6564 = vmatprep.mubr.bf16.mxu0 %v3104_v4 }
 0xafb   : > { %v3081_v34 = vadd.f32 %v6539_v32, %v5483_v33  ;;  %v3072_v35 = vpop.f32.mrb[111].mxu1  ;;  %6565 = vmatmul.mubr.bf16.gmra.mrb[120].mxu0 %v3105_v26  ;;  %v3098_v40 = vmax.f32 %v3078_v29, 0.0 }
 0xafc   : > { %v3073_v10 = vadd.f32 %v5483_v33, %v3072_v35  ;;  %v3096_v7 = vmax.f32 %v3070_v31, 0.0  ;;  %v7083_v33 = vld [vmem:[%s8210_s5 + $0x2c0] sm:$0xff]  }
 0xafd   : > { %v3099_v42 = vmax.f32 %v3081_v34, 0.0  ;;  %6604 = vmatprep.subr.bf16.mxu0 %v7083_v33 }
 0xafe   : > { %v3097_v5 = vmax.f32 %v3073_v10, 0.0  ;;  %6605 = vmatpush3.bf16.msra.mxu0 %v7083_v33 }
 0xaff   : > { %v3107_v6 = vpack.c.bf16 %v3099_v42, %v3098_v40  ;;  %6606 = vmatprep.subr.bf16.mxu0 %v7084_v43 }
 0xb00   : > { %v3106_v23 = vpack.c.bf16 %v3097_v5, %v3096_v7 }
 0xb02   : > { %6568 = vmatprep.mubr.bf16.mxu0 %v3106_v23  ;;  %6607 = vmatpush3.bf16.msra.mxu0 %v7084_v43 }
 0xb03   : > { %6569 = vmatmul.mubr.bf16.gmra.mrb[124].mxu0 %v3107_v6  ;;  %6608 = vmatprep.subr.bf16.mxu0 %v7085_v59 }
 0xb06   : > { %6609 = vmatpush3.bf16.msra.mxu0 %v7085_v59 }
 0xb07   : > { %6610 = vmatprep.subr.bf16.mxu0 %v7086_v60 }
 0xb0a   : > { %6611 = vmatpush3.bf16.msra.mxu0 %v7086_v60 }
 0xb0b   : > { %6612 = vmatprep.subr.bf16.mxu0 %v7087_v45 }
 0xb0e   : > { %6613 = vmatpush3.bf16.msra.mxu0 %v7087_v45 }
 0xb0f   : > { %6614 = vmatprep.subr.bf16.mxu0 %v7088_v46 }
 0xb12   : > { %6615 = vmatpush3.bf16.msra.mxu0 %v7088_v46 }
 0xbbe   : > { %v6558_v49 = vpop.f32.mrb[112].mxu0 }
 0xbbf   : > { %v3221_v50 = vadd.f32 %v6558_v49, %v5509_v48  ;;  %v3212_v52 = vpop.f32.mrb[113].mxu0 }
 0xbc0   : > { %v3213_v53 = vadd.f32 %v5509_v48, %v3212_v52  ;;  %v6559_v54 = vpop.f32.mrb[114].mxu0 }
 0xbc1   : > { %v3224_v51 = vadd.f32 %v6559_v54, %v5509_v48  ;;  %v3215_v61 = vpop.f32.mrb[115].mxu0  ;;  %v3277_v27 = vmax.f32 %v3221_v50, 0.0 }
 0xbc2   : > { %v3216_v62 = vadd.f32 %v5509_v48, %v3215_v61  ;;  %v3275_v8 = vmax.f32 %v3213_v53, 0.0 }
 0xbc3   : > { %v3278_v63 = vmax.f32 %v3224_v51, 0.0 }
 0xbc4   : > { %v3276_v9 = vmax.f32 %v3216_v62, 0.0 }
 0xbc5   : > { %v3292_v11 = vpack.c.bf16 %v3278_v63, %v3277_v27  ;;  %v7089_v63 = vld [vmem:[%s8210_s5 + $0x2f0] sm:$0xff]  }
 0xbc6   : > { %v3291_v44 = vpack.c.bf16 %v3276_v9, %v3275_v8  ;;  %v6562_v12 = vpop.f32.mrb[116].mxu0  ;;  %6616 = vmatprep.subr.bf16.mxu0 %v7089_v63  ;;  %v7090_v8 = vld [vmem:[%s8210_s5 + $0x2f8] sm:$0xff]   ;;  %v7092_v9 = vld [vmem:[#allocation4 + $0x88] sm:$0xff]  }
 0xbc7   : > { %v3237_v13 = vadd.f32 %v6562_v12, %v5509_v48  ;;  %v3228_v14 = vpop.f32.mrb[117].mxu0  ;;  %6617 = vmatpush3.bf16.msra.mxu0 %v7089_v63  ;;  %v7095_v12 = vld [vmem:[#allocation4 + $0xa0] sm:$0xff]  }
 0xbc8   : > { %v3229_v15 = vadd.f32 %v5509_v48, %v3228_v14  ;;  %v6563_v47 = vpop.f32.mrb[118].mxu0  ;;  %6588 = vmatprep.mubr.bf16.mxu1 %v3291_v44  ;;  %6618 = vmatprep.subr.bf16.mxu0 %v7090_v8  ;;  %v7094_v44 = vld [vmem:[#allocation4 + $0x98] sm:$0xff]   ;;  %v5535_v14 = vld [vmem:[%s8212_s7 + $0x13] ss:$0 sm:$0xff] }
 0xbc9   : > { %v3240_v16 = vadd.f32 %v6563_v47, %v5509_v48  ;;  %v3231_v17 = vpop.f32.mrb[119].mxu0  ;;  %6589 = vmatmul.mubr.bf16.vlgmr.msra.gmra.mrb[112].mxu1 %v3292_v11  ;;  %v3281_v24 = vmax.f32 %v3237_v13, 0.0  ;;  %v7093_v11 = vld [vmem:[#allocation4 + $0x90] sm:$0xff]   ;;  %v7096_v13 = vld [vmem:[#allocation4 + $0xa8] sm:$0xff]  }
 0xbca   : > { %v3232_v22 = vadd.f32 %v5509_v48, %v3231_v17  ;;  %v3279_v4 = vmax.f32 %v3229_v15, 0.0 }
 0xbcb   : > { %v3282_v26 = vmax.f32 %v3240_v16, 0.0  ;;  %6619 = vmatpush3.bf16.msra.mxu0 %v7090_v8 }
 0xbcc   : > { %v3280_v28 = vmax.f32 %v3232_v22, 0.0 }
 0xbcd   : > { %v3294_v29 = vpack.c.bf16 %v3282_v26, %v3281_v24 }
 0xbce   : > { %v3293_v30 = vpack.c.bf16 %v3280_v28, %v3279_v4  ;;  %v6566_v31 = vpop.f32.mrb[120].mxu0 }
 0xbcf   : > { %v3253_v32 = vadd.f32 %v6566_v31, %v5509_v48  ;;  %v3244_v34 = vpop.f32.mrb[121].mxu0 }
 0xbd0   : > { %v3245_v35 = vadd.f32 %v5509_v48, %v3244_v34  ;;  %v6567_v10 = vpop.f32.mrb[122].mxu0  ;;  %6592 = vmatprep.mubr.bf16.mxu1 %v3293_v30 }
 0xbd1   : > { %v3256_v40 = vadd.f32 %v6567_v10, %v5509_v48  ;;  %v3247_v42 = vpop.f32.mrb[123].mxu0  ;;  %6593 = vmatmul.mubr.bf16.gmra.mrb[116].mxu1 %v3294_v29  ;;  %v3285_v5 = vmax.f32 %v3253_v32, 0.0 }
 0xbd2   : > { %v3248_v7 = vadd.f32 %v5509_v48, %v3247_v42  ;;  %v3283_v23 = vmax.f32 %v3245_v35, 0.0 }
 0xbd3   : > { %v3286_v6 = vmax.f32 %v3256_v40, 0.0 }
 0xbd4   : > { %v3284_v25 = vmax.f32 %v3248_v7, 0.0 }
 0xbd5   : > { %v3296_v41 = vpack.c.bf16 %v3286_v6, %v3285_v5 }
 0xbd6   : > { %v3295_v33 = vpack.c.bf16 %v3284_v25, %v3283_v23  ;;  %v6570_v43 = vpop.f32.mrb[124].mxu0 }
 0xbd7   : > { %v3269_v59 = vadd.f32 %v6570_v43, %v5509_v48  ;;  %v3260_v60 = vpop.f32.mrb[125].mxu0 }
 0xbd8   : > { %v3261_v45 = vadd.f32 %v5509_v48, %v3260_v60  ;;  %v6571_v46 = vpop.f32.mrb[126].mxu0  ;;  %6596 = vmatprep.mubr.bf16.mxu1 %v3295_v33 }
 0xbd9   : > { %v3272_v49 = vadd.f32 %v6571_v46, %v5509_v48  ;;  %v3263_v50 = vpop.f32.mrb[127].mxu0  ;;  %6597 = vmatmul.mubr.bf16.gmra.mrb[120].mxu1 %v3296_v41  ;;  %v3289_v53 = vmax.f32 %v3269_v59, 0.0 }
 0xbda   : > { %v3264_v52 = vadd.f32 %v5509_v48, %v3263_v50  ;;  %v3287_v51 = vmax.f32 %v3261_v45, 0.0  ;;  %v7091_v48 = vld [vmem:[#allocation4 + $0x80] sm:$0xff]  }
 0xbdb   : > { %v3290_v54 = vmax.f32 %v3272_v49, 0.0  ;;  %6636 = vmatprep.subr.bf16.mxu1 %v7091_v48 }
 0xbdc   : > { %v3288_v61 = vmax.f32 %v3264_v52, 0.0  ;;  %6637 = vmatpush3.bf16.msra.mxu1 %v7091_v48 }
 0xbdd   : > { %v3298_v62 = vpack.c.bf16 %v3290_v54, %v3289_v53  ;;  %6638 = vmatprep.subr.bf16.mxu1 %v7092_v9 }
 0xbde   : > { %v3297_v27 = vpack.c.bf16 %v3288_v61, %v3287_v51 }
 0xbe0   : > { %6600 = vmatprep.mubr.bf16.mxu1 %v3297_v27  ;;  %6639 = vmatpush3.bf16.msra.mxu1 %v7092_v9 }
 0xbe1   : > { %6601 = vmatmul.mubr.bf16.gmra.mrb[124].mxu1 %v3298_v62  ;;  %6640 = vmatprep.subr.bf16.mxu1 %v7093_v11 }
 0xbe4   : > { %6641 = vmatpush3.bf16.msra.mxu1 %v7093_v11 }
 0xbe5   : > { %6642 = vmatprep.subr.bf16.mxu1 %v7094_v44 }
 0xbe8   : > { %6643 = vmatpush3.bf16.msra.mxu1 %v7094_v44 }
 0xbe9   : > { %6644 = vmatprep.subr.bf16.mxu1 %v7095_v12 }
 0xbec   : > { %6645 = vmatpush3.bf16.msra.mxu1 %v7095_v12 }
 0xbed   : > { %6646 = vmatprep.subr.bf16.mxu1 %v7096_v13 }
 0xbf0   : > { %6647 = vmatpush3.bf16.msra.mxu1 %v7096_v13 }
 0xc9c   : > { %v6590_v15 = vpop.f32.mrb[112].mxu1 }
 0xc9d   : > { %v3412_v47 = vadd.f32 %v6590_v15, %v5535_v14  ;;  %v3403_v16 = vpop.f32.mrb[113].mxu1 }
 0xc9e   : > { %v3404_v17 = vadd.f32 %v5535_v14, %v3403_v16  ;;  %v6591_v22 = vpop.f32.mrb[114].mxu1 }
 0xc9f   : > { %v3415_v24 = vadd.f32 %v6591_v22, %v5535_v14  ;;  %v3406_v26 = vpop.f32.mrb[115].mxu1  ;;  %v3468_v28 = vmax.f32 %v3412_v47, 0.0 }
 0xca0   : > { %v3407_v4 = vadd.f32 %v5535_v14, %v3406_v26  ;;  %v3466_v30 = vmax.f32 %v3404_v17, 0.0 }
 0xca1   : > { %v3469_v29 = vmax.f32 %v3415_v24, 0.0 }
 0xca2   : > { %v3467_v31 = vmax.f32 %v3407_v4, 0.0 }
 0xca3   : > { %v3483_v32 = vpack.c.bf16 %v3469_v29, %v3468_v28  ;;  %v7097_v29 = vld [vmem:[#allocation4 + $0xb0] sm:$0xff]  }
 0xca4   : > { %v3482_v34 = vpack.c.bf16 %v3467_v31, %v3466_v30  ;;  %v6594_v35 = vpop.f32.mrb[116].mxu1  ;;  %6648 = vmatprep.subr.bf16.mxu1 %v7097_v29  ;;  %v7098_v30 = vld [vmem:[#allocation4 + $0xb8] sm:$0xff]   ;;  %v7099_v31 = vld [vmem:[#allocation2 + $0xc0] sm:$0xff]  }
 0xca5   : > { %v3428_v10 = vadd.f32 %v6594_v35, %v5535_v14  ;;  %v3419_v40 = vpop.f32.mrb[117].mxu1  ;;  %6649 = vmatpush3.bf16.msra.mxu1 %v7097_v29  ;;  %6668 = vmatprep.subr.bf16.mxu0 %v7099_v31  ;;  %v7103_v35 = vld [vmem:[#allocation2 + $0xe0] sm:$0xff]  }
 0xca6   : > { %v3420_v42 = vadd.f32 %v5535_v14, %v3419_v40  ;;  %v6595_v7 = vpop.f32.mrb[118].mxu1  ;;  %6620 = vmatprep.mubr.bf16.mxu0 %v3482_v34  ;;  %6650 = vmatprep.subr.bf16.mxu1 %v7098_v30  ;;  %v7102_v34 = vld [vmem:[#allocation2 + $0xd8] sm:$0xff]   ;;  %v5561_v40 = vld [vmem:[%s8212_s7 + $0x14] ss:$0 sm:$0xff] }
 0xca7   : > { %v3431_v5 = vadd.f32 %v6595_v7, %v5535_v14  ;;  %v3422_v6 = vpop.f32.mrb[119].mxu1  ;;  %6621 = vmatmul.mubr.bf16.vlgmr.msra.gmra.mrb[128].mxu0 %v3483_v32  ;;  %v3472_v25 = vmax.f32 %v3428_v10, 0.0  ;;  %v7100_v32 = vld [vmem:[#allocation2 + $0xc8] sm:$0xff]  }
 0xca8   : > { %v3423_v23 = vadd.f32 %v5535_v14, %v3422_v6  ;;  %v3470_v33 = vmax.f32 %v3420_v42, 0.0  ;;  %6669 = vmatpush3.bf16.msra.mxu0 %v7099_v31  ;;  %v7104_v10 = vld [vmem:[#allocation2 + $0xe8] sm:$0xff]  }
 0xca9   : > { %v3473_v41 = vmax.f32 %v3431_v5, 0.0  ;;  %6651 = vmatpush3.bf16.msra.mxu1 %v7098_v30  ;;  %6670 = vmatprep.subr.bf16.mxu0 %v7100_v32 }
 0xcaa   : > { %v3471_v43 = vmax.f32 %v3423_v23, 0.0 }
 0xcab   : > { %v3485_v59 = vpack.c.bf16 %v3473_v41, %v3472_v25 }
 0xcac   : > { %v3484_v60 = vpack.c.bf16 %v3471_v43, %v3470_v33  ;;  %v6598_v45 = vpop.f32.mrb[120].mxu1  ;;  %6671 = vmatpush3.bf16.msra.mxu0 %v7100_v32 }
 0xcad   : > { %v3444_v46 = vadd.f32 %v6598_v45, %v5535_v14  ;;  %v3435_v49 = vpop.f32.mrb[121].mxu1 }
 0xcae   : > { %v3436_v50 = vadd.f32 %v5535_v14, %v3435_v49  ;;  %v6599_v52 = vpop.f32.mrb[122].mxu1  ;;  %6624 = vmatprep.mubr.bf16.mxu0 %v3484_v60 }
 0xcaf   : > { %v3447_v53 = vadd.f32 %v6599_v52, %v5535_v14  ;;  %v3438_v54 = vpop.f32.mrb[123].mxu1  ;;  %6625 = vmatmul.mubr.bf16.gmra.mrb[132].mxu0 %v3485_v59  ;;  %v3476_v61 = vmax.f32 %v3444_v46, 0.0 }
 0xcb0   : > { %v3439_v51 = vadd.f32 %v5535_v14, %v3438_v54  ;;  %v3474_v27 = vmax.f32 %v3436_v50, 0.0 }
 0xcb1   : > { %v3477_v62 = vmax.f32 %v3447_v53, 0.0 }
 0xcb2   : > { %v3475_v63 = vmax.f32 %v3439_v51, 0.0 }
 0xcb3   : > { %v3487_v8 = vpack.c.bf16 %v3477_v62, %v3476_v61 }
 0xcb4   : > { %v3486_v48 = vpack.c.bf16 %v3475_v63, %v3474_v27  ;;  %v6602_v9 = vpop.f32.mrb[124].mxu1 }
 0xcb5   : > { %v3460_v11 = vadd.f32 %v6602_v9, %v5535_v14  ;;  %v3451_v44 = vpop.f32.mrb[125].mxu1 }
 0xcb6   : > { %v3452_v12 = vadd.f32 %v5535_v14, %v3451_v44  ;;  %v6603_v13 = vpop.f32.mrb[126].mxu1  ;;  %6628 = vmatprep.mubr.bf16.mxu0 %v3486_v48 }
 0xcb7   : > { %v3463_v15 = vadd.f32 %v6603_v13, %v5535_v14  ;;  %v3454_v47 = vpop.f32.mrb[127].mxu1  ;;  %6629 = vmatmul.mubr.bf16.gmra.mrb[136].mxu0 %v3487_v8  ;;  %v3480_v17 = vmax.f32 %v3460_v11, 0.0 }
 0xcb8   : > { %v3455_v16 = vadd.f32 %v5535_v14, %v3454_v47  ;;  %v3478_v24 = vmax.f32 %v3452_v12, 0.0  ;;  %v7101_v14 = vld [vmem:[#allocation2 + $0xd0] sm:$0xff]  }
 0xcb9   : > { %v3481_v22 = vmax.f32 %v3463_v15, 0.0  ;;  %6672 = vmatprep.subr.bf16.mxu0 %v7101_v14 }
 0xcba   : > { %v3479_v26 = vmax.f32 %v3455_v16, 0.0  ;;  %6673 = vmatpush3.bf16.msra.mxu0 %v7101_v14 }
 0xcbb   : > { %v3489_v4 = vpack.c.bf16 %v3481_v22, %v3480_v17  ;;  %6674 = vmatprep.subr.bf16.mxu0 %v7102_v34 }
 0xcbc   : > { %v3488_v28 = vpack.c.bf16 %v3479_v26, %v3478_v24 }
 0xcbe   : > { %6632 = vmatprep.mubr.bf16.mxu0 %v3488_v28  ;;  %6675 = vmatpush3.bf16.msra.mxu0 %v7102_v34 }
 0xcbf   : > { %6633 = vmatmul.mubr.bf16.gmra.mrb[140].mxu0 %v3489_v4  ;;  %6676 = vmatprep.subr.bf16.mxu0 %v7103_v35 }
 0xcc2   : > { %6677 = vmatpush3.bf16.msra.mxu0 %v7103_v35 }
 0xcc3   : > { %6678 = vmatprep.subr.bf16.mxu0 %v7104_v10 }
 0xcc6   : > { %6679 = vmatpush3.bf16.msra.mxu0 %v7104_v10 }
 0xd7a   : > { %v6622_v42 = vpop.f32.mrb[128].mxu0 }
 0xd7b   : > { %v3603_v7 = vadd.f32 %v6622_v42, %v5561_v40  ;;  %v3594_v5 = vpop.f32.mrb[129].mxu0 }
 0xd7c   : > { %v3595_v6 = vadd.f32 %v5561_v40, %v3594_v5  ;;  %v6623_v23 = vpop.f32.mrb[130].mxu0 }
 0xd7d   : > { %v3606_v25 = vadd.f32 %v6623_v23, %v5561_v40  ;;  %v3597_v41 = vpop.f32.mrb[131].mxu0  ;;  %v3659_v43 = vmax.f32 %v3603_v7, 0.0 }
 0xd7e   : > { %v3598_v33 = vadd.f32 %v5561_v40, %v3597_v41  ;;  %v3657_v60 = vmax.f32 %v3595_v6, 0.0 }
 0xd7f   : > { %v3660_v59 = vmax.f32 %v3606_v25, 0.0 }
 0xd80   : > { %v3658_v45 = vmax.f32 %v3598_v33, 0.0 }
 0xd81   : > { %v3674_v46 = vpack.c.bf16 %v3660_v59, %v3659_v43  ;;  %v7105_v59 = vld [vmem:[#allocation2 + $0xf0] sm:$0xff]  }
 0xd82   : > { %v3673_v49 = vpack.c.bf16 %v3658_v45, %v3657_v60  ;;  %v6626_v50 = vpop.f32.mrb[132].mxu0  ;;  %6680 = vmatprep.subr.bf16.mxu0 %v7105_v59  ;;  %v7106_v60 = vld [vmem:[#allocation2 + $0xf8] sm:$0xff]   ;;  %v7107_v45 = vld [vmem:[%s8210_s5 + $0x300] sm:$0xff]  }
 0xd83   : > { %v3619_v52 = vadd.f32 %v6626_v50, %v5561_v40  ;;  %v3610_v53 = vpop.f32.mrb[133].mxu0  ;;  %6681 = vmatpush3.bf16.msra.mxu0 %v7105_v59  ;;  %6700 = vmatprep.subr.bf16.mxu1 %v7107_v45  ;;  %v7111_v50 = vld [vmem:[%s8210_s5 + $0x320] sm:$0xff]  }
 0xd84   : > { %v3611_v54 = vadd.f32 %v5561_v40, %v3610_v53  ;;  %v6627_v51 = vpop.f32.mrb[134].mxu0  ;;  %6652 = vmatprep.mubr.bf16.mxu1 %v3673_v49  ;;  %6682 = vmatprep.subr.bf16.mxu0 %v7106_v60  ;;  %v7110_v49 = vld [vmem:[%s8210_s5 + $0x318] sm:$0xff]   ;;  %v7931_v53 = vld [vmem:[%s8212_s7 + $0xd] ss:$0 sm:$0xff] }
 0xd85   : > { %v3622_v61 = vadd.f32 %v6627_v51, %v5561_v40  ;;  %v3613_v62 = vpop.f32.mrb[135].mxu0  ;;  %6653 = vmatmul.mubr.bf16.vlgmr.msra.gmra.mrb[80].mxu1 %v3674_v46  ;;  %v3663_v63 = vmax.f32 %v3619_v52, 0.0  ;;  %v7109_v46 = vld [vmem:[%s8210_s5 + $0x310] sm:$0xff]   ;;  %v7112_v52 = vld [vmem:[%s8210_s5 + $0x328] sm:$0xff]  }
 0xd86   : > { %v3614_v27 = vadd.f32 %v5561_v40, %v3613_v62  ;;  %v3661_v48 = vmax.f32 %v3611_v54, 0.0  ;;  %6701 = vmatpush3.bf16.msra.mxu1 %v7107_v45  ;;  %v7147_v54 = vld [vmem:[%s7382_s26 + $0x18] sm:$0xff] }
 0xd87   : > { %v3664_v8 = vmax.f32 %v3622_v61, 0.0  ;;  %6683 = vmatpush3.bf16.msra.mxu0 %v7106_v60  ;;  %v6866_v51 = vadd.f32 %v7147_v54, %v7931_v53  ;;  %v7148_v61 = vld [vmem:[%s7382_s26 + $0x8] sm:$0xff]  ;;  %v7156_v54 = vld [vmem:[%s7382_s26 + $0x40] sm:$0xff] }
 0xd88   : > { %v3662_v9 = vmax.f32 %v3614_v27, 0.0  ;;  %v6869_v62 = vadd.f32 %v7148_v61, %v7931_v53  ;;  %v7940_v27 = vld [vmem:[%s8212_s7 + $0x15] ss:$0 sm:$0xff] }
 0xd89   : > { %v3676_v11 = vpack.c.bf16 %v3664_v8, %v3663_v63  ;;  %v7149_v63 = vld [vmem:[%s7382_s26 + $0x10] sm:$0xff] }
 0xd8a   : > { %v3675_v44 = vpack.c.bf16 %v3662_v9, %v3661_v48  ;;  %v6630_v12 = vpop.f32.mrb[136].mxu0  ;;  %v6860_v8 = vadd.f32 %v7149_v63, %v7931_v53  ;;  %v7150_v48 = vld [vmem:[%s7382_s26] sm:$0xff] }
 0xd8b   : > { %v3635_v13 = vadd.f32 %v6630_v12, %v5561_v40  ;;  %v3626_v15 = vpop.f32.mrb[137].mxu0  ;;  %v6863_v9 = vadd.f32 %v7150_v48, %v7931_v53  ;;  %v6870_v12 = vadd.f32 %v6869_v62, %v7940_v27 }
 0xd8c   : > { %v3627_v47 = vadd.f32 %v5561_v40, %v3626_v15  ;;  %v6631_v16 = vpop.f32.mrb[138].mxu0  ;;  %6656 = vmatprep.mubr.bf16.mxu1 %v3675_v44 }
 0xd8d   : > { %v3638_v17 = vadd.f32 %v6631_v16, %v5561_v40  ;;  %v3629_v22 = vpop.f32.mrb[139].mxu0  ;;  %6657 = vmatmul.mubr.bf16.gmra.mrb[84].mxu1 %v3676_v11  ;;  %v3667_v26 = vmax.f32 %v3635_v13, 0.0  ;;  %v6867_v11 = vadd.f32 %v6866_v51, %v7940_v27  ;;  %v6887_v51 = vadd.f32 %v7156_v54, %v7931_v53 }
 0xd8e   : > { %v3630_v24 = vadd.f32 %v5561_v40, %v3629_v22  ;;  %v3665_v28 = vmax.f32 %v3627_v47, 0.0  ;;  %v7151_v47 = vld [vmem:[%s7382_s26 + $0x30] sm:$0xff] }
 0xd8f   : > { %v3668_v4 = vmax.f32 %v3638_v17, 0.0  ;;  %v6872_v16 = vadd.f32 %v7151_v47, %v7931_v53  ;;  %v7953_v17 = vld [vmem:[%s8207_s2] ss:$0 sm:$0xff] }
 0xd90   : > { %v3666_v29 = vmax.f32 %v3630_v24, 0.0 }
 0xd91   : > { %v3678_v30 = vpack.c.bf16 %v3668_v4, %v3667_v26  ;;  %v7152_v26 = vld [vmem:[%s7382_s26 + $0x20] sm:$0xff] }
 0xd92   : > { %v3677_v31 = vpack.c.bf16 %v3666_v29, %v3665_v28  ;;  %v6634_v32 = vpop.f32.mrb[140].mxu0  ;;  %v6875_v4 = vadd.f32 %v7152_v26, %v7931_v53 }
 0xd93   : > { %v3651_v14 = vadd.f32 %v6634_v32, %v5561_v40  ;;  %v3642_v34 = vpop.f32.mrb[141].mxu0 }
 0xd94   : > { %v3643_v35 = vadd.f32 %v5561_v40, %v3642_v34  ;;  %v6635_v10 = vpop.f32.mrb[142].mxu0  ;;  %6660 = vmatprep.mubr.bf16.mxu1 %v3677_v31  ;;  %v7153_v31 = vld [vmem:[%s7382_s26 + $0x38] sm:$0xff] }
 0xd95   : > { %v3654_v42 = vadd.f32 %v6635_v10, %v5561_v40  ;;  %v3645_v7 = vpop.f32.mrb[143].mxu0  ;;  %6661 = vmatmul.mubr.bf16.gmra.mrb[88].mxu1 %v3678_v30  ;;  %v3671_v6 = vmax.f32 %v3651_v14, 0.0  ;;  %v6878_v32 = vadd.f32 %v7153_v31, %v7931_v53  ;;  %v7159_v31 = vld [vmem:[%s7382_s26 + $0x70] sm:$0xff] }
 0xd96   : > { %v3646_v5 = vadd.f32 %v5561_v40, %v3645_v7  ;;  %v3669_v25 = vmax.f32 %v3643_v35, 0.0  ;;  %v7108_v40 = vld [vmem:[%s8210_s5 + $0x308] sm:$0xff]  }
 0xd97   : > { %v3672_v23 = vmax.f32 %v3654_v42, 0.0  ;;  %6702 = vmatprep.subr.bf16.mxu1 %v7108_v40  ;;  %v7154_v35 = vld [vmem:[%s7382_s26 + $0x28] sm:$0xff] }
 0xd98   : > { %v3670_v41 = vmax.f32 %v3646_v5, 0.0  ;;  %6703 = vmatpush3.bf16.msra.mxu1 %v7108_v40  ;;  %v6881_v10 = vadd.f32 %v7154_v35, %v7931_v53  ;;  %v7160_v35 = vld [vmem:[%s7382_s26 + $0x60] sm:$0xff] }
 0xd99   : > { %v3680_v33 = vpack.c.bf16 %v3672_v23, %v3671_v6  ;;  %6704 = vmatprep.subr.bf16.mxu1 %v7109_v46  ;;  %v6873_v6 = vadd.f32 %v6872_v16, %v7940_v27 }
 0xd9a   : > { %v3679_v43 = vpack.c.bf16 %v3670_v41, %v3669_v25  ;;  %v6882_v60 = vadd.f32 %v6881_v10, %v7940_v27  ;;  %v6899_v10 = vadd.f32 %v7160_v35, %v7931_v53 }
 0xd9c   : > { %6664 = vmatprep.mubr.bf16.mxu1 %v3679_v43  ;;  %6705 = vmatpush3.bf16.msra.mxu1 %v7109_v46  ;;  %v6879_v43 = vadd.f32 %v6878_v32, %v7940_v27  ;;  %v7155_v46 = vld [vmem:[%s7382_s26 + $0x50] sm:$0xff]  ;;  %v6896_v32 = vadd.f32 %v7159_v31, %v7931_v53 }
 0xd9d   : > { %6665 = vmatmul.mubr.bf16.gmra.mrb[92].mxu1 %v3680_v33  ;;  %6706 = vmatprep.subr.bf16.mxu1 %v7110_v49  ;;  %v6876_v33 = vadd.f32 %v6875_v4, %v7940_v27 }
 0xda0   : > { %6707 = vmatpush3.bf16.msra.mxu1 %v7110_v49  ;;  %v6884_v49 = vadd.f32 %v7155_v46, %v7931_v53 }
 0xda1   : > { %6708 = vmatprep.subr.bf16.mxu1 %v7111_v50 }
 0xda2   : > { %v6885_v47 = vadd.f32 %v6884_v49, %v7940_v27  ;;  %v6900_v49 = vadd.f32 %v6899_v10, %v7940_v27 }
 0xda4   : > { %6709 = vmatpush3.bf16.msra.mxu1 %v7111_v50 }
 0xda5   : > { %6710 = vmatprep.subr.bf16.mxu1 %v7112_v52 }
 0xda8   : > { %6711 = vmatpush3.bf16.msra.mxu1 %v7112_v52 }
 0xe58   : > { %v6654_v44 = vpop.f32.mrb[80].mxu1 }
 0xe59   : > { %v6861_v13 = vadd.f32 %v6860_v8, %v6654_v44  ;;  %v3785_v15 = vpop.f32.mrb[81].mxu1  ;;  %v7157_v8 = vld [vmem:[%s7382_s26 + $0x58] sm:$0xff]  ;;  %v7158_v44 = vld [vmem:[%s7382_s26 + $0x48] sm:$0xff] }
 0xe5a   : > { %v6864_v22 = vadd.f32 %v6863_v9, %v3785_v15  ;;  %v6655_v24 = vpop.f32.mrb[82].mxu1  ;;  %v6890_v48 = vadd.f32 %v7157_v8, %v7931_v53 }
 0xe5b   : > { %v6862_v28 = vadd.f32 %v6861_v13, %v7940_v27  ;;  %v6868_v29 = vadd.f32 %v6867_v11, %v6655_v24  ;;  %v3788_v30 = vpop.f32.mrb[83].mxu1  ;;  %v6888_v24 = vadd.f32 %v6887_v51, %v7940_v27 }
 0xe5c   : > { %v6865_v14 = vadd.f32 %v6864_v22, %v7940_v27  ;;  %v6871_v34 = vadd.f32 %v6870_v12, %v3788_v30  ;;  %v6893_v12 = vadd.f32 %v7158_v44, %v7931_v53  ;;  %v6891_v26 = vadd.f32 %v6890_v48, %v7940_v27 }
 0xe5d   : > { %v5020_v42 = vmul.f32 %v6862_v28, %v7953_v17  ;;  %v3865_v7 = vpack.c.bf16 %v6868_v29, %v6862_v28  ;;  %v5021_v5 = vmul.f32 %v6868_v29, %v7953_v17 }
 0xe5e   : > { %v5018_v23 = vmul.f32 %v6865_v14, %v7953_v17  ;;  %v3864_v25 = vpack.c.bf16 %v6871_v34, %v6865_v14  ;;  %v5019_v41 = vmul.f32 %v6871_v34, %v7953_v17  ;;  %v6894_v28 = vadd.f32 %v6893_v12, %v7940_v27 }
 0xe5f   : > { %5036 = vst [vmem:[%s7964_s23 + $0x10] sm:$0xff] %v5020_v42  ;;  %5037 = vst [vmem:[%s7964_s23 + $0x18] sm:$0xff] %v5021_v5 }
 0xe60   : > { %5034 = vst [vmem:[%s7964_s23] sm:$0xff] %v5018_v23  ;;  %5035 = vst [vmem:[%s7964_s23 + $0x8] sm:$0xff] %v5019_v41  ;;  %v6658_v59 = vpop.f32.mrb[84].mxu1  ;;  %6684 = vmatprep.mubr.bf16.mxu0 %v3864_v25 }
 0xe61   : > { %v6874_v45 = vadd.f32 %v6873_v6, %v6658_v59  ;;  %v3801_v40 = vpop.f32.mrb[85].mxu1  ;;  %6685 = vmatmul.mubr.bf16.vlgmr.msra.gmra.mrb[144].mxu0 %v3865_v7  ;;  %v7161_v6 = vld [vmem:[%s7382_s26 + $0x78] sm:$0xff] }
 0xe62   : > { %v6877_v50 = vadd.f32 %v6876_v33, %v3801_v40  ;;  %v6659_v52 = vpop.f32.mrb[86].mxu1  ;;  %v6902_v23 = vadd.f32 %v7161_v6, %v7931_v53  ;;  %v7162_v33 = vld [vmem:[%s7382_s26 + $0x68] sm:$0xff] }
 0xe63   : > { %v5024_v61 = vmul.f32 %v6874_v45, %v7953_v17  ;;  %v6880_v62 = vadd.f32 %v6879_v43, %v6659_v52  ;;  %v3804_v63 = vpop.f32.mrb[87].mxu1  ;;  %v6905_v43 = vadd.f32 %v7162_v33, %v7931_v53 }
 0xe64   : > { %v5022_v9 = vmul.f32 %v6877_v50, %v7953_v17  ;;  %v6883_v11 = vadd.f32 %v6882_v60, %v3804_v63 }
 0xe65   : > { %5040 = vst [vmem:[%s7964_s23 + $0x30] sm:$0xff] %v5024_v61  ;;  %v3867_v13 = vpack.c.bf16 %v6880_v62, %v6874_v45  ;;  %v5025_v15 = vmul.f32 %v6880_v62, %v7953_v17  ;;  %v6897_v45 = vadd.f32 %v6896_v32, %v7940_v27  ;;  %v6906_v53 = vadd.f32 %v6905_v43, %v7940_v27 }
 0xe66   : > { %5038 = vst [vmem:[%s7964_s23 + $0x20] sm:$0xff] %v5022_v9  ;;  %v3866_v16 = vpack.c.bf16 %v6883_v11, %v6877_v50  ;;  %v5023_v22 = vmul.f32 %v6883_v11, %v7953_v17  ;;  %v6903_v50 = vadd.f32 %v6902_v23, %v7940_v27 }
 0xe67   : > { %5041 = vst [vmem:[%s7964_s23 + $0x38] sm:$0xff] %v5025_v15  ;;  %v7113_v15 = vld [vmem:[%s8210_s5 + $0x330] sm:$0xff]  }
 0xe68   : > { %5039 = vst [vmem:[%s7964_s23 + $0x28] sm:$0xff] %v5023_v22  ;;  %v6662_v4 = vpop.f32.mrb[88].mxu1  ;;  %6688 = vmatprep.mubr.bf16.mxu0 %v3866_v16  ;;  %6712 = vmatprep.subr.bf16.mxu1 %v7113_v15  ;;  %v7116_v16 = vld [vmem:[%s8210_s5 + $0x348] sm:$0xff]   ;;  %v7117_v22 = vld [vmem:[%s8210_s5 + $0x350] sm:$0xff]  }
 0xe69   : > { %v6886_v29 = vadd.f32 %v6885_v47, %v6662_v4  ;;  %v3817_v30 = vpop.f32.mrb[89].mxu1  ;;  %6689 = vmatmul.mubr.bf16.gmra.mrb[148].mxu0 %v3867_v13  ;;  %6713 = vmatpush3.bf16.msra.mxu1 %v7113_v15  ;;  %v7114_v47 = vld [vmem:[%s8210_s5 + $0x338] sm:$0xff]   ;;  %v7120_v4 = vld [vmem:[%s8210_s5 + $0x368] sm:$0xff]  }
 0xe6a   : > { %v6889_v14 = vadd.f32 %v6888_v24, %v3817_v30  ;;  %v6663_v34 = vpop.f32.mrb[90].mxu1  ;;  %6714 = vmatprep.subr.bf16.mxu1 %v7114_v47  ;;  %v7118_v24 = vld [vmem:[%s8210_s5 + $0x358] sm:$0xff]  }
 0xe6b   : > { %v5028_v42 = vmul.f32 %v6886_v29, %v7953_v17  ;;  %v6892_v7 = vadd.f32 %v6891_v26, %v6663_v34  ;;  %v3820_v5 = vpop.f32.mrb[91].mxu1  ;;  %v7119_v26 = vld [vmem:[%s8210_s5 + $0x360] sm:$0xff]  }
 0xe6c   : > { %v5026_v25 = vmul.f32 %v6889_v14, %v7953_v17  ;;  %v6895_v41 = vadd.f32 %v6894_v28, %v3820_v5  ;;  %v5581_v28 = vld [vmem:[%s8212_s7 + $0x18] ss:$0 sm:$0xff] }
 0xe6d   : > { %5044 = vst [vmem:[%s7964_s23 + $0x50] sm:$0xff] %v5028_v42  ;;  %v3869_v59 = vpack.c.bf16 %v6892_v7, %v6886_v29  ;;  %v5029_v60 = vmul.f32 %v6892_v7, %v7953_v17  ;;  %6715 = vmatpush3.bf16.msra.mxu1 %v7114_v47 }
 0xe6e   : > { %5042 = vst [vmem:[%s7964_s23 + $0x40] sm:$0xff] %v5026_v25  ;;  %v3868_v40 = vpack.c.bf16 %v6895_v41, %v6889_v14  ;;  %v5027_v46 = vmul.f32 %v6895_v41, %v7953_v17 }
 0xe6f   : > { %5045 = vst [vmem:[%s7964_s23 + $0x58] sm:$0xff] %v5029_v60 }
 0xe70   : > { %5043 = vst [vmem:[%s7964_s23 + $0x48] sm:$0xff] %v5027_v46  ;;  %v6666_v52 = vpop.f32.mrb[92].mxu1  ;;  %6692 = vmatprep.mubr.bf16.mxu0 %v3868_v40 }
 0xe71   : > { %v6898_v54 = vadd.f32 %v6897_v45, %v6666_v52  ;;  %v3833_v51 = vpop.f32.mrb[93].mxu1  ;;  %6693 = vmatmul.mubr.bf16.gmra.mrb[152].mxu0 %v3869_v59 }
 0xe72   : > { %v6901_v61 = vadd.f32 %v6900_v49, %v3833_v51  ;;  %v6667_v62 = vpop.f32.mrb[94].mxu1 }
 0xe73   : > { %v5032_v63 = vmul.f32 %v6898_v54, %v7953_v17  ;;  %v6904_v8 = vadd.f32 %v6903_v50, %v6667_v62  ;;  %v3836_v48 = vpop.f32.mrb[95].mxu1 }
 0xe74   : > { %v5030_v9 = vmul.f32 %v6901_v61, %v7953_v17  ;;  %v6907_v11 = vadd.f32 %v6906_v53, %v3836_v48 }
 0xe75   : > { %5048 = vst [vmem:[%s7964_s23 + $0x70] sm:$0xff] %v5032_v63  ;;  %v3871_v44 = vpack.c.bf16 %v6904_v8, %v6898_v54  ;;  %v5033_v12 = vmul.f32 %v6904_v8, %v7953_v17 }
 0xe76   : > { %5046 = vst [vmem:[%s7964_s23 + $0x60] sm:$0xff] %v5030_v9  ;;  %v3870_v27 = vpack.c.bf16 %v6907_v11, %v6901_v61  ;;  %v5031_v13 = vmul.f32 %v6907_v11, %v7953_v17  ;;  %v7115_v17 = vld [vmem:[%s8210_s5 + $0x340] sm:$0xff]  }
 0xe77   : > { %5049 = vst [vmem:[%s7964_s23 + $0x78] sm:$0xff] %v5033_v12  ;;  %6732 = vmatprep.subr.bf16.mxu0 %v7115_v17 }
 0xe78   : > { %5047 = vst [vmem:[%s7964_s23 + $0x68] sm:$0xff] %v5031_v13  ;;  %6696 = vmatprep.mubr.bf16.mxu0 %v3870_v27  ;;  %6733 = vmatpush3.bf16.msra.mxu0 %v7115_v17 }
 0xe79   : > { %6697 = vmatmul.mubr.bf16.gmra.mrb[156].mxu0 %v3871_v44  ;;  %6734 = vmatprep.subr.bf16.mxu0 %v7116_v16 }
 0xe7c   : > { %6735 = vmatpush3.bf16.msra.mxu0 %v7116_v16 }
 0xe7d   : > { %6736 = vmatprep.subr.bf16.mxu0 %v7117_v22 }
 0xe80   : > { %6737 = vmatpush3.bf16.msra.mxu0 %v7117_v22 }
 0xe81   : > { %6738 = vmatprep.subr.bf16.mxu0 %v7118_v24 }
 0xe84   : > { %6739 = vmatpush3.bf16.msra.mxu0 %v7118_v24 }
 0xe85   : > { %6740 = vmatprep.subr.bf16.mxu0 %v7119_v26 }
 0xe88   : > { %6741 = vmatpush3.bf16.msra.mxu0 %v7119_v26 }
 0xe89   : > { %6742 = vmatprep.subr.bf16.mxu0 %v7120_v4 }
 0xe8c   : > { %6743 = vmatpush3.bf16.msra.mxu0 %v7120_v4 }
 0xf34   : > { %v6686_v29 = vpop.f32.mrb[144].mxu0 }
 0xf35   : > { %v3986_v30 = vadd.f32 %v6686_v29, %v5581_v28  ;;  %v3977_v31 = vpop.f32.mrb[145].mxu0 }
 0xf36   : > { %v3978_v32 = vadd.f32 %v5581_v28, %v3977_v31  ;;  %v6687_v14 = vpop.f32.mrb[146].mxu0 }
 0xf37   : > { %v3989_v34 = vadd.f32 %v6687_v14, %v5581_v28  ;;  %v3980_v35 = vpop.f32.mrb[147].mxu0  ;;  %v4042_v42 = vmax.f32 %v3986_v30, 0.0 }
 0xf38   : > { %v3981_v10 = vadd.f32 %v5581_v28, %v3980_v35  ;;  %v4040_v5 = vmax.f32 %v3978_v32, 0.0 }
 0xf39   : > { %v4043_v7 = vmax.f32 %v3989_v34, 0.0 }
 0xf3a   : > { %v4041_v6 = vmax.f32 %v3981_v10, 0.0 }
 0xf3b   : > { %v4057_v23 = vpack.c.bf16 %v4043_v7, %v4042_v42  ;;  %v7121_v7 = vld [vmem:[%s8210_s5 + $0x370] sm:$0xff]  }
 0xf3c   : > { %v4056_v25 = vpack.c.bf16 %v4041_v6, %v4040_v5  ;;  %v6690_v41 = vpop.f32.mrb[148].mxu0  ;;  %6744 = vmatprep.subr.bf16.mxu0 %v7121_v7  ;;  %v7122_v5 = vld [vmem:[%s8210_s5 + $0x378] sm:$0xff]   ;;  %v7124_v6 = vld [vmem:[%s8210_s5 + $0x388] sm:$0xff]  }
 0xf3d   : > { %v4002_v33 = vadd.f32 %v6690_v41, %v5581_v28  ;;  %v3993_v43 = vpop.f32.mrb[149].mxu0  ;;  %6745 = vmatpush3.bf16.msra.mxu0 %v7121_v7  ;;  %v7127_v41 = vld [vmem:[%s8210_s5 + $0x3a0] sm:$0xff]  }
 0xf3e   : > { %v3994_v59 = vadd.f32 %v5581_v28, %v3993_v43  ;;  %v6691_v60 = vpop.f32.mrb[150].mxu0  ;;  %6716 = vmatprep.mubr.bf16.mxu1 %v4056_v25  ;;  %6746 = vmatprep.subr.bf16.mxu0 %v7122_v5  ;;  %v7126_v25 = vld [vmem:[%s8210_s5 + $0x398] sm:$0xff]  }
 0xf3f   : > { %v4005_v45 = vadd.f32 %v6691_v60, %v5581_v28  ;;  %v3996_v40 = vpop.f32.mrb[151].mxu0  ;;  %6717 = vmatmul.mubr.bf16.vlgmr.msra.gmra.mrb[128].mxu1 %v4057_v23  ;;  %v4046_v49 = vmax.f32 %v4002_v33, 0.0  ;;  %v7125_v23 = vld [vmem:[%s8210_s5 + $0x390] sm:$0xff]   ;;  %v7128_v33 = vld [vmem:[%s8210_s5 + $0x3a8] sm:$0xff]   ;;  %v5607_v43 = vld [vmem:[%s8212_s7 + $0x19] ss:$0 sm:$0xff] }
 0xf40   : > { %v3997_v46 = vadd.f32 %v5581_v28, %v3996_v40  ;;  %v4044_v52 = vmax.f32 %v3994_v59, 0.0 }
 0xf41   : > { %v4047_v50 = vmax.f32 %v4005_v45, 0.0  ;;  %6747 = vmatpush3.bf16.msra.mxu0 %v7122_v5 }
 0xf42   : > { %v4045_v53 = vmax.f32 %v3997_v46, 0.0 }
 0xf43   : > { %v4059_v54 = vpack.c.bf16 %v4047_v50, %v4046_v49 }
 0xf44   : > { %v4058_v51 = vpack.c.bf16 %v4045_v53, %v4044_v52  ;;  %v6694_v61 = vpop.f32.mrb[152].mxu0 }
 0xf45   : > { %v4018_v62 = vadd.f32 %v6694_v61, %v5581_v28  ;;  %v4009_v63 = vpop.f32.mrb[153].mxu0 }
 0xf46   : > { %v4010_v8 = vadd.f32 %v5581_v28, %v4009_v63  ;;  %v6695_v48 = vpop.f32.mrb[154].mxu0  ;;  %6720 = vmatprep.mubr.bf16.mxu1 %v4058_v51 }
 0xf47   : > { %v4021_v9 = vadd.f32 %v6695_v48, %v5581_v28  ;;  %v4012_v11 = vpop.f32.mrb[155].mxu0  ;;  %6721 = vmatmul.mubr.bf16.gmra.mrb[132].mxu1 %v4059_v54  ;;  %v4050_v12 = vmax.f32 %v4018_v62, 0.0 }
 0xf48   : > { %v4013_v44 = vadd.f32 %v5581_v28, %v4012_v11  ;;  %v4048_v13 = vmax.f32 %v4010_v8, 0.0 }
 0xf49   : > { %v4051_v27 = vmax.f32 %v4021_v9, 0.0 }
 0xf4a   : > { %v4049_v15 = vmax.f32 %v4013_v44, 0.0 }
 0xf4b   : > { %v4061_v47 = vpack.c.bf16 %v4051_v27, %v4050_v12 }
 0xf4c   : > { %v4060_v17 = vpack.c.bf16 %v4049_v15, %v4048_v13  ;;  %v6698_v16 = vpop.f32.mrb[156].mxu0 }
 0xf4d   : > { %v4034_v22 = vadd.f32 %v6698_v16, %v5581_v28  ;;  %v4025_v24 = vpop.f32.mrb[157].mxu0 }
 0xf4e   : > { %v4026_v26 = vadd.f32 %v5581_v28, %v4025_v24  ;;  %v6699_v4 = vpop.f32.mrb[158].mxu0  ;;  %6724 = vmatprep.mubr.bf16.mxu1 %v4060_v17 }
 0xf4f   : > { %v4037_v29 = vadd.f32 %v6699_v4, %v5581_v28  ;;  %v4028_v30 = vpop.f32.mrb[159].mxu0  ;;  %6725 = vmatmul.mubr.bf16.gmra.mrb[136].mxu1 %v4061_v47  ;;  %v4054_v32 = vmax.f32 %v4034_v22, 0.0 }
 0xf50   : > { %v4029_v31 = vadd.f32 %v5581_v28, %v4028_v30  ;;  %v4052_v34 = vmax.f32 %v4026_v26, 0.0  ;;  %v7123_v28 = vld [vmem:[%s8210_s5 + $0x380] sm:$0xff]  }
 0xf51   : > { %v4055_v14 = vmax.f32 %v4037_v29, 0.0  ;;  %6764 = vmatprep.subr.bf16.mxu1 %v7123_v28 }
 0xf52   : > { %v4053_v35 = vmax.f32 %v4029_v31, 0.0  ;;  %6765 = vmatpush3.bf16.msra.mxu1 %v7123_v28 }
 0xf53   : > { %v4063_v10 = vpack.c.bf16 %v4055_v14, %v4054_v32  ;;  %6766 = vmatprep.subr.bf16.mxu1 %v7124_v6 }
 0xf54   : > { %v4062_v42 = vpack.c.bf16 %v4053_v35, %v4052_v34 }
 0xf56   : > { %6728 = vmatprep.mubr.bf16.mxu1 %v4062_v42  ;;  %6767 = vmatpush3.bf16.msra.mxu1 %v7124_v6 }
 0xf57   : > { %6729 = vmatmul.mubr.bf16.gmra.mrb[140].mxu1 %v4063_v10  ;;  %6768 = vmatprep.subr.bf16.mxu1 %v7125_v23 }
 0xf5a   : > { %6769 = vmatpush3.bf16.msra.mxu1 %v7125_v23 }
 0xf5b   : > { %6770 = vmatprep.subr.bf16.mxu1 %v7126_v25 }
 0xf5e   : > { %6771 = vmatpush3.bf16.msra.mxu1 %v7126_v25 }
 0xf5f   : > { %6772 = vmatprep.subr.bf16.mxu1 %v7127_v41 }
 0xf62   : > { %6773 = vmatpush3.bf16.msra.mxu1 %v7127_v41 }
 0xf63   : > { %6774 = vmatprep.subr.bf16.mxu1 %v7128_v33 }
 0xf66   : > { %6775 = vmatpush3.bf16.msra.mxu1 %v7128_v33 }
0x1012   : > { %v6718_v59 = vpop.f32.mrb[128].mxu1 }
0x1013   : > { %v4177_v60 = vadd.f32 %v6718_v59, %v5607_v43  ;;  %v4168_v45 = vpop.f32.mrb[129].mxu1 }
0x1014   : > { %v4169_v40 = vadd.f32 %v5607_v43, %v4168_v45  ;;  %v6719_v46 = vpop.f32.mrb[130].mxu1 }
0x1015   : > { %v4180_v49 = vadd.f32 %v6719_v46, %v5607_v43  ;;  %v4171_v50 = vpop.f32.mrb[131].mxu1  ;;  %v4233_v53 = vmax.f32 %v4177_v60, 0.0 }
0x1016   : > { %v4172_v52 = vadd.f32 %v5607_v43, %v4171_v50  ;;  %v4231_v51 = vmax.f32 %v4169_v40, 0.0 }
0x1017   : > { %v4234_v54 = vmax.f32 %v4180_v49, 0.0 }
0x1018   : > { %v4232_v61 = vmax.f32 %v4172_v52, 0.0 }
0x1019   : > { %v4248_v62 = vpack.c.bf16 %v4234_v54, %v4233_v53  ;;  %v7129_v54 = vld [vmem:[%s8210_s5 + $0x3b0] sm:$0xff]  }
0x101a   : > { %v4247_v63 = vpack.c.bf16 %v4232_v61, %v4231_v51  ;;  %v6722_v8 = vpop.f32.mrb[132].mxu1  ;;  %6776 = vmatprep.subr.bf16.mxu1 %v7129_v54  ;;  %v7130_v51 = vld [vmem:[%s8210_s5 + $0x3b8] sm:$0xff]   ;;  %v7132_v61 = vld [vmem:[%s8210_s5 + $0x3c8] sm:$0xff]  }
0x101b   : > { %v4193_v48 = vadd.f32 %v6722_v8, %v5607_v43  ;;  %v4184_v9 = vpop.f32.mrb[133].mxu1  ;;  %6777 = vmatpush3.bf16.msra.mxu1 %v7129_v54  ;;  %v7135_v8 = vld [vmem:[%s8210_s5 + $0x3e0] sm:$0xff]  }
0x101c   : > { %v4185_v11 = vadd.f32 %v5607_v43, %v4184_v9  ;;  %v6723_v44 = vpop.f32.mrb[134].mxu1  ;;  %6748 = vmatprep.mubr.bf16.mxu0 %v4247_v63  ;;  %6778 = vmatprep.subr.bf16.mxu1 %v7130_v51  ;;  %v7134_v63 = vld [vmem:[%s8210_s5 + $0x3d8] sm:$0xff]  }
0x101d   : > { %v4196_v12 = vadd.f32 %v6723_v44, %v5607_v43  ;;  %v4187_v27 = vpop.f32.mrb[135].mxu1  ;;  %6749 = vmatmul.mubr.bf16.vlgmr.msra.gmra.mrb[160].mxu0 %v4248_v62  ;;  %v4237_v15 = vmax.f32 %v4193_v48, 0.0  ;;  %v7133_v62 = vld [vmem:[%s8210_s5 + $0x3d0] sm:$0xff]   ;;  %v7136_v48 = vld [vmem:[%s8210_s5 + $0x3e8] sm:$0xff]   ;;  %v5633_v9 = vld [vmem:[%s8212_s7 + $0x1a] ss:$0 sm:$0xff] }
0x101e   : > { %v4188_v13 = vadd.f32 %v5607_v43, %v4187_v27  ;;  %v4235_v17 = vmax.f32 %v4185_v11, 0.0 }
0x101f   : > { %v4238_v47 = vmax.f32 %v4196_v12, 0.0  ;;  %6779 = vmatpush3.bf16.msra.mxu1 %v7130_v51 }
0x1020   : > { %v4236_v16 = vmax.f32 %v4188_v13, 0.0 }
0x1021   : > { %v4250_v22 = vpack.c.bf16 %v4238_v47, %v4237_v15 }
0x1022   : > { %v4249_v24 = vpack.c.bf16 %v4236_v16, %v4235_v17  ;;  %v6726_v26 = vpop.f32.mrb[136].mxu1 }
0x1023   : > { %v4209_v4 = vadd.f32 %v6726_v26, %v5607_v43  ;;  %v4200_v29 = vpop.f32.mrb[137].mxu1 }
0x1024   : > { %v4201_v30 = vadd.f32 %v5607_v43, %v4200_v29  ;;  %v6727_v31 = vpop.f32.mrb[138].mxu1  ;;  %6752 = vmatprep.mubr.bf16.mxu0 %v4249_v24 }
0x1025   : > { %v4212_v32 = vadd.f32 %v6727_v31, %v5607_v43  ;;  %v4203_v14 = vpop.f32.mrb[139].mxu1  ;;  %6753 = vmatmul.mubr.bf16.gmra.mrb[164].mxu0 %v4250_v22  ;;  %v4241_v35 = vmax.f32 %v4209_v4, 0.0 }
0x1026   : > { %v4204_v34 = vadd.f32 %v5607_v43, %v4203_v14  ;;  %v4239_v42 = vmax.f32 %v4201_v30, 0.0 }
0x1027   : > { %v4242_v10 = vmax.f32 %v4212_v32, 0.0 }
0x1028   : > { %v4240_v7 = vmax.f32 %v4204_v34, 0.0 }
0x1029   : > { %v4252_v5 = vpack.c.bf16 %v4242_v10, %v4241_v35 }
0x102a   : > { %v4251_v28 = vpack.c.bf16 %v4240_v7, %v4239_v42  ;;  %v6730_v6 = vpop.f32.mrb[140].mxu1 }
0x102b   : > { %v4225_v23 = vadd.f32 %v6730_v6, %v5607_v43  ;;  %v4216_v25 = vpop.f32.mrb[141].mxu1 }
0x102c   : > { %v4217_v41 = vadd.f32 %v5607_v43, %v4216_v25  ;;  %v6731_v33 = vpop.f32.mrb[142].mxu1  ;;  %6756 = vmatprep.mubr.bf16.mxu0 %v4251_v28 }
0x102d   : > { %v4228_v59 = vadd.f32 %v6731_v33, %v5607_v43  ;;  %v4219_v60 = vpop.f32.mrb[143].mxu1  ;;  %6757 = vmatmul.mubr.bf16.gmra.mrb[168].mxu0 %v4252_v5  ;;  %v4245_v40 = vmax.f32 %v4225_v23, 0.0 }
0x102e   : > { %v4220_v45 = vadd.f32 %v5607_v43, %v4219_v60  ;;  %v4243_v49 = vmax.f32 %v4217_v41, 0.0  ;;  %v7131_v43 = vld [vmem:[%s8210_s5 + $0x3c0] sm:$0xff]  }
0x102f   : > { %v4246_v46 = vmax.f32 %v4228_v59, 0.0  ;;  %6796 = vmatprep.subr.bf16.mxu0 %v7131_v43 }
0x1030   : > { %v4244_v50 = vmax.f32 %v4220_v45, 0.0  ;;  %6797 = vmatpush3.bf16.msra.mxu0 %v7131_v43 }
0x1031   : > { %v4254_v52 = vpack.c.bf16 %v4246_v46, %v4245_v40  ;;  %6798 = vmatprep.subr.bf16.mxu0 %v7132_v61 }
0x1032   : > { %v4253_v53 = vpack.c.bf16 %v4244_v50, %v4243_v49 }
0x1034   : > { %6760 = vmatprep.mubr.bf16.mxu0 %v4253_v53  ;;  %6799 = vmatpush3.bf16.msra.mxu0 %v7132_v61 }
0x1035   : > { %6761 = vmatmul.mubr.bf16.gmra.mrb[172].mxu0 %v4254_v52  ;;  %6800 = vmatprep.subr.bf16.mxu0 %v7133_v62 }
0x1038   : > { %6801 = vmatpush3.bf16.msra.mxu0 %v7133_v62 }
0x1039   : > { %6802 = vmatprep.subr.bf16.mxu0 %v7134_v63 }
0x103c   : > { %6803 = vmatpush3.bf16.msra.mxu0 %v7134_v63 }
0x103d   : > { %6804 = vmatprep.subr.bf16.mxu0 %v7135_v8 }
0x1040   : > { %6805 = vmatpush3.bf16.msra.mxu0 %v7135_v8 }
0x1041   : > { %6806 = vmatprep.subr.bf16.mxu0 %v7136_v48 }
0x1044   : > { %6807 = vmatpush3.bf16.msra.mxu0 %v7136_v48 }
0x10f0   : > { %v6750_v11 = vpop.f32.mrb[160].mxu0 }
0x10f1   : > { %v4368_v44 = vadd.f32 %v6750_v11, %v5633_v9  ;;  %v4359_v12 = vpop.f32.mrb[161].mxu0 }
0x10f2   : > { %v4360_v27 = vadd.f32 %v5633_v9, %v4359_v12  ;;  %v6751_v13 = vpop.f32.mrb[162].mxu0 }
0x10f3   : > { %v4371_v15 = vadd.f32 %v6751_v13, %v5633_v9  ;;  %v4362_v47 = vpop.f32.mrb[163].mxu0  ;;  %v4424_v16 = vmax.f32 %v4368_v44, 0.0 }
0x10f4   : > { %v4363_v17 = vadd.f32 %v5633_v9, %v4362_v47  ;;  %v4422_v24 = vmax.f32 %v4360_v27, 0.0 }
0x10f5   : > { %v4425_v22 = vmax.f32 %v4371_v15, 0.0 }
0x10f6   : > { %v4423_v26 = vmax.f32 %v4363_v17, 0.0 }
0x10f7   : > { %v4439_v4 = vpack.c.bf16 %v4425_v22, %v4424_v16  ;;  %v7137_v22 = vld [vmem:[%s8210_s5 + $0x3f0] sm:$0xff]  }
0x10f8   : > { %v4438_v29 = vpack.c.bf16 %v4423_v26, %v4422_v24  ;;  %v6754_v30 = vpop.f32.mrb[164].mxu0  ;;  %6808 = vmatprep.subr.bf16.mxu0 %v7137_v22  ;;  %v7138_v24 = vld [vmem:[%s8210_s5 + $0x3f8] sm:$0xff]   ;;  %v7140_v26 = vld [vmem:[#allocation4 + $0xc8] sm:$0xff]  }
0x10f9   : > { %v4384_v31 = vadd.f32 %v6754_v30, %v5633_v9  ;;  %v4375_v32 = vpop.f32.mrb[165].mxu0  ;;  %6809 = vmatpush3.bf16.msra.mxu0 %v7137_v22  ;;  %v7143_v30 = vld [vmem:[#allocation4 + $0xe0] sm:$0xff]  }
0x10fa   : > { %v4376_v14 = vadd.f32 %v5633_v9, %v4375_v32  ;;  %v6755_v34 = vpop.f32.mrb[166].mxu0  ;;  %6780 = vmatprep.mubr.bf16.mxu1 %v4438_v29  ;;  %6810 = vmatprep.subr.bf16.mxu0 %v7138_v24  ;;  %v7142_v29 = vld [vmem:[#allocation4 + $0xd8] sm:$0xff]  }
0x10fb   : > { %v4387_v35 = vadd.f32 %v6755_v34, %v5633_v9  ;;  %v4378_v10 = vpop.f32.mrb[167].mxu0  ;;  %6781 = vmatmul.mubr.bf16.vlgmr.msra.gmra.mrb[144].mxu1 %v4439_v4  ;;  %v4428_v7 = vmax.f32 %v4384_v31, 0.0  ;;  %v7141_v4 = vld [vmem:[#allocation4 + $0xd0] sm:$0xff]   ;;  %v7144_v31 = vld [vmem:[#allocation4 + $0xe8] sm:$0xff]   ;;  %v5659_v32 = vld [vmem:[%s8212_s7 + $0x1b] ss:$0 sm:$0xff] }
0x10fc   : > { %v4379_v42 = vadd.f32 %v5633_v9, %v4378_v10  ;;  %v4426_v28 = vmax.f32 %v4376_v14, 0.0 }
0x10fd   : > { %v4429_v5 = vmax.f32 %v4387_v35, 0.0  ;;  %6811 = vmatpush3.bf16.msra.mxu0 %v7138_v24 }
0x10fe   : > { %v4427_v6 = vmax.f32 %v4379_v42, 0.0 }
0x10ff   : > { %v4441_v23 = vpack.c.bf16 %v4429_v5, %v4428_v7 }
0x1100   : > { %v4440_v25 = vpack.c.bf16 %v4427_v6, %v4426_v28  ;;  %v6758_v41 = vpop.f32.mrb[168].mxu0 }
0x1101   : > { %v4400_v33 = vadd.f32 %v6758_v41, %v5633_v9  ;;  %v4391_v59 = vpop.f32.mrb[169].mxu0 }
0x1102   : > { %v4392_v60 = vadd.f32 %v5633_v9, %v4391_v59  ;;  %v6759_v45 = vpop.f32.mrb[170].mxu0  ;;  %6784 = vmatprep.mubr.bf16.mxu1 %v4440_v25 }
0x1103   : > { %v4403_v40 = vadd.f32 %v6759_v45, %v5633_v9  ;;  %v4394_v46 = vpop.f32.mrb[171].mxu0  ;;  %6785 = vmatmul.mubr.bf16.gmra.mrb[148].mxu1 %v4441_v23  ;;  %v4432_v50 = vmax.f32 %v4400_v33, 0.0 }
0x1104   : > { %v4395_v49 = vadd.f32 %v5633_v9, %v4394_v46  ;;  %v4430_v53 = vmax.f32 %v4392_v60, 0.0 }
0x1105   : > { %v4433_v52 = vmax.f32 %v4403_v40, 0.0 }
0x1106   : > { %v4431_v54 = vmax.f32 %v4395_v49, 0.0 }
0x1107   : > { %v4443_v51 = vpack.c.bf16 %v4433_v52, %v4432_v50 }
0x1108   : > { %v4442_v43 = vpack.c.bf16 %v4431_v54, %v4430_v53  ;;  %v6762_v61 = vpop.f32.mrb[172].mxu0 }
0x1109   : > { %v4416_v62 = vadd.f32 %v6762_v61, %v5633_v9  ;;  %v4407_v63 = vpop.f32.mrb[173].mxu0 }
0x110a   : > { %v4408_v8 = vadd.f32 %v5633_v9, %v4407_v63  ;;  %v6763_v48 = vpop.f32.mrb[174].mxu0  ;;  %6788 = vmatprep.mubr.bf16.mxu1 %v4442_v43 }
0x110b   : > { %v4419_v11 = vadd.f32 %v6763_v48, %v5633_v9  ;;  %v4410_v44 = vpop.f32.mrb[175].mxu0  ;;  %6789 = vmatmul.mubr.bf16.gmra.mrb[152].mxu1 %v4443_v51  ;;  %v4436_v27 = vmax.f32 %v4416_v62, 0.0 }
0x110c   : > { %v4411_v12 = vadd.f32 %v5633_v9, %v4410_v44  ;;  %v4434_v15 = vmax.f32 %v4408_v8, 0.0  ;;  %v7139_v9 = vld [vmem:[#allocation4 + $0xc0] sm:$0xff]  }
0x110d   : > { %v4437_v13 = vmax.f32 %v4419_v11, 0.0  ;;  %6828 = vmatprep.subr.bf16.mxu1 %v7139_v9 }
0x110e   : > { %v4435_v47 = vmax.f32 %v4411_v12, 0.0  ;;  %6829 = vmatpush3.bf16.msra.mxu1 %v7139_v9 }
0x110f   : > { %v4445_v17 = vpack.c.bf16 %v4437_v13, %v4436_v27  ;;  %6830 = vmatprep.subr.bf16.mxu1 %v7140_v26 }
0x1110   : > { %v4444_v16 = vpack.c.bf16 %v4435_v47, %v4434_v15 }
0x1112   : > { %6792 = vmatprep.mubr.bf16.mxu1 %v4444_v16  ;;  %6831 = vmatpush3.bf16.msra.mxu1 %v7140_v26 }
0x1113   : > { %6793 = vmatmul.mubr.bf16.gmra.mrb[156].mxu1 %v4445_v17  ;;  %6832 = vmatprep.subr.bf16.mxu1 %v7141_v4 }
0x1116   : > { %6833 = vmatpush3.bf16.msra.mxu1 %v7141_v4 }
0x1117   : > { %6834 = vmatprep.subr.bf16.mxu1 %v7142_v29 }
0x111a   : > { %6835 = vmatpush3.bf16.msra.mxu1 %v7142_v29 }
0x111b   : > { %6836 = vmatprep.subr.bf16.mxu1 %v7143_v30 }
0x111e   : > { %6837 = vmatpush3.bf16.msra.mxu1 %v7143_v30 }
0x111f   : > { %6838 = vmatprep.subr.bf16.mxu1 %v7144_v31 }
0x1122   : > { %6839 = vmatpush3.bf16.msra.mxu1 %v7144_v31 }
0x11ce   : > { %v6782_v14 = vpop.f32.mrb[144].mxu1 }
0x11cf   : > { %v4559_v34 = vadd.f32 %v6782_v14, %v5659_v32  ;;  %v4550_v35 = vpop.f32.mrb[145].mxu1 }
0x11d0   : > { %v4551_v10 = vadd.f32 %v5659_v32, %v4550_v35  ;;  %v6783_v42 = vpop.f32.mrb[146].mxu1 }
0x11d1   : > { %v4562_v7 = vadd.f32 %v6783_v42, %v5659_v32  ;;  %v4553_v5 = vpop.f32.mrb[147].mxu1  ;;  %v4615_v6 = vmax.f32 %v4559_v34, 0.0 }
0x11d2   : > { %v4554_v28 = vadd.f32 %v5659_v32, %v4553_v5  ;;  %v4613_v25 = vmax.f32 %v4551_v10, 0.0 }
0x11d3   : > { %v4616_v23 = vmax.f32 %v4562_v7, 0.0 }
0x11d4   : > { %v4614_v41 = vmax.f32 %v4554_v28, 0.0 }
0x11d5   : > { %v4630_v33 = vpack.c.bf16 %v4616_v23, %v4615_v6  ;;  %v7145_v23 = vld [vmem:[#allocation4 + $0xf0] sm:$0xff]  }
0x11d6   : > { %v4629_v59 = vpack.c.bf16 %v4614_v41, %v4613_v25  ;;  %v6786_v60 = vpop.f32.mrb[148].mxu1  ;;  %6840 = vmatprep.subr.bf16.mxu1 %v7145_v23  ;;  %v7146_v25 = vld [vmem:[#allocation4 + $0xf8] sm:$0xff]  }
0x11d7   : > { %v4575_v45 = vadd.f32 %v6786_v60, %v5659_v32  ;;  %v4566_v40 = vpop.f32.mrb[149].mxu1  ;;  %6841 = vmatpush3.bf16.msra.mxu1 %v7145_v23  ;;  %v5685_v41 = vld [vmem:[%s8212_s7 + $0x1c] ss:$0 sm:$0xff] }
0x11d8   : > { %v4567_v46 = vadd.f32 %v5659_v32, %v4566_v40  ;;  %v6787_v49 = vpop.f32.mrb[150].mxu1  ;;  %6812 = vmatprep.mubr.bf16.mxu0 %v4629_v59  ;;  %6842 = vmatprep.subr.bf16.mxu1 %v7146_v25 }
0x11d9   : > { %v4578_v50 = vadd.f32 %v6787_v49, %v5659_v32  ;;  %v4569_v52 = vpop.f32.mrb[151].mxu1  ;;  %6813 = vmatmul.mubr.bf16.vlgmr.msra.gmra.mrb[176].mxu0 %v4630_v33  ;;  %v4619_v54 = vmax.f32 %v4575_v45, 0.0 }
0x11da   : > { %v4570_v53 = vadd.f32 %v5659_v32, %v4569_v52  ;;  %v4617_v43 = vmax.f32 %v4567_v46, 0.0 }
0x11db   : > { %v4620_v51 = vmax.f32 %v4578_v50, 0.0  ;;  %6843 = vmatpush3.bf16.msra.mxu1 %v7146_v25 }
0x11dc   : > { %v4618_v61 = vmax.f32 %v4570_v53, 0.0 }
0x11dd   : > { %v4632_v62 = vpack.c.bf16 %v4620_v51, %v4619_v54 }
0x11de   : > { %v4631_v63 = vpack.c.bf16 %v4618_v61, %v4617_v43  ;;  %v6790_v8 = vpop.f32.mrb[152].mxu1 }
0x11df   : > { %v4591_v48 = vadd.f32 %v6790_v8, %v5659_v32  ;;  %v4582_v11 = vpop.f32.mrb[153].mxu1 }
0x11e0   : > { %v4583_v44 = vadd.f32 %v5659_v32, %v4582_v11  ;;  %v6791_v12 = vpop.f32.mrb[154].mxu1  ;;  %6816 = vmatprep.mubr.bf16.mxu0 %v4631_v63 }
0x11e1   : > { %v4594_v27 = vadd.f32 %v6791_v12, %v5659_v32  ;;  %v4585_v13 = vpop.f32.mrb[155].mxu1  ;;  %6817 = vmatmul.mubr.bf16.gmra.mrb[180].mxu0 %v4632_v62  ;;  %v4623_v47 = vmax.f32 %v4591_v48, 0.0 }
0x11e2   : > { %v4586_v15 = vadd.f32 %v5659_v32, %v4585_v13  ;;  %v4621_v16 = vmax.f32 %v4583_v44, 0.0 }
0x11e3   : > { %v4624_v17 = vmax.f32 %v4594_v27, 0.0 }
0x11e4   : > { %v4622_v22 = vmax.f32 %v4586_v15, 0.0 }
0x11e5   : > { %v4634_v24 = vpack.c.bf16 %v4624_v17, %v4623_v47 }
0x11e6   : > { %v4633_v9 = vpack.c.bf16 %v4622_v22, %v4621_v16  ;;  %v6794_v26 = vpop.f32.mrb[156].mxu1 }
0x11e7   : > { %v4607_v4 = vadd.f32 %v6794_v26, %v5659_v32  ;;  %v4598_v29 = vpop.f32.mrb[157].mxu1 }
0x11e8   : > { %v4599_v30 = vadd.f32 %v5659_v32, %v4598_v29  ;;  %v6795_v31 = vpop.f32.mrb[158].mxu1  ;;  %6820 = vmatprep.mubr.bf16.mxu0 %v4633_v9 }
0x11e9   : > { %v4610_v14 = vadd.f32 %v6795_v31, %v5659_v32  ;;  %v4601_v34 = vpop.f32.mrb[159].mxu1  ;;  %6821 = vmatmul.mubr.bf16.gmra.mrb[184].mxu0 %v4634_v24  ;;  %v4627_v10 = vmax.f32 %v4607_v4, 0.0 }
0x11ea   : > { %v4602_v35 = vadd.f32 %v5659_v32, %v4601_v34  ;;  %v4625_v7 = vmax.f32 %v4599_v30, 0.0 }
0x11eb   : > { %v4628_v42 = vmax.f32 %v4610_v14, 0.0 }
0x11ec   : > { %v4626_v5 = vmax.f32 %v4602_v35, 0.0 }
0x11ed   : > { %v4636_v28 = vpack.c.bf16 %v4628_v42, %v4627_v10 }
0x11ee   : > { %v4635_v6 = vpack.c.bf16 %v4626_v5, %v4625_v7 }
0x11f0   : > { %6824 = vmatprep.mubr.bf16.mxu0 %v4635_v6 }
0x11f1   : > { %6825 = vmatmul.mubr.bf16.gmra.mrb[188].mxu0 %v4636_v28 }
0x12ac   : > { %v6814_v33 = vpop.f32.mrb[176].mxu0 }
0x12ad   : > { %v4750_v32 = vadd.f32 %v6814_v33, %v5685_v41  ;;  %v4741_v59 = vpop.f32.mrb[177].mxu0 }
0x12ae   : > { %v4742_v60 = vadd.f32 %v5685_v41, %v4741_v59  ;;  %v6815_v45 = vpop.f32.mrb[178].mxu0 }
0x12af   : > { %v4753_v40 = vadd.f32 %v6815_v45, %v5685_v41  ;;  %v4744_v46 = vpop.f32.mrb[179].mxu0  ;;  %v4806_v50 = vmax.f32 %v4750_v32, 0.0 }
0x12b0   : > { %v4745_v49 = vadd.f32 %v5685_v41, %v4744_v46  ;;  %v4804_v53 = vmax.f32 %v4742_v60, 0.0 }
0x12b1   : > { %v4807_v52 = vmax.f32 %v4753_v40, 0.0 }
0x12b2   : > { %v4805_v54 = vmax.f32 %v4745_v49, 0.0 }
0x12b3   : > { %v4821_v51 = vpack.c.bf16 %v4807_v52, %v4806_v50  ;;  %v8125_v52 = vld [vmem:[%s8212_s7 + $0x1d] ss:$0 sm:$0xff] }
0x12b4   : > { %v4820_v43 = vpack.c.bf16 %v4805_v54, %v4804_v53  ;;  %v6818_v61 = vpop.f32.mrb[180].mxu0 }
0x12b5   : > { %v4766_v62 = vadd.f32 %v6818_v61, %v5685_v41  ;;  %v4757_v63 = vpop.f32.mrb[181].mxu0 }
0x12b6   : > { %v4758_v8 = vadd.f32 %v5685_v41, %v4757_v63  ;;  %v6819_v48 = vpop.f32.mrb[182].mxu0  ;;  %6844 = vmatprep.mubr.bf16.mxu1 %v4820_v43 }
0x12b7   : > { %v4769_v11 = vadd.f32 %v6819_v48, %v5685_v41  ;;  %v4760_v44 = vpop.f32.mrb[183].mxu0  ;;  %6845 = vmatmul.mubr.bf16.vlgmr.msra.gmra.mrb[160].mxu1 %v4821_v51  ;;  %v4810_v27 = vmax.f32 %v4766_v62, 0.0 }
0x12b8   : > { %v4761_v12 = vadd.f32 %v5685_v41, %v4760_v44  ;;  %v4808_v15 = vmax.f32 %v4758_v8, 0.0 }
0x12b9   : > { %v4811_v13 = vmax.f32 %v4769_v11, 0.0 }
0x12ba   : > { %v4809_v47 = vmax.f32 %v4761_v12, 0.0 }
0x12bb   : > { %v4823_v17 = vpack.c.bf16 %v4811_v13, %v4810_v27 }
0x12bc   : > { %v4822_v16 = vpack.c.bf16 %v4809_v47, %v4808_v15  ;;  %v6822_v22 = vpop.f32.mrb[184].mxu0 }
0x12bd   : > { %v4782_v24 = vadd.f32 %v6822_v22, %v5685_v41  ;;  %v4773_v9 = vpop.f32.mrb[185].mxu0 }
0x12be   : > { %v4774_v26 = vadd.f32 %v5685_v41, %v4773_v9  ;;  %v6823_v4 = vpop.f32.mrb[186].mxu0  ;;  %6848 = vmatprep.mubr.bf16.mxu1 %v4822_v16 }
0x12bf   : > { %v4785_v29 = vadd.f32 %v6823_v4, %v5685_v41  ;;  %v4776_v30 = vpop.f32.mrb[187].mxu0  ;;  %6849 = vmatmul.mubr.bf16.gmra.mrb[164].mxu1 %v4823_v17  ;;  %v4814_v14 = vmax.f32 %v4782_v24, 0.0 }
0x12c0   : > { %v4777_v31 = vadd.f32 %v5685_v41, %v4776_v30  ;;  %v4812_v35 = vmax.f32 %v4774_v26, 0.0 }
0x12c1   : > { %v4815_v34 = vmax.f32 %v4785_v29, 0.0 }
0x12c2   : > { %v4813_v10 = vmax.f32 %v4777_v31, 0.0 }
0x12c3   : > { %v4825_v42 = vpack.c.bf16 %v4815_v34, %v4814_v14 }
0x12c4   : > { %v4824_v7 = vpack.c.bf16 %v4813_v10, %v4812_v35  ;;  %v6826_v5 = vpop.f32.mrb[188].mxu0 }
0x12c5   : > { %v4798_v28 = vadd.f32 %v6826_v5, %v5685_v41  ;;  %v4789_v6 = vpop.f32.mrb[189].mxu0 }
0x12c6   : > { %v4790_v23 = vadd.f32 %v5685_v41, %v4789_v6  ;;  %v6827_v25 = vpop.f32.mrb[190].mxu0  ;;  %6852 = vmatprep.mubr.bf16.mxu1 %v4824_v7 }
0x12c7   : > { %v4801_v33 = vadd.f32 %v6827_v25, %v5685_v41  ;;  %v4792_v32 = vpop.f32.mrb[191].mxu0  ;;  %6853 = vmatmul.mubr.bf16.gmra.mrb[168].mxu1 %v4825_v42  ;;  %v4818_v60 = vmax.f32 %v4798_v28, 0.0 }
0x12c8   : > { %v4793_v59 = vadd.f32 %v5685_v41, %v4792_v32  ;;  %v4816_v40 = vmax.f32 %v4790_v23, 0.0  ;;  %v8131_v41 = vld [vmem:[%s8208_s3] ss:$0 sm:$0xff] }
0x12c9   : > { %v4819_v45 = vmax.f32 %v4801_v33, 0.0 }
0x12ca   : > { %v4817_v46 = vmax.f32 %v4793_v59, 0.0 }
0x12cb   : > { %v4827_v49 = vpack.c.bf16 %v4819_v45, %v4818_v60 }
0x12cc   : > { %v4826_v50 = vpack.c.bf16 %v4817_v46, %v4816_v40 }
0x12ce   : > { %6856 = vmatprep.mubr.bf16.mxu1 %v4826_v50 }
0x12cf   : > { %6857 = vmatmul.mubr.bf16.gmra.mrb[172].mxu1 %v4827_v49 }
0x138a   : > { %v6846_v53 = vpop.f32.mrb[160].mxu1 }
0x138b   : > { %v4941_v54 = vadd.f32 %v6846_v53, %v8125_v52  ;;  %v4932_v51 = vpop.f32.mrb[161].mxu1 }
0x138c   : > { %v4933_v43 = vadd.f32 %v8125_v52, %v4932_v51  ;;  %v6847_v61 = vpop.f32.mrb[162].mxu1 }
0x138d   : > { %v4997_v62 = vadd.f32 %v4941_v54, %v7554_v3  ;;  %v4944_v63 = vadd.f32 %v6847_v61, %v8125_v52  ;;  %v4935_v8 = vpop.f32.mrb[163].mxu1 }
0x138e   : > { %v4995_v48 = vadd.f32 %v4933_v43, %v7550_v1  ;;  %v4936_v11 = vadd.f32 %v8125_v52, %v4935_v8 }
0x138f   : > { %v5059_v44 = vmul.f32 %v8131_v41, %v4997_v62  ;;  %v4998_v3 = vadd.f32 %v4944_v63, %v7548_v0 }
0x1390   : > { %v5057_v12 = vmul.f32 %v8131_v41, %v4995_v48  ;;  %v4996_v27 = vadd.f32 %v4936_v11, %v7552_v2 }
0x1391   : > { %5075 = vst [vmem:[%s8140_s15 + $0x10] sm:$0xff] %v5059_v44  ;;  %v5060_v13 = vmul.f32 %v8131_v41, %v4998_v3 }
0x1392   : > { %5073 = vst [vmem:[%s8140_s15] sm:$0xff] %v5057_v12  ;;  %v5058_v15 = vmul.f32 %v8131_v41, %v4996_v27  ;;  %v6850_v47 = vpop.f32.mrb[164].mxu1 }
0x1393   : > { %5076 = vst [vmem:[%s8140_s15 + $0x18] sm:$0xff] %v5060_v13  ;;  %v4957_v1 = vadd.f32 %v6850_v47, %v8125_v52  ;;  %v4948_v17 = vpop.f32.mrb[165].mxu1 }
0x1394   : > { %5074 = vst [vmem:[%s8140_s15 + $0x8] sm:$0xff] %v5058_v15  ;;  %v4949_v0 = vadd.f32 %v8125_v52, %v4948_v17  ;;  %v6851_v16 = vpop.f32.mrb[166].mxu1 }
0x1395   : > { %v5001_v2 = vadd.f32 %v4957_v1, %v7580_v21  ;;  %v4960_v22 = vadd.f32 %v6851_v16, %v8125_v52  ;;  %v4951_v24 = vpop.f32.mrb[167].mxu1 }
0x1396   : > { %v4999_v9 = vadd.f32 %v4949_v0, %v7576_v19  ;;  %v4952_v26 = vadd.f32 %v8125_v52, %v4951_v24 }
0x1397   : > { %v5063_v4 = vmul.f32 %v8131_v41, %v5001_v2  ;;  %v5002_v29 = vadd.f32 %v4960_v22, %v7574_v18 }
0x1398   : > { %v5061_v30 = vmul.f32 %v8131_v41, %v4999_v9  ;;  %v5000_v31 = vadd.f32 %v4952_v26, %v7578_v20 }
0x1399   : > { %5079 = vst [vmem:[%s8140_s15 + $0x30] sm:$0xff] %v5063_v4  ;;  %v5064_v14 = vmul.f32 %v8131_v41, %v5002_v29 }
0x139a   : > { %5077 = vst [vmem:[%s8140_s15 + $0x20] sm:$0xff] %v5061_v30  ;;  %v5062_v21 = vmul.f32 %v8131_v41, %v5000_v31  ;;  %v6854_v34 = vpop.f32.mrb[168].mxu1 }
0x139b   : > { %5080 = vst [vmem:[%s8140_s15 + $0x38] sm:$0xff] %v5064_v14  ;;  %v4973_v19 = vadd.f32 %v6854_v34, %v8125_v52  ;;  %v4964_v35 = vpop.f32.mrb[169].mxu1 }
0x139c   : > { %5078 = vst [vmem:[%s8140_s15 + $0x28] sm:$0xff] %v5062_v21  ;;  %v4965_v18 = vadd.f32 %v8125_v52, %v4964_v35  ;;  %v6855_v10 = vpop.f32.mrb[170].mxu1 }
0x139d   : > { %v5005_v20 = vadd.f32 %v4973_v19, %v7606_v39  ;;  %v4976_v42 = vadd.f32 %v6855_v10, %v8125_v52  ;;  %v4967_v7 = vpop.f32.mrb[171].mxu1 }
0x139e   : > { %v5003_v5 = vadd.f32 %v4965_v18, %v7602_v37  ;;  %v4968_v28 = vadd.f32 %v8125_v52, %v4967_v7 }
0x139f   : > { %v5067_v6 = vmul.f32 %v8131_v41, %v5005_v20  ;;  %v5006_v23 = vadd.f32 %v4976_v42, %v7600_v36 }
0x13a0   : > { %v5065_v25 = vmul.f32 %v8131_v41, %v5003_v5  ;;  %v5004_v33 = vadd.f32 %v4968_v28, %v7604_v38 }
0x13a1   : > { %5083 = vst [vmem:[%s8140_s15 + $0x50] sm:$0xff] %v5067_v6  ;;  %v5068_v32 = vmul.f32 %v8131_v41, %v5006_v23 }
0x13a2   : > { %5081 = vst [vmem:[%s8140_s15 + $0x40] sm:$0xff] %v5065_v25  ;;  %v5066_v39 = vmul.f32 %v8131_v41, %v5004_v33  ;;  %v6858_v59 = vpop.f32.mrb[172].mxu1 }
0x13a3   : > { %5084 = vst [vmem:[%s8140_s15 + $0x58] sm:$0xff] %v5068_v32  ;;  %v4989_v37 = vadd.f32 %v6858_v59, %v8125_v52  ;;  %v4980_v60 = vpop.f32.mrb[173].mxu1 }
0x13a4   : > { %5082 = vst [vmem:[%s8140_s15 + $0x48] sm:$0xff] %v5066_v39  ;;  %v4981_v36 = vadd.f32 %v8125_v52, %v4980_v60  ;;  %v6859_v45 = vpop.f32.mrb[174].mxu1 }
0x13a5   : > { %v5009_v38 = vadd.f32 %v4989_v37, %v7632_v58  ;;  %v4992_v40 = vadd.f32 %v6859_v45, %v8125_v52  ;;  %v4983_v46 = vpop.f32.mrb[175].mxu1 }
0x13a6   : > { %v5007_v49 = vadd.f32 %v4981_v36, %v7628_v56  ;;  %v4984_v50 = vadd.f32 %v8125_v52, %v4983_v46 }
0x13a7   : > { %v5071_v53 = vmul.f32 %v8131_v41, %v5009_v38  ;;  %v5010_v54 = vadd.f32 %v4992_v40, %v7626_v55 }
0x13a8   : > { %v5069_v51 = vmul.f32 %v8131_v41, %v5007_v49  ;;  %v5008_v43 = vadd.f32 %v4984_v50, %v7630_v57 }
0x13a9   : > { %5087 = vst [vmem:[%s8140_s15 + $0x70] sm:$0xff] %v5071_v53  ;;  %v5072_v61 = vmul.f32 %v8131_v41, %v5010_v54 }
0x13aa   : > { %5085 = vst [vmem:[%s8140_s15 + $0x60] sm:$0xff] %v5069_v51  ;;  %v5070_v58 = vmul.f32 %v8131_v41, %v5008_v43 }
0x13ab   : > { %5088 = vst [vmem:[%s8140_s15 + $0x78] sm:$0xff] %v5072_v61 }
0x13ac   : > { %5086 = vst [vmem:[%s8140_s15 + $0x68] sm:$0xff] %v5070_v58 }
0x13ad PF: > { %s22_s30 = sadd.s32 1, %s7233_s30  }
0x13ae   : > { %p19_p5 = scmp.ge.s32.totalorder %s22_s30, 4  }
0x13b0   :  { %21 = sbr.rel (!%p19_p5) target bundleno = 2 (0x2), region = 130 }
0x13b7   :  { %5128 = vsyncpa [#allocation3], 1 }
0x13b8   :  { %5130 = vsyncpa [#allocation3 + $0x1], 1 }
0x13b9   :  { %5131 = vsyncpa [#allocation5], 1 }

</bundles_post_ra>
